<compile_context>
chip_gen: v7x
topology: tpu7x:2x2x1
jax: 0.10.0
libtpu: 0.0.40
codegen_flags: <defaults>
</compile_context>

<pallas_src>
import functools

import jax
import jax.numpy as jnp
from jax.experimental import pallas as pl
from jax.experimental.pallas import tpu as pltpu


# ---------------------------------------------------------------------------
# Tiling helpers
# ---------------------------------------------------------------------------
def _round_up(x, m):
    return ((x + m - 1) // m) * m


def _pick_m_tiling(m, cap=256):
    """Return (padded_m, tile_m).

    cap=256 keeps the double-buffered (tm, K) + (K, Cout) + (tm, Cout) blocks
    a few MiB even for K=4608, comfortably inside the default scoped-VMEM
    budget on v5e/v6e and the smaller 64 MiB VMEM of v7x (where tm should stay
    at or below roughly half the v6e choice).  Rows are padded to multiples of
    16 to match bf16 sublane packing.
    """
    if m <= cap:
        mp = max(16, _round_up(m, 16))
        return mp, mp
    mp = _round_up(m, 128)
    tm = cap if mp % cap == 0 else 128
    return mp, tm


def _pad_axis(a, axis, new_size):
    if a.shape[axis] == new_size:
        return a
    pad = [(0, 0)] * a.ndim
    pad[axis] = (0, new_size - a.shape[axis])
    return jnp.pad(a, pad)


# ---------------------------------------------------------------------------
# Pallas kernel 1: batched PReLU(A @ W + bias) -- conv lowered to matmul.
# Grid = (branch, M tiles); tk == K (single reduction step) so there is no
# accumulator scratch and the epilogue writes directly into out_ref.
# ---------------------------------------------------------------------------
def _branch_matmul_kernel(a_ref, w_ref, bias_ref, alpha_ref, out_ref):
    acc = jnp.dot(a_ref[...], w_ref[...], preferred_element_type=jnp.float32)
    y = acc + bias_ref[...]                                 # (tm,Co)+(1,Co)
    out_ref[...] = jnp.where(y > 0.0, y, alpha_ref[...] * y).astype(out_ref.dtype)


def batched_matmul_bias_prelu(a, w, bias, alpha, *, out_dtype=jnp.bfloat16,
                              tm_cap=256):
    """PReLU(A @ W + bias), batched over a leading branch axis.

    a:     (B, M, K)    bf16 activations (flattened / im2col'd).
    w:     (B, K, Cout) bf16 conv weights with the BN scale folded in.
    bias:  (B, Cout)    f32 fused BN bias (beta + (conv_b - mean) * scale).
    alpha: (B, 1)       f32 PReLU slope (nn.PReLU() single parameter).
    Returns (B, M, Cout) in out_dtype; accumulation is f32 on the MXU.
    """
    B, M, K = a.shape
    Cout = w.shape[-1]
    Mp, tm = _pick_m_tiling(M, cap=tm_cap)
    a = _pad_axis(a.astype(jnp.bfloat16), 1, Mp)
    w = w.astype(jnp.bfloat16)
    bias3 = bias.astype(jnp.float32).reshape(B, 1, Cout)
    alpha3 = jnp.broadcast_to(
        alpha.astype(jnp.float32).reshape(B, 1, -1), (B, 1, Cout))

    out = pl.pallas_call(
        _branch_matmul_kernel,
        out_shape=jax.ShapeDtypeStruct((B, Mp, Cout), out_dtype),
        grid_spec=pltpu.PrefetchScalarGridSpec(
            num_scalar_prefetch=0,
            grid=(B, Mp // tm),
            in_specs=[
                pl.BlockSpec((None, tm, K), lambda b, i: (b, i, 0)),
                pl.BlockSpec((None, K, Cout), lambda b, i: (b, 0, 0)),
                pl.BlockSpec((None, 1, Cout), lambda b, i: (b, 0, 0)),
                pl.BlockSpec((None, 1, Cout), lambda b, i: (b, 0, 0)),
            ],
            out_specs=pl.BlockSpec((None, tm, Cout), lambda b, i: (b, i, 0)),
        ),
        compiler_params=pltpu.CompilerParams(
            dimension_semantics=("parallel", "parallel")),
    )(a, w, bias3, alpha3)
    return out[:, :M] if Mp != M else out


# ---------------------------------------------------------------------------
# Pallas kernel 2: fuse conv (640 -> 512) + BN + PReLU for both heads.
# The (M, 5*128) concat is never materialized: the four 128-wide branch
# outputs are matmul'd against matching row-slices of the fuse weight and
# summed in an f32 accumulator; the conv5 branch (constant over H,W) is
# pre-folded into rb_ref together with the BN bias (per image).
# ---------------------------------------------------------------------------
def _fuse_matmul_kernel(c1_ref, c2_ref, c3_ref, c4_ref, w_ref, rb_ref,
                        alpha_ref, out_ref):
    cb = c1_ref.shape[-1]
    acc = jnp.dot(c1_ref[...], w_ref[0 * cb:1 * cb, :],
                  preferred_element_type=jnp.float32)
    acc = acc + jnp.dot(c2_ref[...], w_ref[1 * cb:2 * cb, :],
                        preferred_element_type=jnp.float32)
    acc = acc + jnp.dot(c3_ref[...], w_ref[2 * cb:3 * cb, :],
                        preferred_element_type=jnp.float32)
    acc = acc + jnp.dot(c4_ref[...], w_ref[3 * cb:4 * cb, :],
                        preferred_element_type=jnp.float32)
    y = acc + rb_ref[...]                                   # (t,512)+(1,512)
    out_ref[...] = jnp.where(y > 0.0, y, alpha_ref[...] * y).astype(out_ref.dtype)


def fuse_heads(c1, c2, c3, c4, w14, rowbias, alpha, *, t_cap=256):
    """Fused 1x1 'fuse' conv + BN + PReLU for both SE heads.

    c1..c4:  (Hh, N, HW, 128) bf16 branch outputs (conv1, conv2, conv3, conv4).
    w14:     (Hh, 512, 512)   fuse weight rows for c1..c4 (BN scale folded in).
    rowbias: (Hh, N, 512)     f32 per-image bias = BN bias + c5 @ W_fuse[512:].
    alpha:   (Hh, 1)          f32 PReLU slope.
    """
    Hh, N, HW, Cb = c1.shape
    Co = w14.shape[-1]
    HWp, t = _pick_m_tiling(HW, cap=t_cap)
    c1, c2, c3, c4 = [_pad_axis(c.astype(jnp.bfloat16), 2, HWp)
                      for c in (c1, c2, c3, c4)]
    alpha3 = jnp.broadcast_to(
        alpha.astype(jnp.float32).reshape(Hh, 1, -1), (Hh, 1, Co))

    out = pl.pallas_call(
        _fuse_matmul_kernel,
        out_shape=jax.ShapeDtypeStruct((Hh, N, HWp, Co), jnp.float32),
        grid_spec=pltpu.PrefetchScalarGridSpec(
            num_scalar_prefetch=0,
            grid=(Hh, N, HWp // t),
            in_specs=[
                pl.BlockSpec((None, None, t, Cb), lambda h, n, j: (h, n, j, 0)),
                pl.BlockSpec((None, None, t, Cb), lambda h, n, j: (h, n, j, 0)),
                pl.BlockSpec((None, None, t, Cb), lambda h, n, j: (h, n, j, 0)),
                pl.BlockSpec((None, None, t, Cb), lambda h, n, j: (h, n, j, 0)),
                pl.BlockSpec((None, 4 * Cb, Co), lambda h, n, j: (h, 0, 0)),
                pl.BlockSpec((None, 1, Co), lambda h, n, j: (h, n, 0)),
                pl.BlockSpec((None, 1, Co), lambda h, n, j: (h, 0, 0)),
            ],
            out_specs=pl.BlockSpec((None, None, t, Co),
                                   lambda h, n, j: (h, n, j, 0)),
        ),
        compiler_params=pltpu.CompilerParams(
            dimension_semantics=("parallel", "parallel", "parallel")),
    )(c1, c2, c3, c4, w14.astype(jnp.bfloat16),
      rowbias.astype(jnp.float32), alpha3)
    return out[:, :, :HW] if HWp != HW else out


# ---------------------------------------------------------------------------
# Glue: im2col for dilated 3x3 convs (padding == dilation keeps H, W) and
# BN-folding helpers.  Pure pads / reshapes stay in plain JAX.
# ---------------------------------------------------------------------------
def im2col_dilated3x3(x_nhwc, d):
    # TODO(synk): replace with an in-kernel 9-tap accumulation over shifted
    # NHWC views to avoid materializing the 9x-expanded column in HBM.
    N, H, W, C = x_nhwc.shape
    xp = jnp.pad(x_nhwc, ((0, 0), (d, d), (d, d), (0, 0)))
    taps = []
    for i in range(3):
        for j in range(3):
            taps.append(xp[:, i * d:i * d + H, j * d:j * d + W, :])
    col = jnp.stack(taps, axis=3)            # (N, H, W, 9, C), tap-major
    return col.reshape(N * H * W, 9 * C)


def _fold_bn(p, eps=1e-5):
    """Fold BN scale into the conv weight; return ((K, Cout) W', (Cout,) bias')."""
    s = p["gamma"] / jnp.sqrt(p["var"] + eps)
    w = (p["w"] * s).reshape(-1, p["w"].shape[-1])
    b = p["beta"] + (p["b"] - p["mean"]) * s
    return w, b


def _stack_branches(plist):
    ws, bs, als = [], [], []
    for p in plist:
        w, b = _fold_bn(p)
        ws.append(w)
        bs.append(b)
        als.append(p["alpha"])
    return (jnp.stack(ws).astype(jnp.bfloat16), jnp.stack(bs), jnp.stack(als))


def init_branch(key, cin, cout, ksize):
    ks = jax.random.split(key, 6)
    # weight stored as (kh, kw, cin, cout); row-major flatten matches the
    # tap-major im2col ordering.
    w = jax.random.normal(ks[0], (ksize, ksize, cin, cout), jnp.float32) * 0.02
    b = jax.random.normal(ks[1], (cout,), jnp.float32) * 0.01
    gamma = 1.0 + 0.1 * jax.random.normal(ks[2], (cout,), jnp.float32)
    beta = 0.1 * jax.random.normal(ks[3], (cout,), jnp.float32)
    mean = 0.1 * jax.random.normal(ks[4], (cout,), jnp.float32)
    var = jnp.abs(jax.random.normal(ks[5], (cout,), jnp.float32)) * 0.1 + 0.5
    alpha = jnp.full((1,), 0.25, jnp.float32)  # nn.PReLU() default init
    return dict(w=w, b=b, gamma=gamma, beta=beta, mean=mean, var=var,
                alpha=alpha)


def init_se_params(key):
    ks = jax.random.split(key, 6)
    return dict(
        conv1=init_branch(ks[0], 512, 128, 1),
        conv2=init_branch(ks[1], 512, 128, 3),
        conv3=init_branch(ks[2], 512, 128, 3),
        conv4=init_branch(ks[3], 512, 128, 3),
        conv5=init_branch(ks[4], 512, 128, 1),
        fuse=init_branch(ks[5], 5 * 128, 512, 1),
    )


def init_net_params(key):
    k1, k2 = jax.random.split(key)
    return dict(rgb_global=init_se_params(k1), t_global=init_se_params(k2))


# ---------------------------------------------------------------------------
# net forward: both SE heads share each Pallas grid via a leading branch axis.
# ---------------------------------------------------------------------------
def net_forward(params, x1, x2):
    # TODO(synk): the resnet34 backbones, mfe attention blocks and
    # aggregation_scale CP heads referenced by `net` are not defined in the
    # provided source; only the SE global-context heads are implemented here,
    # taking the layer-4 feature maps (512 channels) directly as inputs.
    heads = (params["rgb_global"], params["t_global"])
    Hh = len(heads)

    x = jnp.stack([x1, x2], axis=0).astype(jnp.float32)     # (2, N, 512, H, W)
    x = jnp.transpose(x, (0, 1, 3, 4, 2))                   # (2, N, H, W, 512)
    _, N, H, W, C = x.shape
    HW, M = H * W, N * H * W
    x_bf = x.astype(jnp.bfloat16)

    # conv1 (1x1) for both heads in one batched call (B = 2).
    w1, b1, al1 = _stack_branches([p["conv1"] for p in heads])
    c1 = batched_matmul_bias_prelu(x_bf.reshape(Hh, M, C), w1, b1, al1)

    # conv2/3/4 (dilated 3x3) for both heads in one batched call (B = 6),
    # ordered dilation-major so the outputs reshape into per-dilation slabs.
    dil_ps, cols = [], []
    for name, d in (("conv2", 2), ("conv3", 4), ("conv4", 6)):
        for h in range(Hh):
            dil_ps.append(heads[h][name])
            cols.append(im2col_dilated3x3(x_bf[h], d))
    w2, b2, al2 = _stack_branches(dil_ps)
    cdil = batched_matmul_bias_prelu(jnp.stack(cols), w2, b2, al2)  # (6, M, 128)

    # conv5: global average pool -> 1x1 conv/BN/PReLU.  Bilinear upsample of a
    # 1x1 map is a constant broadcast over H, W, so instead of expanding it to
    # (M, 128) and pushing it through the fuse matmul, its contribution is
    # folded into the fuse conv's per-image bias below.
    pooled = jnp.mean(x, axis=(2, 3))                        # (2, N, 512) f32
    w5, b5, al5 = _stack_branches([p["conv5"] for p in heads])
    c5 = batched_matmul_bias_prelu(pooled.astype(jnp.bfloat16), w5, b5, al5,
                                   out_dtype=jnp.float32)    # (2, N, 128)

    # fuse (1x1, 640 -> 512): BN scale folded into the weights; rows 512:640
    # (the c5 slice) are contracted with c5 ahead of time into a per-image bias.
    wf_l, bf_l, alf_l = [], [], []
    for p in heads:
        wfull, bfull = _fold_bn(p["fuse"])
        wf_l.append(wfull)
        bf_l.append(bfull)
        alf_l.append(p["fuse"]["alpha"])
    wf = jnp.stack(wf_l)                                     # (2, 640, 512) f32
    bf = jnp.stack(bf_l)                                     # (2, 512)
    alf = jnp.stack(alf_l)                                   # (2, 1)
    rowbias = bf[:, None, :] + jnp.einsum("hnc,hco->hno", c5,
                                          wf[:, 4 * 128:, :])  # (2, N, 512)

    cd = cdil.reshape(3, Hh, N, HW, 128)                     # per-dilation slabs
    out = fuse_heads(c1.reshape(Hh, N, HW, 128), cd[0], cd[1], cd[2],
                     wf[:, :4 * 128, :], rowbias, alf)       # (2, N, HW, 512)

    out = out.reshape(Hh, N, H, W, 512).transpose(0, 1, 4, 2, 3)  # NCHW
    return out[0], out[1]


# ---------------------------------------------------------------------------
# Plain-JAX f32 reference of SE.forward (for numerical validation only).
# ---------------------------------------------------------------------------
def _branch_ref(p, a):
    w = p["w"].reshape(-1, p["w"].shape[-1])
    z = a @ w + p["b"]
    s = p["gamma"] / jnp.sqrt(p["var"] + 1e-5)
    y = (z - p["mean"]) * s + p["beta"]
    return jnp.where(y > 0, y, p["alpha"] * y)


def se_reference(sp, x_nchw):
    x = jnp.transpose(x_nchw, (0, 2, 3, 1)).astype(jnp.float32)
    N, H, W, C = x.shape
    M = N * H * W
    xf = x.reshape(M, C)
    c1 = _branch_ref(sp["conv1"], xf)
    c2 = _branch_ref(sp["conv2"], im2col_dilated3x3(x, 2))
    c3 = _branch_ref(sp["conv3"], im2col_dilated3x3(x, 4))
    c4 = _branch_ref(sp["conv4"], im2col_dilated3x3(x, 6))
    pooled = jnp.mean(x, axis=(1, 2))                        # (N, 512)
    c5s = _branch_ref(sp["conv5"], pooled)                   # (N, 128)
    c5 = jnp.broadcast_to(c5s[:, None, :], (N, H * W, 128)).reshape(M, 128)
    cat = jnp.concatenate([c1, c2, c3, c4, c5], axis=-1)
    out = _branch_ref(sp["fuse"], cat)                       # (M, 512)
    return out.reshape(N, H, W, 512).transpose(0, 3, 1, 2)


if __name__ == "__main__":
    key = jax.random.PRNGKey(0)
    kp, kx, ky = jax.random.split(key, 3)
    params = init_net_params(kp)

    # Small synthetic layer-4 features: NCHW, 512 channels, 8x8 spatial.
    x1 = jax.random.normal(kx, (1, 512, 8, 8), jnp.float32)
    x2 = jax.random.normal(ky, (1, 512, 8, 8), jnp.float32)

    fwd = jax.jit(functools.partial(net_forward, params))
    rgb_global, t_global = fwd(x1, x2)
    jax.block_until_ready((rgb_global, t_global))

    assert rgb_global.shape == (1, 512, 8, 8)
    assert t_global.shape == (1, 512, 8, 8)
    assert bool(jnp.all(jnp.isfinite(rgb_global)))
    assert bool(jnp.all(jnp.isfinite(t_global)))

    # Validate against the plain-JAX f32 reference (bf16 MXU inputs -> loose tol).
    ref_rgb = se_reference(params["rgb_global"], x1)
    ref_t = se_reference(params["t_global"], x2)
    err = max(float(jnp.max(jnp.abs(rgb_global - ref_rgb))),
              float(jnp.max(jnp.abs(t_global - ref_t))))
    assert err < 0.2, f"max abs error vs f32 reference too large: {err}"

    print("KERNEL_OK")
</pallas_src>

<mosaic_0001>
module attributes {stable_mosaic.version = 11 : i64} {
  func.func @_branch_matmul_kernel(%arg0: i32, %arg1: i32, %arg2: memref<1x64x512xbf16, #tpu.memory_space<vmem>>, %arg3: memref<1x512x128xbf16, #tpu.memory_space<vmem>>, %arg4: memref<1x1x128xf32, #tpu.memory_space<vmem>>, %arg5: memref<1x1x128xf32, #tpu.memory_space<vmem>>, %arg6: memref<1x64x128xbf16, #tpu.memory_space<vmem>>) attributes {dimension_semantics = [#tpu.dimension_semantics<parallel>, #tpu.dimension_semantics<parallel>], iteration_bounds = array<i64: 2, 1>, scalar_prefetch = 0 : i64, scratch_operands = 0 : i64, tpu.core_type = #tpu.core_type<tc>, window_params = [{transform_indices = @transform_0, window_bounds = array<i64: 1, 64, 512>}, {transform_indices = @transform_1, window_bounds = array<i64: 1, 512, 128>}, {transform_indices = @transform_2, window_bounds = array<i64: 1, 1, 128>}, {transform_indices = @transform_3, window_bounds = array<i64: 1, 1, 128>}, {transform_indices = @transform_4, window_bounds = array<i64: 1, 64, 128>}]} {
    %c0 = arith.constant 0 : index
    %c0_0 = arith.constant 0 : index
    %c0_1 = arith.constant 0 : index
    %0 = vector.load %arg2[%c0, %c0_0, %c0_1] : memref<1x64x512xbf16, #tpu.memory_space<vmem>>, vector<1x64x512xbf16>
    %1 = vector.shape_cast %0 : vector<1x64x512xbf16> to vector<64x512xbf16>
    %c0_2 = arith.constant 0 : index
    %c0_3 = arith.constant 0 : index
    %c0_4 = arith.constant 0 : index
    %2 = vector.load %arg3[%c0_2, %c0_3, %c0_4] : memref<1x512x128xbf16, #tpu.memory_space<vmem>>, vector<1x512x128xbf16>
    %3 = vector.shape_cast %2 : vector<1x512x128xbf16> to vector<512x128xbf16>
    %cst = arith.constant dense<0.000000e+00> : vector<64x128xf32>
    %4 = tpu.matmul %1, %3, %cst {dimension_numbers = #tpu.dot_dimension_numbers<[1], [0], [0], [1], [0, 0, 1, 1], [], []>} : vector<64x512xbf16>, vector<512x128xbf16>, vector<64x128xf32> -> vector<64x128xf32>
    %c0_5 = arith.constant 0 : index
    %c0_6 = arith.constant 0 : index
    %c0_7 = arith.constant 0 : index
    %5 = vector.load %arg4[%c0_5, %c0_6, %c0_7] : memref<1x1x128xf32, #tpu.memory_space<vmem>>, vector<1x1x128xf32>
    %6 = vector.shape_cast %5 : vector<1x1x128xf32> to vector<1x128xf32>
    %7 = vector.broadcast %6 : vector<1x128xf32> to vector<64x128xf32>
    %8 = arith.addf %4, %7 : vector<64x128xf32>
    %cst_8 = arith.constant 0.000000e+00 : f32
    %9 = vector.broadcast %cst_8 : f32 to vector<64x128xf32>
    %10 = arith.cmpf ogt, %8, %9 : vector<64x128xf32>
    %c0_9 = arith.constant 0 : index
    %c0_10 = arith.constant 0 : index
    %c0_11 = arith.constant 0 : index
    %11 = vector.load %arg5[%c0_9, %c0_10, %c0_11] : memref<1x1x128xf32, #tpu.memory_space<vmem>>, vector<1x1x128xf32>
    %12 = vector.shape_cast %11 : vector<1x1x128xf32> to vector<1x128xf32>
    %13 = vector.broadcast %12 : vector<1x128xf32> to vector<64x128xf32>
    %14 = arith.mulf %13, %8 : vector<64x128xf32>
    %15 = arith.select %10, %8, %14 : vector<64x128xi1>, vector<64x128xf32>
    %16 = arith.truncf %15 : vector<64x128xf32> to vector<64x128xbf16>
    %c0_12 = arith.constant 0 : index
    %c0_13 = arith.constant 0 : index
    %c0_14 = arith.constant 0 : index
    %17 = vector.load %arg6[%c0_12, %c0_13, %c0_14] : memref<1x64x128xbf16, #tpu.memory_space<vmem>>, vector<1x64x128xbf16>
    %18 = vector.shape_cast %17 : vector<1x64x128xbf16> to vector<64x128xbf16>
    %19 = vector.shape_cast %16 : vector<64x128xbf16> to vector<1x64x128xbf16>
    tpu.vector_store %arg6[%c0_12, %c0_13, %c0_14], %19 {strides = array<i32>} : memref<1x64x128xbf16, #tpu.memory_space<vmem>>, vector<1x64x128xbf16>,
    return
  }
  func.func @transform_0(%arg0: i32, %arg1: i32) -> (i32, i32, i32) {
    %c0_i32 = arith.constant 0 : i32
    %c0_i32_0 = arith.constant 0 : i32
    return %arg0, %arg1, %c0_i32 : i32, i32, i32
  }
  func.func @transform_1(%arg0: i32, %arg1: i32) -> (i32, i32, i32) {
    %c0_i32 = arith.constant 0 : i32
    %c0_i32_0 = arith.constant 0 : i32
    %c0_i32_1 = arith.constant 0 : i32
    return %arg0, %c0_i32, %c0_i32_0 : i32, i32, i32
  }
  func.func @transform_2(%arg0: i32, %arg1: i32) -> (i32, i32, i32) {
    %c0_i32 = arith.constant 0 : i32
    %c0_i32_0 = arith.constant 0 : i32
    %c0_i32_1 = arith.constant 0 : i32
    return %arg0, %c0_i32, %c0_i32_0 : i32, i32, i32
  }
  func.func @transform_3(%arg0: i32, %arg1: i32) -> (i32, i32, i32) {
    %c0_i32 = arith.constant 0 : i32
    %c0_i32_0 = arith.constant 0 : i32
    %c0_i32_1 = arith.constant 0 : i32
    return %arg0, %c0_i32, %c0_i32_0 : i32, i32, i32
  }
  func.func @transform_4(%arg0: i32, %arg1: i32) -> (i32, i32, i32) {
    %c0_i32 = arith.constant 0 : i32
    %c0_i32_0 = arith.constant 0 : i32
    return %arg0, %arg1, %c0_i32 : i32, i32, i32
  }
}

module attributes {stable_mosaic.version = 11 : i64} {
  func.func @_branch_matmul_kernel(%arg0: i32, %arg1: i32, %arg2: memref<1x64x4608xbf16, #tpu.memory_space<vmem>>, %arg3: memref<1x4608x128xbf16, #tpu.memory_space<vmem>>, %arg4: memref<1x1x128xf32, #tpu.memory_space<vmem>>, %arg5: memref<1x1x128xf32, #tpu.memory_space<vmem>>, %arg6: memref<1x64x128xbf16, #tpu.memory_space<vmem>>) attributes {dimension_semantics = [#tpu.dimension_semantics<parallel>, #tpu.dimension_semantics<parallel>], iteration_bounds = array<i64: 6, 1>, scalar_prefetch = 0 : i64, scratch_operands = 0 : i64, tpu.core_type = #tpu.core_type<tc>, window_params = [{transform_indices = @transform_0, window_bounds = array<i64: 1, 64, 4608>}, {transform_indices = @transform_1, window_bounds = array<i64: 1, 4608, 128>}, {transform_indices = @transform_2, window_bounds = array<i64: 1, 1, 128>}, {transform_indices = @transform_3, window_bounds = array<i64: 1, 1, 128>}, {transform_indices = @transform_4, window_bounds = array<i64: 1, 64, 128>}]} {
    %c0 = arith.constant 0 : index
    %c0_0 = arith.constant 0 : index
    %c0_1 = arith.constant 0 : index
    %0 = vector.load %arg2[%c0, %c0_0, %c0_1] : memref<1x64x4608xbf16, #tpu.memory_space<vmem>>, vector<1x64x4608xbf16>
    %1 = vector.shape_cast %0 : vector<1x64x4608xbf16> to vector<64x4608xbf16>
    %c0_2 = arith.constant 0 : index
    %c0_3 = arith.constant 0 : index
    %c0_4 = arith.constant 0 : index
    %2 = vector.load %arg3[%c0_2, %c0_3, %c0_4] : memref<1x4608x128xbf16, #tpu.memory_space<vmem>>, vector<1x4608x128xbf16>
    %3 = vector.shape_cast %2 : vector<1x4608x128xbf16> to vector<4608x128xbf16>
    %cst = arith.constant dense<0.000000e+00> : vector<64x128xf32>
    %4 = tpu.matmul %1, %3, %cst {dimension_numbers = #tpu.dot_dimension_numbers<[1], [0], [0], [1], [0, 0, 1, 1], [], []>} : vector<64x4608xbf16>, vector<4608x128xbf16>, vector<64x128xf32> -> vector<64x128xf32>
    %c0_5 = arith.constant 0 : index
    %c0_6 = arith.constant 0 : index
    %c0_7 = arith.constant 0 : index
    %5 = vector.load %arg4[%c0_5, %c0_6, %c0_7] : memref<1x1x128xf32, #tpu.memory_space<vmem>>, vector<1x1x128xf32>
    %6 = vector.shape_cast %5 : vector<1x1x128xf32> to vector<1x128xf32>
    %7 = vector.broadcast %6 : vector<1x128xf32> to vector<64x128xf32>
    %8 = arith.addf %4, %7 : vector<64x128xf32>
    %cst_8 = arith.constant 0.000000e+00 : f32
    %9 = vector.broadcast %cst_8 : f32 to vector<64x128xf32>
    %10 = arith.cmpf ogt, %8, %9 : vector<64x128xf32>
    %c0_9 = arith.constant 0 : index
    %c0_10 = arith.constant 0 : index
    %c0_11 = arith.constant 0 : index
    %11 = vector.load %arg5[%c0_9, %c0_10, %c0_11] : memref<1x1x128xf32, #tpu.memory_space<vmem>>, vector<1x1x128xf32>
    %12 = vector.shape_cast %11 : vector<1x1x128xf32> to vector<1x128xf32>
    %13 = vector.broadcast %12 : vector<1x128xf32> to vector<64x128xf32>
    %14 = arith.mulf %13, %8 : vector<64x128xf32>
    %15 = arith.select %10, %8, %14 : vector<64x128xi1>, vector<64x128xf32>
    %16 = arith.truncf %15 : vector<64x128xf32> to vector<64x128xbf16>
    %c0_12 = arith.constant 0 : index
    %c0_13 = arith.constant 0 : index
    %c0_14 = arith.constant 0 : index
    %17 = vector.load %arg6[%c0_12, %c0_13, %c0_14] : memref<1x64x128xbf16, #tpu.memory_space<vmem>>, vector<1x64x128xbf16>
    %18 = vector.shape_cast %17 : vector<1x64x128xbf16> to vector<64x128xbf16>
    %19 = vector.shape_cast %16 : vector<64x128xbf16> to vector<1x64x128xbf16>
    tpu.vector_store %arg6[%c0_12, %c0_13, %c0_14], %19 {strides = array<i32>} : memref<1x64x128xbf16, #tpu.memory_space<vmem>>, vector<1x64x128xbf16>,
    return
  }
  func.func @transform_0(%arg0: i32, %arg1: i32) -> (i32, i32, i32) {
    %c0_i32 = arith.constant 0 : i32
    %c0_i32_0 = arith.constant 0 : i32
    return %arg0, %arg1, %c0_i32 : i32, i32, i32
  }
  func.func @transform_1(%arg0: i32, %arg1: i32) -> (i32, i32, i32) {
    %c0_i32 = arith.constant 0 : i32
    %c0_i32_0 = arith.constant 0 : i32
    %c0_i32_1 = arith.constant 0 : i32
    return %arg0, %c0_i32, %c0_i32_0 : i32, i32, i32
  }
  func.func @transform_2(%arg0: i32, %arg1: i32) -> (i32, i32, i32) {
    %c0_i32 = arith.constant 0 : i32
    %c0_i32_0 = arith.constant 0 : i32
    %c0_i32_1 = arith.constant 0 : i32
    return %arg0, %c0_i32, %c0_i32_0 : i32, i32, i32
  }
  func.func @transform_3(%arg0: i32, %arg1: i32) -> (i32, i32, i32) {
    %c0_i32 = arith.constant 0 : i32
    %c0_i32_0 = arith.constant 0 : i32
    %c0_i32_1 = arith.constant 0 : i32
    return %arg0, %c0_i32, %c0_i32_0 : i32, i32, i32
  }
  func.func @transform_4(%arg0: i32, %arg1: i32) -> (i32, i32, i32) {
    %c0_i32 = arith.constant 0 : i32
    %c0_i32_0 = arith.constant 0 : i32
    return %arg0, %arg1, %c0_i32 : i32, i32, i32
  }
}

module attributes {stable_mosaic.version = 11 : i64} {
  func.func @_branch_matmul_kernel(%arg0: i32, %arg1: i32, %arg2: memref<1x16x512xbf16, #tpu.memory_space<vmem>>, %arg3: memref<1x512x128xbf16, #tpu.memory_space<vmem>>, %arg4: memref<1x1x128xf32, #tpu.memory_space<vmem>>, %arg5: memref<1x1x128xf32, #tpu.memory_space<vmem>>, %arg6: memref<1x16x128xf32, #tpu.memory_space<vmem>>) attributes {dimension_semantics = [#tpu.dimension_semantics<parallel>, #tpu.dimension_semantics<parallel>], iteration_bounds = array<i64: 2, 1>, scalar_prefetch = 0 : i64, scratch_operands = 0 : i64, tpu.core_type = #tpu.core_type<tc>, window_params = [{transform_indices = @transform_0, window_bounds = array<i64: 1, 16, 512>}, {transform_indices = @transform_1, window_bounds = array<i64: 1, 512, 128>}, {transform_indices = @transform_2, window_bounds = array<i64: 1, 1, 128>}, {transform_indices = @transform_3, window_bounds = array<i64: 1, 1, 128>}, {transform_indices = @transform_4, window_bounds = array<i64: 1, 16, 128>}]} {
    %c0 = arith.constant 0 : index
    %c0_0 = arith.constant 0 : index
    %c0_1 = arith.constant 0 : index
    %0 = vector.load %arg2[%c0, %c0_0, %c0_1] : memref<1x16x512xbf16, #tpu.memory_space<vmem>>, vector<1x16x512xbf16>
    %1 = vector.shape_cast %0 : vector<1x16x512xbf16> to vector<16x512xbf16>
    %c0_2 = arith.constant 0 : index
    %c0_3 = arith.constant 0 : index
    %c0_4 = arith.constant 0 : index
    %2 = vector.load %arg3[%c0_2, %c0_3, %c0_4] : memref<1x512x128xbf16, #tpu.memory_space<vmem>>, vector<1x512x128xbf16>
    %3 = vector.shape_cast %2 : vector<1x512x128xbf16> to vector<512x128xbf16>
    %cst = arith.constant dense<0.000000e+00> : vector<16x128xf32>
    %4 = tpu.matmul %1, %3, %cst {dimension_numbers = #tpu.dot_dimension_numbers<[1], [0], [0], [1], [0, 0, 1, 1], [], []>} : vector<16x512xbf16>, vector<512x128xbf16>, vector<16x128xf32> -> vector<16x128xf32>
    %c0_5 = arith.constant 0 : index
    %c0_6 = arith.constant 0 : index
    %c0_7 = arith.constant 0 : index
    %5 = vector.load %arg4[%c0_5, %c0_6, %c0_7] : memref<1x1x128xf32, #tpu.memory_space<vmem>>, vector<1x1x128xf32>
    %6 = vector.shape_cast %5 : vector<1x1x128xf32> to vector<1x128xf32>
    %7 = vector.broadcast %6 : vector<1x128xf32> to vector<16x128xf32>
    %8 = arith.addf %4, %7 : vector<16x128xf32>
    %cst_8 = arith.constant 0.000000e+00 : f32
    %9 = vector.broadcast %cst_8 : f32 to vector<16x128xf32>
    %10 = arith.cmpf ogt, %8, %9 : vector<16x128xf32>
    %c0_9 = arith.constant 0 : index
    %c0_10 = arith.constant 0 : index
    %c0_11 = arith.constant 0 : index
    %11 = vector.load %arg5[%c0_9, %c0_10, %c0_11] : memref<1x1x128xf32, #tpu.memory_space<vmem>>, vector<1x1x128xf32>
    %12 = vector.shape_cast %11 : vector<1x1x128xf32> to vector<1x128xf32>
    %13 = vector.broadcast %12 : vector<1x128xf32> to vector<16x128xf32>
    %14 = arith.mulf %13, %8 : vector<16x128xf32>
    %15 = arith.select %10, %8, %14 : vector<16x128xi1>, vector<16x128xf32>
    %c0_12 = arith.constant 0 : index
    %c0_13 = arith.constant 0 : index
    %c0_14 = arith.constant 0 : index
    %16 = vector.load %arg6[%c0_12, %c0_13, %c0_14] : memref<1x16x128xf32, #tpu.memory_space<vmem>>, vector<1x16x128xf32>
    %17 = vector.shape_cast %16 : vector<1x16x128xf32> to vector<16x128xf32>
    %18 = vector.shape_cast %15 : vector<16x128xf32> to vector<1x16x128xf32>
    tpu.vector_store %arg6[%c0_12, %c0_13, %c0_14], %18 {strides = array<i32>} : memref<1x16x128xf32, #tpu.memory_space<vmem>>, vector<1x16x128xf32>,
    return
  }
  func.func @transform_0(%arg0: i32, %arg1: i32) -> (i32, i32, i32) {
    %c0_i32 = arith.constant 0 : i32
    %c0_i32_0 = arith.constant 0 : i32
    return %arg0, %arg1, %c0_i32 : i32, i32, i32
  }
  func.func @transform_1(%arg0: i32, %arg1: i32) -> (i32, i32, i32) {
    %c0_i32 = arith.constant 0 : i32
    %c0_i32_0 = arith.constant 0 : i32
    %c0_i32_1 = arith.constant 0 : i32
    return %arg0, %c0_i32, %c0_i32_0 : i32, i32, i32
  }
  func.func @transform_2(%arg0: i32, %arg1: i32) -> (i32, i32, i32) {
    %c0_i32 = arith.constant 0 : i32
    %c0_i32_0 = arith.constant 0 : i32
    %c0_i32_1 = arith.constant 0 : i32
    return %arg0, %c0_i32, %c0_i32_0 : i32, i32, i32
  }
  func.func @transform_3(%arg0: i32, %arg1: i32) -> (i32, i32, i32) {
    %c0_i32 = arith.constant 0 : i32
    %c0_i32_0 = arith.constant 0 : i32
    %c0_i32_1 = arith.constant 0 : i32
    return %arg0, %c0_i32, %c0_i32_0 : i32, i32, i32
  }
  func.func @transform_4(%arg0: i32, %arg1: i32) -> (i32, i32, i32) {
    %c0_i32 = arith.constant 0 : i32
    %c0_i32_0 = arith.constant 0 : i32
    return %arg0, %arg1, %c0_i32 : i32, i32, i32
  }
}

module attributes {stable_mosaic.version = 11 : i64} {
  func.func @_fuse_matmul_kernel(%arg0: i32, %arg1: i32, %arg2: i32, %arg3: memref<1x1x64x128xbf16, #tpu.memory_space<vmem>>, %arg4: memref<1x1x64x128xbf16, #tpu.memory_space<vmem>>, %arg5: memref<1x1x64x128xbf16, #tpu.memory_space<vmem>>, %arg6: memref<1x1x64x128xbf16, #tpu.memory_space<vmem>>, %arg7: memref<1x512x512xbf16, #tpu.memory_space<vmem>>, %arg8: memref<1x1x512xf32, #tpu.memory_space<vmem>>, %arg9: memref<1x1x512xf32, #tpu.memory_space<vmem>>, %arg10: memref<1x1x64x512xf32, #tpu.memory_space<vmem>>) attributes {dimension_semantics = [#tpu.dimension_semantics<parallel>, #tpu.dimension_semantics<parallel>, #tpu.dimension_semantics<parallel>], iteration_bounds = array<i64: 2, 1, 1>, scalar_prefetch = 0 : i64, scratch_operands = 0 : i64, tpu.core_type = #tpu.core_type<tc>, window_params = [{transform_indices = @transform_0, window_bounds = array<i64: 1, 1, 64, 128>}, {transform_indices = @transform_1, window_bounds = array<i64: 1, 1, 64, 128>}, {transform_indices = @transform_2, window_bounds = array<i64: 1, 1, 64, 128>}, {transform_indices = @transform_3, window_bounds = array<i64: 1, 1, 64, 128>}, {transform_indices = @transform_4, window_bounds = array<i64: 1, 512, 512>}, {transform_indices = @transform_5, window_bounds = array<i64: 1, 1, 512>}, {transform_indices = @transform_6, window_bounds = array<i64: 1, 1, 512>}, {transform_indices = @transform_7, window_bounds = array<i64: 1, 1, 64, 512>}]} {
    %c0 = arith.constant 0 : index
    %c0_0 = arith.constant 0 : index
    %c0_1 = arith.constant 0 : index
    %c0_2 = arith.constant 0 : index
    %0 = vector.load %arg3[%c0, %c0_0, %c0_1, %c0_2] : memref<1x1x64x128xbf16, #tpu.memory_space<vmem>>, vector<1x1x64x128xbf16>
    %1 = vector.shape_cast %0 : vector<1x1x64x128xbf16> to vector<64x128xbf16>
    %c0_3 = arith.constant 0 : index
    %c0_4 = arith.constant 0 : index
    %c0_5 = arith.constant 0 : index
    %2 = vector.load %arg7[%c0_3, %c0_4, %c0_5] : memref<1x512x512xbf16, #tpu.memory_space<vmem>>, vector<1x128x512xbf16>
    %3 = vector.shape_cast %2 : vector<1x128x512xbf16> to vector<128x512xbf16>
    %cst = arith.constant dense<0.000000e+00> : vector<64x512xf32>
    %4 = tpu.matmul %1, %3, %cst {dimension_numbers = #tpu.dot_dimension_numbers<[1], [0], [0], [1], [0, 0, 1, 1], [], []>} : vector<64x128xbf16>, vector<128x512xbf16>, vector<64x512xf32> -> vector<64x512xf32>
    %c0_6 = arith.constant 0 : index
    %c0_7 = arith.constant 0 : index
    %c0_8 = arith.constant 0 : index
    %c0_9 = arith.constant 0 : index
    %5 = vector.load %arg4[%c0_6, %c0_7, %c0_8, %c0_9] : memref<1x1x64x128xbf16, #tpu.memory_space<vmem>>, vector<1x1x64x128xbf16>
    %6 = vector.shape_cast %5 : vector<1x1x64x128xbf16> to vector<64x128xbf16>
    %c0_10 = arith.constant 0 : index
    %c128 = arith.constant 128 : index
    %c0_11 = arith.constant 0 : index
    %7 = vector.load %arg7[%c0_10, %c128, %c0_11] : memref<1x512x512xbf16, #tpu.memory_space<vmem>>, vector<1x128x512xbf16>
    %8 = vector.shape_cast %7 : vector<1x128x512xbf16> to vector<128x512xbf16>
    %cst_12 = arith.constant dense<0.000000e+00> : vector<64x512xf32>
    %9 = tpu.matmul %6, %8, %cst_12 {dimension_numbers = #tpu.dot_dimension_numbers<[1], [0], [0], [1], [0, 0, 1, 1], [], []>} : vector<64x128xbf16>, vector<128x512xbf16>, vector<64x512xf32> -> vector<64x512xf32>
    %10 = arith.addf %4, %9 : vector<64x512xf32>
    %c0_13 = arith.constant 0 : index
    %c0_14 = arith.constant 0 : index
    %c0_15 = arith.constant 0 : index
    %c0_16 = arith.constant 0 : index
    %11 = vector.load %arg5[%c0_13, %c0_14, %c0_15, %c0_16] : memref<1x1x64x128xbf16, #tpu.memory_space<vmem>>, vector<1x1x64x128xbf16>
    %12 = vector.shape_cast %11 : vector<1x1x64x128xbf16> to vector<64x128xbf16>
    %c0_17 = arith.constant 0 : index
    %c256 = arith.constant 256 : index
    %c0_18 = arith.constant 0 : index
    %13 = vector.load %arg7[%c0_17, %c256, %c0_18] : memref<1x512x512xbf16, #tpu.memory_space<vmem>>, vector<1x128x512xbf16>
    %14 = vector.shape_cast %13 : vector<1x128x512xbf16> to vector<128x512xbf16>
    %cst_19 = arith.constant dense<0.000000e+00> : vector<64x512xf32>
    %15 = tpu.matmul %12, %14, %cst_19 {dimension_numbers = #tpu.dot_dimension_numbers<[1], [0], [0], [1], [0, 0, 1, 1], [], []>} : vector<64x128xbf16>, vector<128x512xbf16>, vector<64x512xf32> -> vector<64x512xf32>
    %16 = arith.addf %10, %15 : vector<64x512xf32>
    %c0_20 = arith.constant 0 : index
    %c0_21 = arith.constant 0 : index
    %c0_22 = arith.constant 0 : index
    %c0_23 = arith.constant 0 : index
    %17 = vector.load %arg6[%c0_20, %c0_21, %c0_22, %c0_23] : memref<1x1x64x128xbf16, #tpu.memory_space<vmem>>, vector<1x1x64x128xbf16>
    %18 = vector.shape_cast %17 : vector<1x1x64x128xbf16> to vector<64x128xbf16>
    %c0_24 = arith.constant 0 : index
    %c384 = arith.constant 384 : index
    %c0_25 = arith.constant 0 : index
    %19 = vector.load %arg7[%c0_24, %c384, %c0_25] : memref<1x512x512xbf16, #tpu.memory_space<vmem>>, vector<1x128x512xbf16>
    %20 = vector.shape_cast %19 : vector<1x128x512xbf16> to vector<128x512xbf16>
    %cst_26 = arith.constant dense<0.000000e+00> : vector<64x512xf32>
    %21 = tpu.matmul %18, %20, %cst_26 {dimension_numbers = #tpu.dot_dimension_numbers<[1], [0], [0], [1], [0, 0, 1, 1], [], []>} : vector<64x128xbf16>, vector<128x512xbf16>, vector<64x512xf32> -> vector<64x512xf32>
    %22 = arith.addf %16, %21 : vector<64x512xf32>
    %c0_27 = arith.constant 0 : index
    %c0_28 = arith.constant 0 : index
    %c0_29 = arith.constant 0 : index
    %23 = vector.load %arg8[%c0_27, %c0_28, %c0_29] : memref<1x1x512xf32, #tpu.memory_space<vmem>>, vector<1x1x512xf32>
    %24 = vector.shape_cast %23 : vector<1x1x512xf32> to vector<1x512xf32>
    %25 = vector.broadcast %24 : vector<1x512xf32> to vector<64x512xf32>
    %26 = arith.addf %22, %25 : vector<64x512xf32>
    %cst_30 = arith.constant 0.000000e+00 : f32
    %27 = vector.broadcast %cst_30 : f32 to vector<64x512xf32>
    %28 = arith.cmpf ogt, %26, %27 : vector<64x512xf32>
    %c0_31 = arith.constant 0 : index
    %c0_32 = arith.constant 0 : index
    %c0_33 = arith.constant 0 : index
    %29 = vector.load %arg9[%c0_31, %c0_32, %c0_33] : memref<1x1x512xf32, #tpu.memory_space<vmem>>, vector<1x1x512xf32>
    %30 = vector.shape_cast %29 : vector<1x1x512xf32> to vector<1x512xf32>
    %31 = vector.broadcast %30 : vector<1x512xf32> to vector<64x512xf32>
    %32 = arith.mulf %31, %26 : vector<64x512xf32>
    %33 = arith.select %28, %26, %32 : vector<64x512xi1>, vector<64x512xf32>
    %c0_34 = arith.constant 0 : index
    %c0_35 = arith.constant 0 : index
    %c0_36 = arith.constant 0 : index
    %c0_37 = arith.constant 0 : index
    %34 = vector.load %arg10[%c0_34, %c0_35, %c0_36, %c0_37] : memref<1x1x64x512xf32, #tpu.memory_space<vmem>>, vector<1x1x64x512xf32>
    %35 = vector.shape_cast %34 : vector<1x1x64x512xf32> to vector<64x512xf32>
    %36 = vector.shape_cast %33 : vector<64x512xf32> to vector<1x1x64x512xf32>
    tpu.vector_store %arg10[%c0_34, %c0_35, %c0_36, %c0_37], %36 {strides = array<i32>} : memref<1x1x64x512xf32, #tpu.memory_space<vmem>>, vector<1x1x64x512xf32>,
    return
  }
  func.func @transform_0(%arg0: i32, %arg1: i32, %arg2: i32) -> (i32, i32, i32, i32) {
    %c0_i32 = arith.constant 0 : i32
    %c0_i32_0 = arith.constant 0 : i32
    return %arg0, %arg1, %arg2, %c0_i32 : i32, i32, i32, i32
  }
  func.func @transform_1(%arg0: i32, %arg1: i32, %arg2: i32) -> (i32, i32, i32, i32) {
    %c0_i32 = arith.constant 0 : i32
    %c0_i32_0 = arith.constant 0 : i32
    return %arg0, %arg1, %arg2, %c0_i32 : i32, i32, i32, i32
  }
  func.func @transform_2(%arg0: i32, %arg1: i32, %arg2: i32) -> (i32, i32, i32, i32) {
    %c0_i32 = arith.constant 0 : i32
    %c0_i32_0 = arith.constant 0 : i32
    return %arg0, %arg1, %arg2, %c0_i32 : i32, i32, i32, i32
  }
  func.func @transform_3(%arg0: i32, %arg1: i32, %arg2: i32) -> (i32, i32, i32, i32) {
    %c0_i32 = arith.constant 0 : i32
    %c0_i32_0 = arith.constant 0 : i32
    return %arg0, %arg1, %arg2, %c0_i32 : i32, i32, i32, i32
  }
  func.func @transform_4(%arg0: i32, %arg1: i32, %arg2: i32) -> (i32, i32, i32) {
    %c0_i32 = arith.constant 0 : i32
    %c0_i32_0 = arith.constant 0 : i32
    %c0_i32_1 = arith.constant 0 : i32
    return %arg0, %c0_i32, %c0_i32_0 : i32, i32, i32
  }
  func.func @transform_5(%arg0: i32, %arg1: i32, %arg2: i32) -> (i32, i32, i32) {
    %c0_i32 = arith.constant 0 : i32
    %c0_i32_0 = arith.constant 0 : i32
    return %arg0, %arg1, %c0_i32 : i32, i32, i32
  }
  func.func @transform_6(%arg0: i32, %arg1: i32, %arg2: i32) -> (i32, i32, i32) {
    %c0_i32 = arith.constant 0 : i32
    %c0_i32_0 = arith.constant 0 : i32
    %c0_i32_1 = arith.constant 0 : i32
    return %arg0, %c0_i32, %c0_i32_0 : i32, i32, i32
  }
  func.func @transform_7(%arg0: i32, %arg1: i32, %arg2: i32) -> (i32, i32, i32, i32) {
    %c0_i32 = arith.constant 0 : i32
    %c0_i32_0 = arith.constant 0 : i32
    return %arg0, %arg1, %arg2, %c0_i32 : i32, i32, i32, i32
  }
}

</mosaic_0001>

<bundles_post_ra>
// kernel: net_forward.4
= control target key start
LH: loop header
LB: loop body
LE: loop exit
PB: predicated region body
PF: predicated region fallthrough
CT: control target
= control target key end

     0   :  { %s1283_s15 = smov 0   ;;  %s1285_s16 = smov 0   ;;  %s1410_s0 = inlined_call_operand.vmem [shape: bf16[2,64,512], index: 0, kind: input, shape index: {}]   ;;  %s1411_s1 = inlined_call_operand.vmem [shape: bf16[2,512,128], index: 1, kind: input, shape index: {}]   ;;  %s1412_s2 = inlined_call_operand.vmem [shape: f32[2,1,128], index: 2, kind: input, shape index: {}]   ;;  %s1413_s3 = inlined_call_operand.vmem [shape: f32[2,1,128], index: 3, kind: input, shape index: {}]   ;;  %s1414_s4 = inlined_call_operand.vmem [shape: bf16[2,64,128], index: 4, kind: output, shape index: {}]  }
   0x1   :  { %s1287_s17 = smov 0  }
   0x2 LB: > { %s26_s18 = sadd.s32 1, %s1252_s16  ;;  %p973_p0 = scmp.ge.s32.totalorder %s1256_s17, 1  ;;  %s1256_s17 = sphi %s1287_s17, %s14_s17   ;;  %s1252_s16 = sphi %s1285_s16, %s1416_s16   ;;  %s1248_s15 = sphi %s1283_s15, %s1415_s15  }
   0x3   : > { %p28_p1 = scmp.ge.s32.totalorder %s26_s18, 2  ;;  %p210_p2 = scmp.lt.s32.totalorder %s1256_s17, 3 }
   0x5   : > { %s1418_s18 = smov (%p28_p1, %s26_s18), 0  ;;  %p211_p3 = pnand %p973_p0, %p210_p2 }
   0x6   : > { %p257_p4 = scmp.lt.s32.totalorder (!%p211_p3), %s1248_s15, 1 }
   0x7   : > { %214 = sbr.rel (%p211_p3) target bundleno = 302 (0x12e), region = 36 }
   0xe   : > { %s1420_s15 = smov (!%p257_p4, %s1248_s15), 1 }
   0xf   : > { %s1041_s19 = sshll.u32 %s1420_s15, 8  ;;  %s1040_s23 = sshll.u32 %s1420_s15, 7 }
  0x10   : > { %s1307_s22 = scalar_lea.vmem %s1411_s1, %s1041_s19  ;;  %s1343_s26 = scalar_lea.vmem %s1410_s0, %s1040_s23 }
  0x11   : > { %v1178_v0 = vld [vmem:[%s1307_s22 + $0x40] sm:$0xff]   ;;  %v1182_v4 = vld [vmem:[%s1307_s22 + $0x48] sm:$0xff]   ;;  %v1186_v8 = vld [vmem:[%s1307_s22 + $0x50] sm:$0xff]   ;;  %s274_s29 = scalar_lea.vmem %s1412_s2, %s1420_s15  ;;  %s277_s6 = scalar_lea.vmem %s1413_s3, %s1420_s15 }
  0x12   : > { %v1179_v1 = vld [vmem:[%s1307_s22 + $0xc0] sm:$0xff]   ;;  %1074 = vmatprep.subr.bf16.mxu0 %v1178_v0  ;;  %v1183_v5 = vld [vmem:[%s1307_s22 + $0xc8] sm:$0xff]   ;;  %v1187_v9 = vld [vmem:[%s1307_s22 + $0xd0] sm:$0xff]   ;;  %s1042_s7 = sshll.u32 %s1420_s15, 5 }
  0x13   : > { %v1180_v2 = vld [vmem:[%s1307_s22] sm:$0xff]   ;;  %1114 = vmatprep.subr.bf16.mxu1 %v1179_v1  ;;  %v1184_v6 = vld [vmem:[%s1307_s22 + $0x8] sm:$0xff]   ;;  %v1188_v10 = vld [vmem:[%s1307_s22 + $0x10] sm:$0xff]   ;;  %s1383_s10 = scalar_lea.vmem %s1414_s4, %s1042_s7 }
  0x14   : > { %v1181_v3 = vld [vmem:[%s1307_s22 + $0x80] sm:$0xff]   ;;  %1075 = vmatpush3.bf16.msra.mxu0 %v1180_v2  ;;  %v1185_v7 = vld [vmem:[%s1307_s22 + $0x88] sm:$0xff]   ;;  %v1189_v11 = vld [vmem:[%s1307_s22 + $0x90] sm:$0xff]  }
  0x15   : > { %1115 = vmatpush3.bf16.msra.mxu1 %v1181_v3  ;;  %1076 = vmatprep.subr.bf16.mxu0 %v1182_v4  ;;  %v1190_v12 = vld [vmem:[%s1307_s22 + $0x58] sm:$0xff]   ;;  %v1194_v16 = vld [vmem:[%s1307_s22 + $0x60] sm:$0xff]   ;;  %v1198_v20 = vld [vmem:[%s1307_s22 + $0x68] sm:$0xff]  }
  0x16   : > { %1116 = vmatprep.subr.bf16.mxu1 %v1183_v5  ;;  %v1191_v13 = vld [vmem:[%s1307_s22 + $0xd8] sm:$0xff]   ;;  %v1195_v17 = vld [vmem:[%s1307_s22 + $0xe0] sm:$0xff]   ;;  %v1199_v21 = vld [vmem:[%s1307_s22 + $0xe8] sm:$0xff]  }
  0x17   : > { %v1192_v14 = vld [vmem:[%s1307_s22 + $0x18] sm:$0xff]   ;;  %v1196_v18 = vld [vmem:[%s1307_s22 + $0x20] sm:$0xff]   ;;  %v1200_v22 = vld [vmem:[%s1307_s22 + $0x28] sm:$0xff]  }
  0x18   : > { %1077 = vmatpush3.bf16.msra.mxu0 %v1184_v6  ;;  %v1193_v15 = vld [vmem:[%s1307_s22 + $0x98] sm:$0xff]   ;;  %v1197_v19 = vld [vmem:[%s1307_s22 + $0xa0] sm:$0xff]   ;;  %v1201_v23 = vld [vmem:[%s1307_s22 + $0xa8] sm:$0xff]  }
  0x19   : > { %1117 = vmatpush3.bf16.msra.mxu1 %v1185_v7  ;;  %1078 = vmatprep.subr.bf16.mxu0 %v1186_v8  ;;  %v1202_v24 = vld [vmem:[%s1307_s22 + $0x70] sm:$0xff]   ;;  %v1206_v28 = vld [vmem:[%s1307_s22 + $0x78] sm:$0xff]   ;;  %v1367_v50 = vld [vmem:[%s274_s29] ss:$0 sm:$0xff] }
  0x1a   : > { %1118 = vmatprep.subr.bf16.mxu1 %v1187_v9  ;;  %v1203_v25 = vld [vmem:[%s1307_s22 + $0xf0] sm:$0xff]   ;;  %v1207_v29 = vld [vmem:[%s1307_s22 + $0xf8] sm:$0xff]   ;;  %v1374_v61 = vld [vmem:[%s277_s6] ss:$0 sm:$0xff] }
  0x1b   : > { %v1204_v26 = vld [vmem:[%s1307_s22 + $0x30] sm:$0xff]   ;;  %v1208_v30 = vld [vmem:[%s1307_s22 + $0x38] sm:$0xff]  }
  0x1c   : > { %1079 = vmatpush3.bf16.msra.mxu0 %v1188_v10  ;;  %v1205_v27 = vld [vmem:[%s1307_s22 + $0xb0] sm:$0xff]   ;;  %v1209_v31 = vld [vmem:[%s1307_s22 + $0xb8] sm:$0xff]  }
  0x1d   : > { %1119 = vmatpush3.bf16.msra.mxu1 %v1189_v11  ;;  %1080 = vmatprep.subr.bf16.mxu0 %v1190_v12  ;;  %v1210_v32 = vld [vmem:[%s1343_s26] ss:$16 sps:$4 sm:$0xff]   ;;  %v1212_v33 = vld [vmem:[%s1343_s26 + $0x4] ss:$16 sps:$4 sm:$0xff]   ;;  %v1213_v34 = vld [vmem:[%s1343_s26 + $0x8] ss:$16 sps:$4 sm:$0xff]  }
  0x1e   : > { %1120 = vmatprep.subr.bf16.mxu1 %v1191_v13  ;;  %v1215_v35 = vld [vmem:[%s1343_s26 + $0xc] ss:$16 sps:$4 sm:$0xff]   ;;  %680 = vmatprep.mubr.bf16.mxu0 %v1212_v33  ;;  %v1216_v36 = vld [vmem:[%s1343_s26 + $0x24] ss:$16 sps:$4 sm:$0xff]   ;;  %v1220_v38 = vld [vmem:[%s1343_s26 + $0x20] ss:$16 sps:$4 sm:$0xff]  }
  0x1f   : > { %745 = vmatprep.mubr.bf16.mxu1 %v1215_v35  ;;  %v1218_v37 = vld [vmem:[%s1343_s26 + $0x2c] ss:$16 sps:$4 sm:$0xff]   ;;  %v1221_v39 = vld [vmem:[%s1343_s26 + $0x28] ss:$16 sps:$4 sm:$0xff]   ;;  %v1222_v40 = vld [vmem:[%s1343_s26 + $0x44] ss:$16 sps:$4 sm:$0xff]  }
  0x20   : > { %1081 = vmatpush3.bf16.msra.mxu0 %v1192_v14  ;;  %v1224_v41 = vld [vmem:[%s1343_s26 + $0x4c] ss:$16 sps:$4 sm:$0xff]   ;;  %v1226_v42 = vld [vmem:[%s1343_s26 + $0x40] ss:$16 sps:$4 sm:$0xff]   ;;  %v1227_v43 = vld [vmem:[%s1343_s26 + $0x48] ss:$16 sps:$4 sm:$0xff]  }
  0x21   : > { %1121 = vmatpush3.bf16.msra.mxu1 %v1193_v15  ;;  %1082 = vmatprep.subr.bf16.mxu0 %v1194_v16  ;;  %v1228_v44 = vld [vmem:[%s1343_s26 + $0x64] ss:$16 sps:$4 sm:$0xff]   ;;  %v1230_v45 = vld [vmem:[%s1343_s26 + $0x6c] ss:$16 sps:$4 sm:$0xff]   ;;  %v1232_v46 = vld [vmem:[%s1343_s26 + $0x60] ss:$16 sps:$4 sm:$0xff]  }
  0x22   : > { %1122 = vmatprep.subr.bf16.mxu1 %v1195_v17  ;;  %v1233_v47 = vld [vmem:[%s1343_s26 + $0x68] ss:$16 sps:$4 sm:$0xff]  }
  0x24   : > { %1083 = vmatpush3.bf16.msra.mxu0 %v1196_v18 }
  0x25   : > { %1123 = vmatpush3.bf16.msra.mxu1 %v1197_v19  ;;  %1084 = vmatprep.subr.bf16.mxu0 %v1198_v20 }
  0x26   : > { %1124 = vmatprep.subr.bf16.mxu1 %v1199_v21 }
  0x28   : > { %1085 = vmatpush3.bf16.msra.mxu0 %v1200_v22 }
  0x29   : > { %1125 = vmatpush3.bf16.msra.mxu1 %v1201_v23  ;;  %1086 = vmatprep.subr.bf16.mxu0 %v1202_v24 }
  0x2a   : > { %1126 = vmatprep.subr.bf16.mxu1 %v1203_v25 }
  0x2c   : > { %1087 = vmatpush3.bf16.msra.mxu0 %v1204_v26 }
  0x2d   : > { %1127 = vmatpush3.bf16.msra.mxu1 %v1205_v27  ;;  %1088 = vmatprep.subr.bf16.mxu0 %v1206_v28 }
  0x2e   : > { %1128 = vmatprep.subr.bf16.mxu1 %v1207_v29 }
  0x30   : > { %1089 = vmatpush3.bf16.msra.mxu0 %v1208_v30 }
  0x31   : > { %1129 = vmatpush3.bf16.msra.mxu1 %v1209_v31 }
  0x33   : > { %681 = vmatmul.mubr.bf16.vlgmr.msra.gmra.mrb[0].mxu0 %v1210_v32 }
  0x34   : > { %746 = vmatmul.mubr.bf16.vlgmr.msra.gmra.mrb[0].mxu1 %v1213_v34  ;;  %688 = vmatprep.mubr.bf16.mxu0 %v1216_v36 }
  0x35   : > { %753 = vmatprep.mubr.bf16.mxu1 %v1218_v37 }
  0x3b   : > { %689 = vmatmul.mubr.bf16.gmra.mrb[4].mxu0 %v1220_v38 }
  0x3c   : > { %754 = vmatmul.mubr.bf16.gmra.mrb[4].mxu1 %v1221_v39  ;;  %696 = vmatprep.mubr.bf16.mxu0 %v1222_v40 }
  0x3d   : > { %761 = vmatprep.mubr.bf16.mxu1 %v1224_v41 }
  0x43   : > { %697 = vmatmul.mubr.bf16.gmra.mrb[8].mxu0 %v1226_v42 }
  0x44   : > { %762 = vmatmul.mubr.bf16.gmra.mrb[8].mxu1 %v1227_v43  ;;  %704 = vmatprep.mubr.bf16.mxu0 %v1228_v44 }
  0x45   : > { %769 = vmatprep.mubr.bf16.mxu1 %v1230_v45 }
  0x4b   : > { %705 = vmatmul.mubr.bf16.gmra.mrb[12].mxu0 %v1232_v46 }
  0x4c   : > { %770 = vmatmul.mubr.bf16.gmra.mrb[12].mxu1 %v1233_v47 }
 0x106   : > { %v1090_v48 = vpop.f32.mrb[0].mxu0 }
 0x107   : > { %v1130_v49 = vpop.f32.mrb[0].mxu1  ;;  %v1091_v51 = vpop.f32.mrb[1].mxu0 }
 0x108   : > { %v1092_v52 = vadd.f32 %v1091_v51, %v1090_v48  ;;  %v1131_v53 = vpop.f32.mrb[1].mxu1  ;;  %v1093_v54 = vpop.f32.mrb[2].mxu0 }
 0x109   : > { %v1132_v55 = vadd.f32 %v1131_v53, %v1130_v49  ;;  %v1133_v56 = vpop.f32.mrb[2].mxu1  ;;  %v1094_v57 = vpop.f32.mrb[3].mxu0 }
 0x10a   : > { %v683_v58 = vadd.f32 %v1092_v52, %v1367_v50  ;;  %v1095_v59 = vadd.f32 %v1094_v57, %v1093_v54  ;;  %v1134_v60 = vpop.f32.mrb[3].mxu1 }
 0x10b   : > { %v1135_v62 = vadd.f32 %v1134_v60, %v1133_v56 }
 0x10c   : > { %v748_v63 = vadd.f32 %v1132_v55, %v683_v58  ;;  %v686_v0 = vadd.f32 %v1095_v59, %v1367_v50 }
 0x10e   : > { %v793_v1 = vmul.f32 %v1374_v61, %v748_v63  ;;  %v751_v2 = vadd.f32 %v1135_v62, %v686_v0  ;;  %v1096_v3 = vpop.f32.mrb[4].mxu0  ;;  %vm778_vm0 = vcmp.gt.f32.partialorder %v748_v63, 0.0 }
 0x10f   : > { %v1136_v4 = vpop.f32.mrb[4].mxu1  ;;  %v1097_v5 = vpop.f32.mrb[5].mxu0 }
 0x110   : > { %vm779_vm1 = vcmp.gt.f32.partialorder %v751_v2, 0.0  ;;  %v794_v6 = vmul.f32 %v1374_v61, %v751_v2  ;;  %v1098_v7 = vadd.f32 %v1097_v5, %v1096_v3  ;;  %v1137_v8 = vpop.f32.mrb[5].mxu1  ;;  %v1099_v9 = vpop.f32.mrb[6].mxu0  ;;  %v801_v13 = vsel %vm778_vm0, %v748_v63, %v793_v1 }
 0x111   : > { %v1138_v10 = vadd.f32 %v1137_v8, %v1136_v4  ;;  %v1139_v11 = vpop.f32.mrb[6].mxu1  ;;  %v1100_v12 = vpop.f32.mrb[7].mxu0 }
 0x112   : > { %v802_v14 = vsel %vm779_vm1, %v751_v2, %v794_v6  ;;  %v691_v15 = vadd.f32 %v1098_v7, %v1367_v50  ;;  %v1101_v16 = vadd.f32 %v1100_v12, %v1099_v9  ;;  %v1140_v17 = vpop.f32.mrb[7].mxu1 }
 0x113   : > { %v1054_v18 = vpack.c.bf16 %v802_v14, %v801_v13  ;;  %v1141_v19 = vadd.f32 %v1140_v17, %v1139_v11 }
 0x114   : > { %v756_v20 = vadd.f32 %v1138_v10, %v691_v15  ;;  %v694_v21 = vadd.f32 %v1101_v16, %v1367_v50 }
 0x115   : > { %1055 = vst [vmem:[%s1383_s10] sm:$0xff] %v1054_v18  }
 0x116   : > { %v795_v22 = vmul.f32 %v1374_v61, %v756_v20  ;;  %v759_v23 = vadd.f32 %v1141_v19, %v694_v21  ;;  %v1102_v24 = vpop.f32.mrb[8].mxu0  ;;  %vm780_vm2 = vcmp.gt.f32.partialorder %v756_v20, 0.0 }
 0x117   : > { %v1142_v25 = vpop.f32.mrb[8].mxu1  ;;  %v1103_v26 = vpop.f32.mrb[9].mxu0 }
 0x118   : > { %vm781_vm3 = vcmp.gt.f32.partialorder %v759_v23, 0.0  ;;  %v796_v27 = vmul.f32 %v1374_v61, %v759_v23  ;;  %v1104_v28 = vadd.f32 %v1103_v26, %v1102_v24  ;;  %v1143_v29 = vpop.f32.mrb[9].mxu1  ;;  %v1105_v30 = vpop.f32.mrb[10].mxu0  ;;  %v803_v34 = vsel %vm780_vm2, %v756_v20, %v795_v22 }
 0x119   : > { %v1144_v31 = vadd.f32 %v1143_v29, %v1142_v25  ;;  %v1145_v32 = vpop.f32.mrb[10].mxu1  ;;  %v1106_v33 = vpop.f32.mrb[11].mxu0 }
 0x11a   : > { %v804_v35 = vsel %vm781_vm3, %v759_v23, %v796_v27  ;;  %v699_v36 = vadd.f32 %v1104_v28, %v1367_v50  ;;  %v1107_v37 = vadd.f32 %v1106_v33, %v1105_v30  ;;  %v1146_v38 = vpop.f32.mrb[11].mxu1 }
 0x11b   : > { %v1059_v39 = vpack.c.bf16 %v804_v35, %v803_v34  ;;  %v1147_v40 = vadd.f32 %v1146_v38, %v1145_v32 }
 0x11c   : > { %v764_v41 = vadd.f32 %v1144_v31, %v699_v36  ;;  %v702_v42 = vadd.f32 %v1107_v37, %v1367_v50 }
 0x11d   : > { %1071 = vst [vmem:[%s1383_s10 + $0x8] sm:$0xff] %v1059_v39  }
 0x11e   : > { %v797_v43 = vmul.f32 %v1374_v61, %v764_v41  ;;  %v767_v44 = vadd.f32 %v1147_v40, %v702_v42  ;;  %v1108_v45 = vpop.f32.mrb[12].mxu0  ;;  %vm782_vm4 = vcmp.gt.f32.partialorder %v764_v41, 0.0 }
 0x11f   : > { %v1148_v46 = vpop.f32.mrb[12].mxu1  ;;  %v1109_v47 = vpop.f32.mrb[13].mxu0 }
 0x120   : > { %vm783_vm5 = vcmp.gt.f32.partialorder %v767_v44, 0.0  ;;  %v798_v48 = vmul.f32 %v1374_v61, %v767_v44  ;;  %v1110_v49 = vadd.f32 %v1109_v47, %v1108_v45  ;;  %v1149_v51 = vpop.f32.mrb[13].mxu1  ;;  %v1111_v52 = vpop.f32.mrb[14].mxu0  ;;  %v805_v56 = vsel %vm782_vm4, %v764_v41, %v797_v43 }
 0x121   : > { %v1150_v53 = vadd.f32 %v1149_v51, %v1148_v46  ;;  %v1151_v54 = vpop.f32.mrb[14].mxu1  ;;  %v1112_v55 = vpop.f32.mrb[15].mxu0 }
 0x122   : > { %v806_v57 = vsel %vm783_vm5, %v767_v44, %v798_v48  ;;  %v707_v58 = vadd.f32 %v1110_v49, %v1367_v50  ;;  %v1113_v59 = vadd.f32 %v1112_v55, %v1111_v52  ;;  %v1152_v60 = vpop.f32.mrb[15].mxu1 }
 0x123   : > { %v1064_v62 = vpack.c.bf16 %v806_v57, %v805_v56  ;;  %v1153_v63 = vadd.f32 %v1152_v60, %v1151_v54 }
 0x124   : > { %v772_v0 = vadd.f32 %v1150_v53, %v707_v58  ;;  %v710_v1 = vadd.f32 %v1113_v59, %v1367_v50 }
 0x125   : > { %1072 = vst [vmem:[%s1383_s10 + $0x10] sm:$0xff] %v1064_v62  }
 0x126   : > { %v799_v2 = vmul.f32 %v1374_v61, %v772_v0  ;;  %v775_v3 = vadd.f32 %v1153_v63, %v710_v1  ;;  %vm784_vm6 = vcmp.gt.f32.partialorder %v772_v0, 0.0 }
 0x128   : > { %vm785_vm7 = vcmp.gt.f32.partialorder %v775_v3, 0.0  ;;  %v800_v4 = vmul.f32 %v1374_v61, %v775_v3  ;;  %v807_v5 = vsel %vm784_vm6, %v772_v0, %v799_v2 }
 0x12a   : > { %v808_v6 = vsel %vm785_vm7, %v775_v3, %v800_v4 }
 0x12b   : > { %v1069_v7 = vpack.c.bf16 %v808_v6, %v807_v5 }
 0x12d   : > { %1073 = vst [vmem:[%s1383_s10 + $0x18] sm:$0xff] %v1069_v7  }
 0x12e PF: > { %s14_s17 = sadd.s32 1, %s1256_s17   ;;  %s1415_s15 = smov %s1252_s16 }
 0x12f   : > { %p11_p5 = scmp.ge.s32.totalorder %s14_s17, 4   ;;  %s1416_s16 = smov %s1418_s18 }
 0x131   :  { %13 = sbr.rel (!%p11_p5) target bundleno = 2 (0x2), region = 75 }

// kernel: net_forward.6
= control target key start
LH: loop header
LB: loop body
LE: loop exit
PB: predicated region body
PF: predicated region fallthrough
CT: control target
= control target key end

     0   :  { %s1002_s15 = smov 0   ;;  %s1004_s16 = smov 0   ;;  %s1085_s0 = inlined_call_operand.vmem [shape: bf16[2,16,512], index: 0, kind: input, shape index: {}]   ;;  %s1086_s1 = inlined_call_operand.vmem [shape: bf16[2,512,128], index: 1, kind: input, shape index: {}]   ;;  %s1087_s2 = inlined_call_operand.vmem [shape: f32[2,1,128], index: 2, kind: input, shape index: {}]   ;;  %s1088_s3 = inlined_call_operand.vmem [shape: f32[2,1,128], index: 3, kind: input, shape index: {}]   ;;  %s1089_s4 = inlined_call_operand.vmem [shape: f32[2,16,128], index: 4, kind: output, shape index: {}]  }
   0x1   :  { %s1006_s17 = smov 0  }
   0x2 LB: > { %s26_s18 = sadd.s32 1, %s971_s16  ;;  %p797_p0 = scmp.ge.s32.totalorder %s975_s17, 1  ;;  %s975_s17 = sphi %s1006_s17, %s14_s17   ;;  %s971_s16 = sphi %s1004_s16, %s1091_s16   ;;  %s967_s15 = sphi %s1002_s15, %s1090_s15  }
   0x3   : > { %p28_p1 = scmp.ge.s32.totalorder %s26_s18, 2  ;;  %p210_p2 = scmp.lt.s32.totalorder %s975_s17, 3 }
   0x5   : > { %s1093_s18 = smov (%p28_p1, %s26_s18), 0  ;;  %p211_p3 = pnand %p797_p0, %p210_p2 }
   0x6   : > { %p257_p4 = scmp.lt.s32.totalorder (!%p211_p3), %s967_s15, 1 }
   0x7   : > { %214 = sbr.rel (%p211_p3) target bundleno = 276 (0x114), region = 36 }
   0xe   : > { %s1095_s15 = smov (!%p257_p4, %s967_s15), 1 }
   0xf   : > { %s845_s19 = sshll.u32 %s1095_s15, 8  ;;  %s844_s23 = sshll.u32 %s1095_s15, 5 }
  0x10   : > { %s1026_s22 = scalar_lea.vmem %s1086_s1, %s845_s19  ;;  %s265_s26 = scalar_lea.vmem %s1085_s0, %s844_s23 }
  0x11   : > { %v915_v0 = vld [vmem:[%s1026_s22 + $0x40] sm:$0xff]   ;;  %v919_v4 = vld [vmem:[%s1026_s22 + $0x48] sm:$0xff]   ;;  %v923_v8 = vld [vmem:[%s1026_s22 + $0x50] sm:$0xff]   ;;  %s274_s29 = scalar_lea.vmem %s1087_s2, %s1095_s15  ;;  %s277_s6 = scalar_lea.vmem %s1088_s3, %s1095_s15 }
  0x12   : > { %v916_v1 = vld [vmem:[%s1026_s22 + $0xc0] sm:$0xff]   ;;  %847 = vmatprep.subr.bf16.mxu0 %v915_v0  ;;  %v920_v5 = vld [vmem:[%s1026_s22 + $0xc8] sm:$0xff]   ;;  %v924_v9 = vld [vmem:[%s1026_s22 + $0xd0] sm:$0xff]   ;;  %s846_s7 = sshll.u32 %s1095_s15, 4 }
  0x13   : > { %v917_v2 = vld [vmem:[%s1026_s22] sm:$0xff]   ;;  %869 = vmatprep.subr.bf16.mxu1 %v916_v1  ;;  %v921_v6 = vld [vmem:[%s1026_s22 + $0x8] sm:$0xff]   ;;  %v925_v10 = vld [vmem:[%s1026_s22 + $0x10] sm:$0xff]   ;;  %s286_s10 = scalar_lea.vmem %s1089_s4, %s846_s7 }
  0x14   : > { %v918_v3 = vld [vmem:[%s1026_s22 + $0x80] sm:$0xff]   ;;  %848 = vmatpush3.bf16.msra.mxu0 %v917_v2  ;;  %v922_v7 = vld [vmem:[%s1026_s22 + $0x88] sm:$0xff]   ;;  %v926_v11 = vld [vmem:[%s1026_s22 + $0x90] sm:$0xff]  }
  0x15   : > { %870 = vmatpush3.bf16.msra.mxu1 %v918_v3  ;;  %849 = vmatprep.subr.bf16.mxu0 %v919_v4  ;;  %v927_v12 = vld [vmem:[%s1026_s22 + $0x58] sm:$0xff]   ;;  %v931_v16 = vld [vmem:[%s1026_s22 + $0x60] sm:$0xff]   ;;  %v935_v20 = vld [vmem:[%s1026_s22 + $0x68] sm:$0xff]  }
  0x16   : > { %871 = vmatprep.subr.bf16.mxu1 %v920_v5  ;;  %v928_v13 = vld [vmem:[%s1026_s22 + $0xd8] sm:$0xff]   ;;  %v932_v17 = vld [vmem:[%s1026_s22 + $0xe0] sm:$0xff]   ;;  %v936_v21 = vld [vmem:[%s1026_s22 + $0xe8] sm:$0xff]  }
  0x17   : > { %v929_v14 = vld [vmem:[%s1026_s22 + $0x18] sm:$0xff]   ;;  %v933_v18 = vld [vmem:[%s1026_s22 + $0x20] sm:$0xff]   ;;  %v937_v22 = vld [vmem:[%s1026_s22 + $0x28] sm:$0xff]  }
  0x18   : > { %850 = vmatpush3.bf16.msra.mxu0 %v921_v6  ;;  %v930_v15 = vld [vmem:[%s1026_s22 + $0x98] sm:$0xff]   ;;  %v934_v19 = vld [vmem:[%s1026_s22 + $0xa0] sm:$0xff]   ;;  %v938_v23 = vld [vmem:[%s1026_s22 + $0xa8] sm:$0xff]  }
  0x19   : > { %872 = vmatpush3.bf16.msra.mxu1 %v922_v7  ;;  %851 = vmatprep.subr.bf16.mxu0 %v923_v8  ;;  %v939_v24 = vld [vmem:[%s1026_s22 + $0x70] sm:$0xff]   ;;  %v943_v28 = vld [vmem:[%s1026_s22 + $0x78] sm:$0xff]   ;;  %v804_v38 = vld [vmem:[%s274_s29] ss:$0 sm:$0xff] }
  0x1a   : > { %873 = vmatprep.subr.bf16.mxu1 %v924_v9  ;;  %v940_v25 = vld [vmem:[%s1026_s22 + $0xf0] sm:$0xff]   ;;  %v944_v29 = vld [vmem:[%s1026_s22 + $0xf8] sm:$0xff]   ;;  %v841_v49 = vld [vmem:[%s277_s6] ss:$0 sm:$0xff] }
  0x1b   : > { %v941_v26 = vld [vmem:[%s1026_s22 + $0x30] sm:$0xff]   ;;  %v945_v30 = vld [vmem:[%s1026_s22 + $0x38] sm:$0xff]  }
  0x1c   : > { %852 = vmatpush3.bf16.msra.mxu0 %v925_v10  ;;  %v942_v27 = vld [vmem:[%s1026_s22 + $0xb0] sm:$0xff]   ;;  %v946_v31 = vld [vmem:[%s1026_s22 + $0xb8] sm:$0xff]  }
  0x1d   : > { %874 = vmatpush3.bf16.msra.mxu1 %v926_v11  ;;  %853 = vmatprep.subr.bf16.mxu0 %v927_v12  ;;  %v947_v32 = vld [vmem:[%s265_s26] ss:$16 sps:$4 sm:$0xff]   ;;  %v949_v33 = vld [vmem:[%s265_s26 + $0x4] ss:$16 sps:$4 sm:$0xff]   ;;  %v950_v34 = vld [vmem:[%s265_s26 + $0x8] ss:$16 sps:$4 sm:$0xff]  }
  0x1e   : > { %875 = vmatprep.subr.bf16.mxu1 %v928_v13  ;;  %v952_v35 = vld [vmem:[%s265_s26 + $0xc] ss:$16 sps:$4 sm:$0xff]   ;;  %608 = vmatprep.mubr.bf16.mxu0 %v949_v33 }
  0x1f   : > { %649 = vmatprep.mubr.bf16.mxu1 %v952_v35 }
  0x20   : > { %854 = vmatpush3.bf16.msra.mxu0 %v929_v14 }
  0x21   : > { %876 = vmatpush3.bf16.msra.mxu1 %v930_v15  ;;  %855 = vmatprep.subr.bf16.mxu0 %v931_v16 }
  0x22   : > { %877 = vmatprep.subr.bf16.mxu1 %v932_v17 }
  0x24   : > { %856 = vmatpush3.bf16.msra.mxu0 %v933_v18 }
  0x25   : > { %878 = vmatpush3.bf16.msra.mxu1 %v934_v19  ;;  %857 = vmatprep.subr.bf16.mxu0 %v935_v20 }
  0x26   : > { %879 = vmatprep.subr.bf16.mxu1 %v936_v21 }
  0x28   : > { %858 = vmatpush3.bf16.msra.mxu0 %v937_v22 }
  0x29   : > { %880 = vmatpush3.bf16.msra.mxu1 %v938_v23  ;;  %859 = vmatprep.subr.bf16.mxu0 %v939_v24 }
  0x2a   : > { %881 = vmatprep.subr.bf16.mxu1 %v940_v25 }
  0x2c   : > { %860 = vmatpush3.bf16.msra.mxu0 %v941_v26 }
  0x2d   : > { %882 = vmatpush3.bf16.msra.mxu1 %v942_v27  ;;  %861 = vmatprep.subr.bf16.mxu0 %v943_v28 }
  0x2e   : > { %883 = vmatprep.subr.bf16.mxu1 %v944_v29 }
  0x30   : > { %862 = vmatpush3.bf16.msra.mxu0 %v945_v30 }
  0x31   : > { %884 = vmatpush3.bf16.msra.mxu1 %v946_v31 }
  0x33   : > { %609 = vmatmul.mubr.bf16.vlgmr.msra.gmra.mrb[0].mxu0 %v947_v32 }
  0x34   : > { %650 = vmatmul.mubr.bf16.vlgmr.msra.gmra.mrb[0].mxu1 %v950_v34 }
 0x106   : > { %v863_v36 = vpop.f32.mrb[0].mxu0 }
 0x107   : > { %v885_v37 = vpop.f32.mrb[0].mxu1  ;;  %v864_v39 = vpop.f32.mrb[1].mxu0 }
 0x108   : > { %v865_v40 = vadd.f32 %v864_v39, %v863_v36  ;;  %v886_v41 = vpop.f32.mrb[1].mxu1  ;;  %v866_v42 = vpop.f32.mrb[2].mxu0 }
 0x109   : > { %v887_v43 = vadd.f32 %v886_v41, %v885_v37  ;;  %v888_v44 = vpop.f32.mrb[2].mxu1  ;;  %v867_v45 = vpop.f32.mrb[3].mxu0 }
 0x10a   : > { %v611_v46 = vadd.f32 %v865_v40, %v804_v38  ;;  %v868_v47 = vadd.f32 %v867_v45, %v866_v42  ;;  %v889_v48 = vpop.f32.mrb[3].mxu1 }
 0x10b   : > { %v890_v50 = vadd.f32 %v889_v48, %v888_v44 }
 0x10c   : > { %v652_v51 = vadd.f32 %v887_v43, %v611_v46  ;;  %v614_v52 = vadd.f32 %v868_v47, %v804_v38 }
 0x10e   : > { %vm658_vm0 = vcmp.gt.f32.partialorder %v652_v51, 0.0  ;;  %v667_v53 = vmul.f32 %v841_v49, %v652_v51  ;;  %v655_v54 = vadd.f32 %v890_v50, %v614_v52 }
 0x110   : > { %v669_v55 = vsel %vm658_vm0, %v652_v51, %v667_v53  ;;  %vm659_vm1 = vcmp.gt.f32.partialorder %v655_v54, 0.0  ;;  %v668_v56 = vmul.f32 %v841_v49, %v655_v54 }
 0x111   : > { %671 = vst [vmem:[%s286_s10] sm:$0xff] %v669_v55 }
 0x112   : > { %v670_v57 = vsel %vm659_vm1, %v655_v54, %v668_v56 }
 0x113   : > { %672 = vst [vmem:[%s286_s10 + $0x8] sm:$0xff] %v670_v57 }
 0x114 PF: > { %s14_s17 = sadd.s32 1, %s975_s17   ;;  %s1090_s15 = smov %s971_s16 }
 0x115   : > { %p11_p5 = scmp.ge.s32.totalorder %s14_s17, 4   ;;  %s1091_s16 = smov %s1093_s18 }
 0x117   :  { %13 = sbr.rel (!%p11_p5) target bundleno = 2 (0x2), region = 75 }

// kernel: net_forward.7
= control target key start
LH: loop header
LB: loop body
LE: loop exit
PB: predicated region body
PF: predicated region fallthrough
CT: control target
= control target key end

     0   :  { %s3115_s24 = smov 0   ;;  %s3117_s25 = smov 0   ;;  %s3478_s0 = inlined_call_operand.vmem [shape: bf16[2,1,64,128], index: 0, kind: input, shape index: {}]   ;;  %s3479_s1 = inlined_call_operand.vmem [shape: bf16[2,1,64,128], index: 1, kind: input, shape index: {}]   ;;  %s3480_s2 = inlined_call_operand.vmem [shape: bf16[2,1,64,128], index: 2, kind: input, shape index: {}]   ;;  %s3481_s3 = inlined_call_operand.vmem [shape: bf16[2,1,64,128], index: 3, kind: input, shape index: {}]   ;;  %s3482_s4 = inlined_call_operand.vmem [shape: bf16[2,512,512], index: 4, kind: input, shape index: {}]   ;;  %s3483_s5 = inlined_call_operand.vmem [shape: f32[2,1,512], index: 5, kind: input, shape index: {}]   ;;  %s3484_s6 = inlined_call_operand.vmem [shape: f32[2,1,512], index: 6, kind: input, shape index: {}]   ;;  %s3485_s7 = inlined_call_operand.vmem [shape: f32[2,1,64,512], index: 7, kind: output, shape index: {}]  }
   0x1   :  { %s3119_s26 = smov 0  }
   0x2 LB: > { %s36_s27 = sadd.s32 1, %s3068_s25  ;;  %p2554_p0 = scmp.ge.s32.totalorder %s3072_s26, 1  ;;  %s3072_s26 = sphi %s3119_s26, %s17_s26   ;;  %s3068_s25 = sphi %s3117_s25, %s3487_s25   ;;  %s3064_s24 = sphi %s3115_s24, %s3486_s24  }
   0x3   : > { %p38_p1 = scmp.ge.s32.totalorder %s36_s27, 2  ;;  %p376_p2 = scmp.lt.s32.totalorder %s3072_s26, 3 }
   0x5   : > { %s3489_s27 = smov (%p38_p1, %s36_s27), 0  ;;  %p377_p3 = pnand %p2554_p0, %p376_p2 }
   0x6   : > { %p482_p4 = scmp.lt.s32.totalorder (!%p377_p3), %s3064_s24, 1  ;;  %v3074_v0 = vmov (!%p377_p3), 0  }
   0x7   : > { %380 = sbr.rel (%p377_p3) target bundleno = 394 (0x18a), region = 48  ;;  %866 = vmatprep.mubr.bf16.mxu0 (!%p377_p3), %v3074_v0  ;;  %939 = vmatprep.mubr.bf16.mxu1 (!%p377_p3), %v3074_v0 }
   0xe   : > { %s3491_s24 = smov (!%p482_p4, %s3064_s24), 1 }
   0xf   : > { %s2719_s28 = sshll.u32 %s3491_s24, 10  ;;  %s3166_s9 = sshll.u32 %s3491_s24, 5 }
  0x10   : > { %s3141_s8 = scalar_lea.vmem %s3482_s4, %s2719_s28  ;;  %s3175_s12 = scalar_lea.vmem %s3479_s1, %s3166_s9 }
  0x11   : > { %v2842_v1 = vld [vmem:[%s3141_s8 + $0x104] ss:$16 sps:$4 sm:$0xff]   ;;  %v2844_v2 = vld [vmem:[%s3141_s8 + $0x10c] ss:$16 sps:$4 sm:$0xff]   ;;  %v2846_v3 = vld [vmem:[%s3141_s8 + $0x100] ss:$16 sps:$4 sm:$0xff]   ;;  %s3210_s15 = scalar_lea.vmem %s3478_s0, %s3166_s9  ;;  %s3254_s18 = scalar_lea.vmem %s3480_s2, %s3166_s9 }
  0x12   : > { %834 = vmatprep.subr.bf16.mxu0 %v2842_v1  ;;  %v2847_v4 = vld [vmem:[%s3141_s8 + $0x108] ss:$16 sps:$4 sm:$0xff]   ;;  %907 = vmatprep.subr.bf16.mxu1 %v2844_v2  ;;  %v2848_v5 = vld [vmem:[%s3141_s8 + $0x124] ss:$16 sps:$4 sm:$0xff]   ;;  %v2850_v6 = vld [vmem:[%s3141_s8 + $0x12c] ss:$16 sps:$4 sm:$0xff]   ;;  %s3294_s21 = scalar_lea.vmem %s3481_s3, %s3166_s9 }
  0x13   : > { %835 = vmatpush1.bf16.msra.mxu0 %v2846_v3  ;;  %908 = vmatpush1.bf16.msra.mxu1 %v2847_v4  ;;  %v2852_v7 = vld [vmem:[%s3141_s8 + $0x120] ss:$16 sps:$4 sm:$0xff]   ;;  %v2853_v8 = vld [vmem:[%s3141_s8 + $0x128] ss:$16 sps:$4 sm:$0xff]   ;;  %v2854_v9 = vld [vmem:[%s3141_s8 + $0x144] ss:$16 sps:$4 sm:$0xff]  }
  0x14   : > { %836 = vmatprep.subr.bf16.mxu0 %v2848_v5  ;;  %909 = vmatprep.subr.bf16.mxu1 %v2850_v6  ;;  %v2856_v10 = vld [vmem:[%s3141_s8 + $0x14c] ss:$16 sps:$4 sm:$0xff]   ;;  %v2858_v11 = vld [vmem:[%s3141_s8 + $0x140] ss:$16 sps:$4 sm:$0xff]   ;;  %v2859_v12 = vld [vmem:[%s3141_s8 + $0x148] ss:$16 sps:$4 sm:$0xff]  }
  0x15   : > { %v2860_v13 = vld [vmem:[%s3141_s8 + $0x164] ss:$16 sps:$4 sm:$0xff]   ;;  %v2862_v14 = vld [vmem:[%s3141_s8 + $0x16c] ss:$16 sps:$4 sm:$0xff]   ;;  %v2864_v15 = vld [vmem:[%s3141_s8 + $0x160] ss:$16 sps:$4 sm:$0xff]  }
  0x16   : > { %v2865_v16 = vld [vmem:[%s3141_s8 + $0x168] ss:$16 sps:$4 sm:$0xff]   ;;  %v2866_v17 = vld [vmem:[%s3141_s8 + $0x184] ss:$16 sps:$4 sm:$0xff]   ;;  %v2868_v18 = vld [vmem:[%s3141_s8 + $0x18c] ss:$16 sps:$4 sm:$0xff]  }
  0x17   : > { %837 = vmatpush1.bf16.msra.mxu0 %v2852_v7  ;;  %910 = vmatpush1.bf16.msra.mxu1 %v2853_v8  ;;  %v2870_v19 = vld [vmem:[%s3141_s8 + $0x180] ss:$16 sps:$4 sm:$0xff]   ;;  %v2871_v20 = vld [vmem:[%s3141_s8 + $0x188] ss:$16 sps:$4 sm:$0xff]   ;;  %v2872_v21 = vld [vmem:[%s3141_s8 + $0x1a4] ss:$16 sps:$4 sm:$0xff]  }
  0x18   : > { %838 = vmatprep.subr.bf16.mxu0 %v2854_v9  ;;  %911 = vmatprep.subr.bf16.mxu1 %v2856_v10  ;;  %v2874_v22 = vld [vmem:[%s3141_s8 + $0x1ac] ss:$16 sps:$4 sm:$0xff]   ;;  %v2876_v23 = vld [vmem:[%s3141_s8 + $0x1a0] ss:$16 sps:$4 sm:$0xff]   ;;  %v2877_v24 = vld [vmem:[%s3141_s8 + $0x1a8] ss:$16 sps:$4 sm:$0xff]  }
  0x19   : > { %v2878_v25 = vld [vmem:[%s3141_s8 + $0x1c4] ss:$16 sps:$4 sm:$0xff]   ;;  %v2880_v26 = vld [vmem:[%s3141_s8 + $0x1cc] ss:$16 sps:$4 sm:$0xff]   ;;  %v2882_v27 = vld [vmem:[%s3141_s8 + $0x1c0] ss:$16 sps:$4 sm:$0xff]  }
  0x1a   : > { %v2883_v28 = vld [vmem:[%s3141_s8 + $0x1c8] ss:$16 sps:$4 sm:$0xff]   ;;  %v2884_v29 = vld [vmem:[%s3141_s8 + $0x1e4] ss:$16 sps:$4 sm:$0xff]   ;;  %v2886_v30 = vld [vmem:[%s3141_s8 + $0x1ec] ss:$16 sps:$4 sm:$0xff]  }
  0x1b   : > { %839 = vmatpush1.bf16.msra.mxu0 %v2858_v11  ;;  %912 = vmatpush1.bf16.msra.mxu1 %v2859_v12  ;;  %v2888_v31 = vld [vmem:[%s3141_s8 + $0x1e0] ss:$16 sps:$4 sm:$0xff]   ;;  %v2889_v32 = vld [vmem:[%s3141_s8 + $0x1e8] ss:$16 sps:$4 sm:$0xff]   ;;  %v2893_v33 = vld [vmem:[%s3141_s8 + $0x4] ss:$16 sps:$4 sm:$0xff]  }
  0x1c   : > { %840 = vmatprep.subr.bf16.mxu0 %v2860_v13  ;;  %913 = vmatprep.subr.bf16.mxu1 %v2862_v14  ;;  %v2896_v34 = vld [vmem:[%s3141_s8 + $0xc] ss:$16 sps:$4 sm:$0xff]   ;;  %v2890_v35 = vld [vmem:[%s3175_s12] sm:$0xff]   ;;  %v2894_v37 = vld [vmem:[%s3141_s8 + $0x8] ss:$16 sps:$4 sm:$0xff]   ;;  %s2565_s22 = sshll.u32 %s3491_s24, 2 }
  0x1d   : > { %v2891_v36 = vld [vmem:[%s3141_s8] ss:$16 sps:$4 sm:$0xff]   ;;  %v2899_v38 = vld [vmem:[%s3141_s8 + $0x24] ss:$16 sps:$4 sm:$0xff]   ;;  %v2902_v39 = vld [vmem:[%s3141_s8 + $0x2c] ss:$16 sps:$4 sm:$0xff]   ;;  %s549_s29 = scalar_lea.vmem %s3483_s5, %s2565_s22  ;;  %s553_s9 = scalar_lea.vmem %s3484_s6, %s2565_s22 }
  0x1e   : > { %v2897_v40 = vld [vmem:[%s3141_s8 + $0x20] ss:$16 sps:$4 sm:$0xff]   ;;  %v2900_v41 = vld [vmem:[%s3141_s8 + $0x28] ss:$16 sps:$4 sm:$0xff]   ;;  %v2906_v42 = vld [vmem:[%s3141_s8 + $0x44] ss:$16 sps:$4 sm:$0xff]  }
  0x1f   : > { %841 = vmatpush1.bf16.msra.mxu0 %v2864_v15  ;;  %914 = vmatpush1.bf16.msra.mxu1 %v2865_v16  ;;  %v2909_v43 = vld [vmem:[%s3141_s8 + $0x4c] ss:$16 sps:$4 sm:$0xff]   ;;  %v2904_v45 = vld [vmem:[%s3141_s8 + $0x40] ss:$16 sps:$4 sm:$0xff]   ;;  %v2907_v46 = vld [vmem:[%s3141_s8 + $0x48] ss:$16 sps:$4 sm:$0xff]  }
  0x20   : > { %842 = vmatprep.subr.bf16.mxu0 %v2866_v17  ;;  %915 = vmatprep.subr.bf16.mxu1 %v2868_v18  ;;  %v2903_v44 = vld [vmem:[%s3175_s12 + $0x8] sm:$0xff]   ;;  %v2912_v47 = vld [vmem:[%s3141_s8 + $0x64] ss:$16 sps:$4 sm:$0xff]   ;;  %v2910_v49 = vld [vmem:[%s3141_s8 + $0x60] ss:$16 sps:$4 sm:$0xff]   ;;  %s2720_s10 = sshll.u32 %s3491_s24, 8 }
  0x21   : > { %v2915_v48 = vld [vmem:[%s3141_s8 + $0x6c] ss:$16 sps:$4 sm:$0xff]   ;;  %v2913_v50 = vld [vmem:[%s3141_s8 + $0x68] ss:$16 sps:$4 sm:$0xff]   ;;  %v2919_v51 = vld [vmem:[%s3141_s8 + $0x84] ss:$16 sps:$4 sm:$0xff]  }
  0x22   : > { %v2922_v52 = vld [vmem:[%s3141_s8 + $0x8c] ss:$16 sps:$4 sm:$0xff]   ;;  %v2916_v53 = vld [vmem:[%s3175_s12 + $0x10] sm:$0xff]   ;;  %v2920_v55 = vld [vmem:[%s3141_s8 + $0x88] ss:$16 sps:$4 sm:$0xff]  }
  0x23   : > { %843 = vmatpush1.bf16.msra.mxu0 %v2870_v19  ;;  %916 = vmatpush1.bf16.msra.mxu1 %v2871_v20  ;;  %v2917_v54 = vld [vmem:[%s3141_s8 + $0x80] ss:$16 sps:$4 sm:$0xff]   ;;  %v2925_v56 = vld [vmem:[%s3141_s8 + $0xa4] ss:$16 sps:$4 sm:$0xff]   ;;  %v2928_v57 = vld [vmem:[%s3141_s8 + $0xac] ss:$16 sps:$4 sm:$0xff]  }
  0x24   : > { %844 = vmatprep.subr.bf16.mxu0 %v2872_v21  ;;  %917 = vmatprep.subr.bf16.mxu1 %v2874_v22  ;;  %v2923_v58 = vld [vmem:[%s3141_s8 + $0xa0] ss:$16 sps:$4 sm:$0xff]   ;;  %v2926_v59 = vld [vmem:[%s3141_s8 + $0xa8] ss:$16 sps:$4 sm:$0xff]   ;;  %v2932_v60 = vld [vmem:[%s3141_s8 + $0xc4] ss:$16 sps:$4 sm:$0xff]  }
  0x25   : > { %v2935_v61 = vld [vmem:[%s3141_s8 + $0xcc] ss:$16 sps:$4 sm:$0xff]   ;;  %v2930_v63 = vld [vmem:[%s3141_s8 + $0xc0] ss:$16 sps:$4 sm:$0xff]   ;;  %v2933_v1 = vld [vmem:[%s3141_s8 + $0xc8] ss:$16 sps:$4 sm:$0xff]  }
  0x26   : > { %v2929_v62 = vld [vmem:[%s3175_s12 + $0x18] sm:$0xff]   ;;  %v2938_v2 = vld [vmem:[%s3141_s8 + $0xe4] ss:$16 sps:$4 sm:$0xff]   ;;  %v2936_v4 = vld [vmem:[%s3141_s8 + $0xe0] ss:$16 sps:$4 sm:$0xff]   ;;  %s3375_s12 = scalar_lea.vmem %s3485_s7, %s2720_s10 }
  0x27   : > { %845 = vmatpush1.bf16.msra.mxu0 %v2876_v23  ;;  %918 = vmatpush1.bf16.msra.mxu1 %v2877_v24  ;;  %v2941_v3 = vld [vmem:[%s3141_s8 + $0xec] ss:$16 sps:$4 sm:$0xff]   ;;  %v2939_v5 = vld [vmem:[%s3141_s8 + $0xe8] ss:$16 sps:$4 sm:$0xff]   ;;  %v2945_v6 = vld [vmem:[%s3141_s8 + $0x204] ss:$16 sps:$4 sm:$0xff]  }
  0x28   : > { %846 = vmatprep.subr.bf16.mxu0 %v2878_v25  ;;  %919 = vmatprep.subr.bf16.mxu1 %v2880_v26  ;;  %v2948_v7 = vld [vmem:[%s3141_s8 + $0x20c] ss:$16 sps:$4 sm:$0xff]   ;;  %v2942_v8 = vld [vmem:[%s3210_s15] sm:$0xff]   ;;  %v2946_v10 = vld [vmem:[%s3141_s8 + $0x208] ss:$16 sps:$4 sm:$0xff]  }
  0x29   : > { %v2943_v9 = vld [vmem:[%s3141_s8 + $0x200] ss:$16 sps:$4 sm:$0xff]   ;;  %v2951_v11 = vld [vmem:[%s3141_s8 + $0x224] ss:$16 sps:$4 sm:$0xff]   ;;  %v2954_v12 = vld [vmem:[%s3141_s8 + $0x22c] ss:$16 sps:$4 sm:$0xff]  }
  0x2a   : > { %v2949_v13 = vld [vmem:[%s3141_s8 + $0x220] ss:$16 sps:$4 sm:$0xff]   ;;  %v2952_v14 = vld [vmem:[%s3141_s8 + $0x228] ss:$16 sps:$4 sm:$0xff]   ;;  %v2958_v15 = vld [vmem:[%s3141_s8 + $0x244] ss:$16 sps:$4 sm:$0xff]  }
  0x2b   : > { %847 = vmatpush1.bf16.msra.mxu0 %v2882_v27  ;;  %920 = vmatpush1.bf16.msra.mxu1 %v2883_v28  ;;  %v2961_v16 = vld [vmem:[%s3141_s8 + $0x24c] ss:$16 sps:$4 sm:$0xff]   ;;  %v2956_v18 = vld [vmem:[%s3141_s8 + $0x240] ss:$16 sps:$4 sm:$0xff]   ;;  %v2959_v19 = vld [vmem:[%s3141_s8 + $0x248] ss:$16 sps:$4 sm:$0xff]  }
  0x2c   : > { %848 = vmatprep.subr.bf16.mxu0 %v2884_v29  ;;  %921 = vmatprep.subr.bf16.mxu1 %v2886_v30  ;;  %v2955_v17 = vld [vmem:[%s3210_s15 + $0x8] sm:$0xff]   ;;  %v2964_v20 = vld [vmem:[%s3141_s8 + $0x264] ss:$16 sps:$4 sm:$0xff]   ;;  %v2962_v22 = vld [vmem:[%s3141_s8 + $0x260] ss:$16 sps:$4 sm:$0xff]  }
  0x2d   : > { %v2967_v21 = vld [vmem:[%s3141_s8 + $0x26c] ss:$16 sps:$4 sm:$0xff]   ;;  %v2965_v23 = vld [vmem:[%s3141_s8 + $0x268] ss:$16 sps:$4 sm:$0xff]   ;;  %v2971_v24 = vld [vmem:[%s3141_s8 + $0x284] ss:$16 sps:$4 sm:$0xff]  }
  0x2e   : > { %v2974_v25 = vld [vmem:[%s3141_s8 + $0x28c] ss:$16 sps:$4 sm:$0xff]   ;;  %v2968_v26 = vld [vmem:[%s3210_s15 + $0x10] sm:$0xff]   ;;  %v2972_v28 = vld [vmem:[%s3141_s8 + $0x288] ss:$16 sps:$4 sm:$0xff]  }
  0x2f   : > { %849 = vmatpush1.bf16.msra.mxu0 %v2888_v31  ;;  %922 = vmatpush1.bf16.msra.mxu1 %v2889_v32  ;;  %v2969_v27 = vld [vmem:[%s3141_s8 + $0x280] ss:$16 sps:$4 sm:$0xff]   ;;  %v2977_v29 = vld [vmem:[%s3141_s8 + $0x2a4] ss:$16 sps:$4 sm:$0xff]   ;;  %v2980_v30 = vld [vmem:[%s3141_s8 + $0x2ac] ss:$16 sps:$4 sm:$0xff]  }
  0x30   : > { %1164 = vmatprep.subr.bf16.mxu0 %v2893_v33  ;;  %1237 = vmatprep.subr.bf16.mxu1 %v2896_v34  ;;  %v2975_v31 = vld [vmem:[%s3141_s8 + $0x2a0] ss:$16 sps:$4 sm:$0xff]   ;;  %v2978_v32 = vld [vmem:[%s3141_s8 + $0x2a8] ss:$16 sps:$4 sm:$0xff]   ;;  %v2984_v33 = vld [vmem:[%s3141_s8 + $0x2c4] ss:$16 sps:$4 sm:$0xff]  }
  0x31   : > { %v2987_v34 = vld [vmem:[%s3141_s8 + $0x2cc] ss:$16 sps:$4 sm:$0xff]  }
  0x32   : > { %867 = vmatmul.mubr.bf16.vlgmr.msra.gmra.mrb[0].mxu0 %v2890_v35  ;;  %940 = vmatmul.mubr.bf16.vlgmr.msra.gmra.mrb[0].mxu1 %v2890_v35  ;;  %v2981_v35 = vld [vmem:[%s3210_s15 + $0x18] sm:$0xff]  }
  0x33   : > { %1165 = vmatpush1.bf16.msra.mxu0 %v2891_v36  ;;  %1238 = vmatpush1.bf16.msra.mxu1 %v2894_v37  ;;  %v2982_v36 = vld [vmem:[%s3141_s8 + $0x2c0] ss:$16 sps:$4 sm:$0xff]   ;;  %v2985_v37 = vld [vmem:[%s3141_s8 + $0x2c8] ss:$16 sps:$4 sm:$0xff]  }
  0x34   : > { %1166 = vmatprep.subr.bf16.mxu0 %v2899_v38  ;;  %1239 = vmatprep.subr.bf16.mxu1 %v2902_v39  ;;  %v2990_v38 = vld [vmem:[%s3141_s8 + $0x2e4] ss:$16 sps:$4 sm:$0xff]   ;;  %v2993_v39 = vld [vmem:[%s3141_s8 + $0x2ec] ss:$16 sps:$4 sm:$0xff]  }
  0x35   : > { %876 = vmatprep.mubr.bf16.mxu0 %v3074_v0  ;;  %949 = vmatprep.mubr.bf16.mxu1 %v3074_v0 }
  0x37   : > { %1167 = vmatpush1.bf16.msra.mxu0 %v2897_v40  ;;  %1240 = vmatpush1.bf16.msra.mxu1 %v2900_v41  ;;  %v2988_v40 = vld [vmem:[%s3141_s8 + $0x2e0] ss:$16 sps:$4 sm:$0xff]   ;;  %v2991_v41 = vld [vmem:[%s3141_s8 + $0x2e8] ss:$16 sps:$4 sm:$0xff]  }
  0x38   : > { %1168 = vmatprep.subr.bf16.mxu0 %v2906_v42  ;;  %1241 = vmatprep.subr.bf16.mxu1 %v2909_v43  ;;  %v2997_v42 = vld [vmem:[%s3141_s8 + $0x304] ss:$16 sps:$4 sm:$0xff]   ;;  %v3000_v43 = vld [vmem:[%s3141_s8 + $0x30c] ss:$16 sps:$4 sm:$0xff]  }
  0x3a   : > { %877 = vmatmul.mubr.bf16.gmra.mrb[4].mxu0 %v2903_v44  ;;  %950 = vmatmul.mubr.bf16.gmra.mrb[4].mxu1 %v2903_v44  ;;  %v2994_v44 = vld [vmem:[%s3254_s18] sm:$0xff]  }
  0x3b   : > { %1169 = vmatpush1.bf16.msra.mxu0 %v2904_v45  ;;  %1242 = vmatpush1.bf16.msra.mxu1 %v2907_v46  ;;  %v2995_v45 = vld [vmem:[%s3141_s8 + $0x300] ss:$16 sps:$4 sm:$0xff]   ;;  %v2998_v46 = vld [vmem:[%s3141_s8 + $0x308] ss:$16 sps:$4 sm:$0xff]  }
  0x3c   : > { %1170 = vmatprep.subr.bf16.mxu0 %v2912_v47  ;;  %1243 = vmatprep.subr.bf16.mxu1 %v2915_v48  ;;  %v3003_v47 = vld [vmem:[%s3141_s8 + $0x324] ss:$16 sps:$4 sm:$0xff]   ;;  %v3006_v48 = vld [vmem:[%s3141_s8 + $0x32c] ss:$16 sps:$4 sm:$0xff]  }
  0x3d   : > { %886 = vmatprep.mubr.bf16.mxu0 %v3074_v0  ;;  %959 = vmatprep.mubr.bf16.mxu1 %v3074_v0 }
  0x3f   : > { %1171 = vmatpush1.bf16.msra.mxu0 %v2910_v49  ;;  %1244 = vmatpush1.bf16.msra.mxu1 %v2913_v50  ;;  %v3001_v49 = vld [vmem:[%s3141_s8 + $0x320] ss:$16 sps:$4 sm:$0xff]   ;;  %v3004_v50 = vld [vmem:[%s3141_s8 + $0x328] ss:$16 sps:$4 sm:$0xff]  }
  0x40   : > { %1172 = vmatprep.subr.bf16.mxu0 %v2919_v51  ;;  %1245 = vmatprep.subr.bf16.mxu1 %v2922_v52  ;;  %v3010_v51 = vld [vmem:[%s3141_s8 + $0x344] ss:$16 sps:$4 sm:$0xff]   ;;  %v3013_v52 = vld [vmem:[%s3141_s8 + $0x34c] ss:$16 sps:$4 sm:$0xff]  }
  0x42   : > { %887 = vmatmul.mubr.bf16.gmra.mrb[8].mxu0 %v2916_v53  ;;  %960 = vmatmul.mubr.bf16.gmra.mrb[8].mxu1 %v2916_v53  ;;  %v3007_v53 = vld [vmem:[%s3254_s18 + $0x8] sm:$0xff]  }
  0x43   : > { %1173 = vmatpush1.bf16.msra.mxu0 %v2917_v54  ;;  %1246 = vmatpush1.bf16.msra.mxu1 %v2920_v55  ;;  %v3008_v54 = vld [vmem:[%s3141_s8 + $0x340] ss:$16 sps:$4 sm:$0xff]   ;;  %v3011_v55 = vld [vmem:[%s3141_s8 + $0x348] ss:$16 sps:$4 sm:$0xff]  }
  0x44   : > { %1174 = vmatprep.subr.bf16.mxu0 %v2925_v56  ;;  %1247 = vmatprep.subr.bf16.mxu1 %v2928_v57  ;;  %v3016_v56 = vld [vmem:[%s3141_s8 + $0x364] ss:$16 sps:$4 sm:$0xff]   ;;  %v3019_v57 = vld [vmem:[%s3141_s8 + $0x36c] ss:$16 sps:$4 sm:$0xff]  }
  0x45   : > { %896 = vmatprep.mubr.bf16.mxu0 %v3074_v0  ;;  %969 = vmatprep.mubr.bf16.mxu1 %v3074_v0 }
  0x47   : > { %1175 = vmatpush1.bf16.msra.mxu0 %v2923_v58  ;;  %1248 = vmatpush1.bf16.msra.mxu1 %v2926_v59  ;;  %v3014_v58 = vld [vmem:[%s3141_s8 + $0x360] ss:$16 sps:$4 sm:$0xff]   ;;  %v3017_v59 = vld [vmem:[%s3141_s8 + $0x368] ss:$16 sps:$4 sm:$0xff]  }
  0x48   : > { %1176 = vmatprep.subr.bf16.mxu0 %v2932_v60  ;;  %1249 = vmatprep.subr.bf16.mxu1 %v2935_v61  ;;  %v3023_v60 = vld [vmem:[%s3141_s8 + $0x384] ss:$16 sps:$4 sm:$0xff]   ;;  %v3026_v61 = vld [vmem:[%s3141_s8 + $0x38c] ss:$16 sps:$4 sm:$0xff]  }
  0x4a   : > { %897 = vmatmul.mubr.bf16.gmra.mrb[12].mxu0 %v2929_v62  ;;  %970 = vmatmul.mubr.bf16.gmra.mrb[12].mxu1 %v2929_v62  ;;  %v3020_v62 = vld [vmem:[%s3254_s18 + $0x10] sm:$0xff]  }
  0x4b   : > { %1177 = vmatpush1.bf16.msra.mxu0 %v2930_v63  ;;  %1250 = vmatpush1.bf16.msra.mxu1 %v2933_v1  ;;  %v3021_v63 = vld [vmem:[%s3141_s8 + $0x380] ss:$16 sps:$4 sm:$0xff]   ;;  %v3024_v1 = vld [vmem:[%s3141_s8 + $0x388] ss:$16 sps:$4 sm:$0xff]  }
  0x4c   : > { %1178 = vmatprep.subr.bf16.mxu0 %v2938_v2  ;;  %1251 = vmatprep.subr.bf16.mxu1 %v2941_v3  ;;  %v3029_v2 = vld [vmem:[%s3141_s8 + $0x3a4] ss:$16 sps:$4 sm:$0xff]   ;;  %v3032_v3 = vld [vmem:[%s3141_s8 + $0x3ac] ss:$16 sps:$4 sm:$0xff]  }
  0x4d   : > { %1196 = vmatprep.mubr.bf16.mxu0 %v3074_v0  ;;  %1269 = vmatprep.mubr.bf16.mxu1 %v3074_v0 }
  0x4f   : > { %1179 = vmatpush1.bf16.msra.mxu0 %v2936_v4  ;;  %1252 = vmatpush1.bf16.msra.mxu1 %v2939_v5  ;;  %v3027_v4 = vld [vmem:[%s3141_s8 + $0x3a0] ss:$16 sps:$4 sm:$0xff]   ;;  %v3030_v5 = vld [vmem:[%s3141_s8 + $0x3a8] ss:$16 sps:$4 sm:$0xff]  }
  0x50   : > { %1534 = vmatprep.subr.bf16.mxu0 %v2945_v6  ;;  %1607 = vmatprep.subr.bf16.mxu1 %v2948_v7  ;;  %v3036_v6 = vld [vmem:[%s3141_s8 + $0x3c4] ss:$16 sps:$4 sm:$0xff]   ;;  %v3039_v7 = vld [vmem:[%s3141_s8 + $0x3cc] ss:$16 sps:$4 sm:$0xff]  }
  0x52   : > { %1197 = vmatmul.mubr.bf16.vlgmr.msra.gmra.mrb[0].mxu0 %v2942_v8  ;;  %1270 = vmatmul.mubr.bf16.vlgmr.msra.gmra.mrb[0].mxu1 %v2942_v8  ;;  %v3033_v8 = vld [vmem:[%s3254_s18 + $0x18] sm:$0xff]  }
  0x53   : > { %1535 = vmatpush1.bf16.msra.mxu0 %v2943_v9  ;;  %1608 = vmatpush1.bf16.msra.mxu1 %v2946_v10  ;;  %v3034_v9 = vld [vmem:[%s3141_s8 + $0x3c0] ss:$16 sps:$4 sm:$0xff]   ;;  %v3037_v10 = vld [vmem:[%s3141_s8 + $0x3c8] ss:$16 sps:$4 sm:$0xff]  }
  0x54   : > { %1536 = vmatprep.subr.bf16.mxu0 %v2951_v11  ;;  %1609 = vmatprep.subr.bf16.mxu1 %v2954_v12  ;;  %v3042_v11 = vld [vmem:[%s3141_s8 + $0x3e4] ss:$16 sps:$4 sm:$0xff]   ;;  %v3045_v12 = vld [vmem:[%s3141_s8 + $0x3ec] ss:$16 sps:$4 sm:$0xff]  }
  0x55   : > { %1206 = vmatprep.mubr.bf16.mxu0 %v3074_v0  ;;  %1279 = vmatprep.mubr.bf16.mxu1 %v3074_v0 }
  0x57   : > { %1537 = vmatpush1.bf16.msra.mxu0 %v2949_v13  ;;  %1610 = vmatpush1.bf16.msra.mxu1 %v2952_v14  ;;  %v3040_v13 = vld [vmem:[%s3141_s8 + $0x3e0] ss:$16 sps:$4 sm:$0xff]   ;;  %v3043_v14 = vld [vmem:[%s3141_s8 + $0x3e8] ss:$16 sps:$4 sm:$0xff]  }
  0x58   : > { %1538 = vmatprep.subr.bf16.mxu0 %v2958_v15  ;;  %1611 = vmatprep.subr.bf16.mxu1 %v2961_v16  ;;  %v3046_v15 = vld [vmem:[%s3294_s21] sm:$0xff]   ;;  %v3047_v16 = vld [vmem:[%s3294_s21 + $0x8] sm:$0xff]  }
  0x5a   : > { %1207 = vmatmul.mubr.bf16.gmra.mrb[4].mxu0 %v2955_v17  ;;  %1280 = vmatmul.mubr.bf16.gmra.mrb[4].mxu1 %v2955_v17  ;;  %v3048_v17 = vld [vmem:[%s3294_s21 + $0x10] sm:$0xff]  }
  0x5b   : > { %1539 = vmatpush1.bf16.msra.mxu0 %v2956_v18  ;;  %1612 = vmatpush1.bf16.msra.mxu1 %v2959_v19  ;;  %v3049_v18 = vld [vmem:[%s3294_s21 + $0x18] sm:$0xff]   ;;  %v2116_v19 = vlaneseq }
  0x5c   : > { %1540 = vmatprep.subr.bf16.mxu0 %v2964_v20  ;;  %1613 = vmatprep.subr.bf16.mxu1 %v2967_v21 }
  0x5d   : > { %1216 = vmatprep.mubr.bf16.mxu0 %v3074_v0  ;;  %1289 = vmatprep.mubr.bf16.mxu1 %v3074_v0  ;;  %v2117_v20 = vshrl.u32 %v2116_v19, 7 }
  0x5f   : > { %1541 = vmatpush1.bf16.msra.mxu0 %v2962_v22  ;;  %1614 = vmatpush1.bf16.msra.mxu1 %v2965_v23  ;;  %v2118_v21 = vsub.s32 0, %v2117_v20  ;;  %v2126_v22 = vsub.s32 2, %v2117_v20  ;;  %v2114_v23 = vld [vmem:[%s549_s29] sm:$0xf] }
  0x60   : > { %1542 = vmatprep.subr.bf16.mxu0 %v2971_v24  ;;  %1615 = vmatprep.subr.bf16.mxu1 %v2974_v25  ;;  %v2122_v24 = vsub.s32 1, %v2117_v20  ;;  %v2200_v25 = vld [vmem:[%s553_s9] sm:$0xf] }
  0x62   : > { %1217 = vmatmul.mubr.bf16.gmra.mrb[8].mxu0 %v2968_v26  ;;  %1290 = vmatmul.mubr.bf16.gmra.mrb[8].mxu1 %v2968_v26  ;;  %v3351_v26 = vrot.slane %v2114_v23, %v2118_v21 }
  0x63   : > { %1543 = vmatpush1.bf16.msra.mxu0 %v2969_v27  ;;  %1616 = vmatpush1.bf16.msra.mxu1 %v2972_v28  ;;  %v3353_v27 = vrot.slane %v2114_v23, %v2126_v22  ;;  %v3355_v28 = vrot.slane %v2114_v23, %v2122_v24 }
  0x64   : > { %1544 = vmatprep.subr.bf16.mxu0 %v2977_v29  ;;  %1617 = vmatprep.subr.bf16.mxu1 %v2980_v30  ;;  %v3359_v30 = vrot.slane %v2200_v25, %v2118_v21 }
  0x65   : > { %1226 = vmatprep.mubr.bf16.mxu0 %v3074_v0  ;;  %1299 = vmatprep.mubr.bf16.mxu1 %v3074_v0 }
  0x67   : > { %1545 = vmatpush1.bf16.msra.mxu0 %v2975_v31  ;;  %1618 = vmatpush1.bf16.msra.mxu1 %v2978_v32  ;;  %v3361_v31 = vrot.slane %v2200_v25, %v2126_v22 }
  0x68   : > { %1546 = vmatprep.subr.bf16.mxu0 %v2984_v33  ;;  %1619 = vmatprep.subr.bf16.mxu1 %v2987_v34  ;;  %v3364_v34 = vrot.slane %v2200_v25, %v2122_v24 }
  0x6a   : > { %1227 = vmatmul.mubr.bf16.gmra.mrb[12].mxu0 %v2981_v35  ;;  %1300 = vmatmul.mubr.bf16.gmra.mrb[12].mxu1 %v2981_v35 }
  0x6b   : > { %1547 = vmatpush1.bf16.msra.mxu0 %v2982_v36  ;;  %1620 = vmatpush1.bf16.msra.mxu1 %v2985_v37 }
  0x6c   : > { %1548 = vmatprep.subr.bf16.mxu0 %v2990_v38  ;;  %1621 = vmatprep.subr.bf16.mxu1 %v2993_v39 }
  0x6d   : > { %1566 = vmatprep.mubr.bf16.mxu0 %v3074_v0  ;;  %1639 = vmatprep.mubr.bf16.mxu1 %v3074_v0 }
  0x6f   : > { %1549 = vmatpush1.bf16.msra.mxu0 %v2988_v40  ;;  %1622 = vmatpush1.bf16.msra.mxu1 %v2991_v41 }
  0x70   : > { %1936 = vmatprep.subr.bf16.mxu0 %v2997_v42  ;;  %2009 = vmatprep.subr.bf16.mxu1 %v3000_v43 }
  0x72   : > { %1567 = vmatmul.mubr.bf16.vlgmr.msra.gmra.mrb[0].mxu0 %v2994_v44  ;;  %1640 = vmatmul.mubr.bf16.vlgmr.msra.gmra.mrb[0].mxu1 %v2994_v44 }
  0x73   : > { %1937 = vmatpush1.bf16.msra.mxu0 %v2995_v45  ;;  %2010 = vmatpush1.bf16.msra.mxu1 %v2998_v46 }
  0x74   : > { %1938 = vmatprep.subr.bf16.mxu0 %v3003_v47  ;;  %2011 = vmatprep.subr.bf16.mxu1 %v3006_v48 }
  0x75   : > { %1576 = vmatprep.mubr.bf16.mxu0 %v3074_v0  ;;  %1649 = vmatprep.mubr.bf16.mxu1 %v3074_v0 }
  0x77   : > { %1939 = vmatpush1.bf16.msra.mxu0 %v3001_v49  ;;  %2012 = vmatpush1.bf16.msra.mxu1 %v3004_v50 }
  0x78   : > { %1940 = vmatprep.subr.bf16.mxu0 %v3010_v51  ;;  %2013 = vmatprep.subr.bf16.mxu1 %v3013_v52 }
  0x7a   : > { %1577 = vmatmul.mubr.bf16.gmra.mrb[4].mxu0 %v3007_v53  ;;  %1650 = vmatmul.mubr.bf16.gmra.mrb[4].mxu1 %v3007_v53 }
  0x7b   : > { %1941 = vmatpush1.bf16.msra.mxu0 %v3008_v54  ;;  %2014 = vmatpush1.bf16.msra.mxu1 %v3011_v55 }
  0x7c   : > { %1942 = vmatprep.subr.bf16.mxu0 %v3016_v56  ;;  %2015 = vmatprep.subr.bf16.mxu1 %v3019_v57 }
  0x7d   : > { %1586 = vmatprep.mubr.bf16.mxu0 %v3074_v0  ;;  %1659 = vmatprep.mubr.bf16.mxu1 %v3074_v0 }
  0x7f   : > { %1943 = vmatpush1.bf16.msra.mxu0 %v3014_v58  ;;  %2016 = vmatpush1.bf16.msra.mxu1 %v3017_v59 }
  0x80   : > { %1944 = vmatprep.subr.bf16.mxu0 %v3023_v60  ;;  %2017 = vmatprep.subr.bf16.mxu1 %v3026_v61 }
  0x82   : > { %1587 = vmatmul.mubr.bf16.gmra.mrb[8].mxu0 %v3020_v62  ;;  %1660 = vmatmul.mubr.bf16.gmra.mrb[8].mxu1 %v3020_v62 }
  0x83   : > { %1945 = vmatpush1.bf16.msra.mxu0 %v3021_v63  ;;  %2018 = vmatpush1.bf16.msra.mxu1 %v3024_v1 }
  0x84   : > { %1946 = vmatprep.subr.bf16.mxu0 %v3029_v2  ;;  %2019 = vmatprep.subr.bf16.mxu1 %v3032_v3 }
  0x85   : > { %1596 = vmatprep.mubr.bf16.mxu0 %v3074_v0  ;;  %1669 = vmatprep.mubr.bf16.mxu1 %v3074_v0 }
  0x87   : > { %1947 = vmatpush1.bf16.msra.mxu0 %v3027_v4  ;;  %2020 = vmatpush1.bf16.msra.mxu1 %v3030_v5 }
  0x88   : > { %1948 = vmatprep.subr.bf16.mxu0 %v3036_v6  ;;  %2021 = vmatprep.subr.bf16.mxu1 %v3039_v7 }
  0x8a   : > { %1597 = vmatmul.mubr.bf16.gmra.mrb[12].mxu0 %v3033_v8  ;;  %1670 = vmatmul.mubr.bf16.gmra.mrb[12].mxu1 %v3033_v8 }
  0x8b   : > { %1949 = vmatpush1.bf16.msra.mxu0 %v3034_v9  ;;  %2022 = vmatpush1.bf16.msra.mxu1 %v3037_v10 }
  0x8c   : > { %1950 = vmatprep.subr.bf16.mxu0 %v3042_v11  ;;  %2023 = vmatprep.subr.bf16.mxu1 %v3045_v12 }
  0x8d   : > { %1968 = vmatprep.mubr.bf16.mxu0 %v3074_v0  ;;  %2041 = vmatprep.mubr.bf16.mxu1 %v3074_v0 }
  0x8f   : > { %1951 = vmatpush1.bf16.msra.mxu0 %v3040_v13  ;;  %2024 = vmatpush1.bf16.msra.mxu1 %v3043_v14 }
  0x92   : > { %1969 = vmatmul.mubr.bf16.vlgmr.msra.gmra.mrb[0].mxu0 %v3046_v15  ;;  %2042 = vmatmul.mubr.bf16.vlgmr.msra.gmra.mrb[0].mxu1 %v3046_v15 }
  0x93   : > { %1978 = vmatprep.mubr.bf16.mxu0 %v3074_v0  ;;  %2051 = vmatprep.mubr.bf16.mxu1 %v3074_v0 }
  0x9a   : > { %1979 = vmatmul.mubr.bf16.gmra.mrb[4].mxu0 %v3047_v16  ;;  %2052 = vmatmul.mubr.bf16.gmra.mrb[4].mxu1 %v3047_v16 }
  0x9b   : > { %1988 = vmatprep.mubr.bf16.mxu0 %v3074_v0  ;;  %2061 = vmatprep.mubr.bf16.mxu1 %v3074_v0 }
  0xa2   : > { %1989 = vmatmul.mubr.bf16.gmra.mrb[8].mxu0 %v3048_v17  ;;  %2062 = vmatmul.mubr.bf16.gmra.mrb[8].mxu1 %v3048_v17 }
  0xa3   : > { %1998 = vmatprep.mubr.bf16.mxu0 %v3074_v0  ;;  %2071 = vmatprep.mubr.bf16.mxu1 %v3074_v0  ;;  %v2130_v0 = vsub.s32 3, %v2117_v20 }
  0xa5   : > { %v3357_v29 = vrot.slane %v2114_v23, %v2130_v0  ;;  %v3366_v35 = vrot.slane %v2200_v25, %v2130_v0 }
  0xaa   : > { %1999 = vmatmul.mubr.bf16.gmra.mrb[12].mxu0 %v3049_v18  ;;  %2072 = vmatmul.mubr.bf16.gmra.mrb[12].mxu1 %v3049_v18 }
 0x165   : > { %v1970_v32 = vpop.f32.mrb[0].mxu0  ;;  %v2043_v33 = vpop.f32.mrb[0].mxu1 }
 0x166   : > { %v2136_v36 = vadd.f32 %v3351_v26, %v1970_v32  ;;  %v2138_v37 = vadd.f32 %v3353_v27, %v2043_v33  ;;  %v1972_v38 = vpop.f32.mrb[1].mxu0  ;;  %v2045_v39 = vpop.f32.mrb[1].mxu1 }
 0x167   : > { %v2137_v40 = vadd.f32 %v3355_v28, %v1972_v38  ;;  %v2139_v41 = vadd.f32 %v3357_v29, %v2045_v39  ;;  %v1974_v42 = vpop.f32.mrb[2].mxu0  ;;  %v2047_v43 = vpop.f32.mrb[2].mxu1 }
 0x168   : > { %vm2168_vm0 = vcmp.gt.f32.partialorder %v2136_v36, 0.0  ;;  %v2222_v44 = vmul.f32 %v3359_v30, %v2136_v36  ;;  %vm2170_vm1 = vcmp.gt.f32.partialorder %v2138_v37, 0.0  ;;  %v2224_v45 = vmul.f32 %v3361_v31, %v2138_v37  ;;  %v1976_v46 = vpop.f32.mrb[3].mxu0  ;;  %v2049_v47 = vpop.f32.mrb[3].mxu1 }
 0x169   : > { %vm2169_vm2 = vcmp.gt.f32.partialorder %v2137_v40, 0.0  ;;  %v2223_v48 = vmul.f32 %v3364_v34, %v2137_v40  ;;  %vm2171_vm3 = vcmp.gt.f32.partialorder %v2139_v41, 0.0  ;;  %v2225_v49 = vmul.f32 %v3366_v35, %v2139_v41 }
 0x16a   : > { %v2254_v50 = vsel %vm2168_vm0, %v2136_v36, %v2222_v44  ;;  %v2256_v51 = vsel %vm2170_vm1, %v2138_v37, %v2224_v45  ;;  %v2140_v52 = vadd.f32 %v3351_v26, %v1974_v42  ;;  %v2142_v53 = vadd.f32 %v3353_v27, %v2047_v43 }
 0x16b   : > { %2286 = vst [vmem:[%s3375_s12] sm:$0xff] %v2254_v50  ;;  %2288 = vst [vmem:[%s3375_s12 + $0x10] sm:$0xff] %v2256_v51  ;;  %v2255_v54 = vsel %vm2169_vm2, %v2137_v40, %v2223_v48  ;;  %v2257_v55 = vsel %vm2171_vm3, %v2139_v41, %v2225_v49  ;;  %v2141_v56 = vadd.f32 %v3355_v28, %v1976_v46 }
 0x16c   : > { %v2143_v57 = vadd.f32 %v3357_v29, %v2049_v47  ;;  %2287 = vst [vmem:[%s3375_s12 + $0x8] sm:$0xff] %v2255_v54  ;;  %2289 = vst [vmem:[%s3375_s12 + $0x18] sm:$0xff] %v2257_v55  ;;  %vm2172_vm4 = vcmp.gt.f32.partialorder %v2140_v52, 0.0  ;;  %v2226_v58 = vmul.f32 %v3359_v30, %v2140_v52  ;;  %vm2174_vm5 = vcmp.gt.f32.partialorder %v2142_v53, 0.0 }
 0x16d   : > { %v2228_v59 = vmul.f32 %v3361_v31, %v2142_v53  ;;  %vm2173_vm6 = vcmp.gt.f32.partialorder %v2141_v56, 0.0  ;;  %v2227_v60 = vmul.f32 %v3364_v34, %v2141_v56  ;;  %v1980_v62 = vpop.f32.mrb[4].mxu0  ;;  %v2053_v63 = vpop.f32.mrb[4].mxu1 }
 0x16e   : > { %vm2175_vm7 = vcmp.gt.f32.partialorder %v2143_v57, 0.0  ;;  %v2229_v61 = vmul.f32 %v3366_v35, %v2143_v57  ;;  %v2258_v1 = vsel %vm2172_vm4, %v2140_v52, %v2226_v58  ;;  %v2144_v3 = vadd.f32 %v3351_v26, %v1980_v62  ;;  %v1982_v5 = vpop.f32.mrb[5].mxu0  ;;  %v2055_v6 = vpop.f32.mrb[5].mxu1 }
 0x16f   : > { %v2260_v2 = vsel %vm2174_vm5, %v2142_v53, %v2228_v59  ;;  %v2146_v4 = vadd.f32 %v3353_v27, %v2053_v63  ;;  %2290 = vst [vmem:[%s3375_s12 + $0x20] sm:$0xff] %v2258_v1  ;;  %v2259_v7 = vsel %vm2173_vm6, %v2141_v56, %v2227_v60  ;;  %v2145_v9 = vadd.f32 %v3355_v28, %v1982_v5  ;;  %v1984_v11 = vpop.f32.mrb[6].mxu0  ;;  %v2057_v12 = vpop.f32.mrb[6].mxu1 }
 0x170   : > { %2292 = vst [vmem:[%s3375_s12 + $0x30] sm:$0xff] %v2260_v2  ;;  %v2261_v8 = vsel %vm2175_vm7, %v2143_v57, %v2229_v61  ;;  %v2147_v10 = vadd.f32 %v3357_v29, %v2055_v6  ;;  %2291 = vst [vmem:[%s3375_s12 + $0x28] sm:$0xff] %v2259_v7  ;;  %vm2176_vm8 = vcmp.gt.f32.partialorder %v2144_v3, 0.0  ;;  %v2230_v13 = vmul.f32 %v3359_v30, %v2144_v3  ;;  %v1986_v15 = vpop.f32.mrb[7].mxu0  ;;  %v2059_v16 = vpop.f32.mrb[7].mxu1 }
 0x171   : > { %2293 = vst [vmem:[%s3375_s12 + $0x38] sm:$0xff] %v2261_v8  ;;  %vm2178_vm9 = vcmp.gt.f32.partialorder %v2146_v4, 0.0  ;;  %v2232_v14 = vmul.f32 %v3361_v31, %v2146_v4  ;;  %vm2177_vm10 = vcmp.gt.f32.partialorder %v2145_v9, 0.0  ;;  %v2231_v17 = vmul.f32 %v3364_v34, %v2145_v9 }
 0x172   : > { %vm2179_vm11 = vcmp.gt.f32.partialorder %v2147_v10, 0.0  ;;  %v2233_v18 = vmul.f32 %v3366_v35, %v2147_v10  ;;  %v2262_v19 = vsel %vm2176_vm8, %v2144_v3, %v2230_v13  ;;  %v2148_v21 = vadd.f32 %v3351_v26, %v1984_v11 }
 0x173   : > { %v2264_v20 = vsel %vm2178_vm9, %v2146_v4, %v2232_v14  ;;  %v2150_v22 = vadd.f32 %v3353_v27, %v2057_v12  ;;  %2294 = vst [vmem:[%s3375_s12 + $0x40] sm:$0xff] %v2262_v19  ;;  %v2263_v23 = vsel %vm2177_vm10, %v2145_v9, %v2231_v17  ;;  %v2149_v0 = vadd.f32 %v3355_v28, %v1986_v15 }
 0x174   : > { %2296 = vst [vmem:[%s3375_s12 + $0x50] sm:$0xff] %v2264_v20  ;;  %v2265_v24 = vsel %vm2179_vm11, %v2147_v10, %v2233_v18  ;;  %v2151_v25 = vadd.f32 %v3357_v29, %v2059_v16  ;;  %2295 = vst [vmem:[%s3375_s12 + $0x48] sm:$0xff] %v2263_v23  ;;  %vm2180_vm12 = vcmp.gt.f32.partialorder %v2148_v21, 0.0  ;;  %v2234_v32 = vmul.f32 %v3359_v30, %v2148_v21 }
 0x175   : > { %2297 = vst [vmem:[%s3375_s12 + $0x58] sm:$0xff] %v2265_v24  ;;  %vm2182_vm13 = vcmp.gt.f32.partialorder %v2150_v22, 0.0  ;;  %v2236_v33 = vmul.f32 %v3361_v31, %v2150_v22  ;;  %vm2181_vm14 = vcmp.gt.f32.partialorder %v2149_v0, 0.0  ;;  %v2235_v36 = vmul.f32 %v3364_v34, %v2149_v0  ;;  %v1990_v38 = vpop.f32.mrb[8].mxu0  ;;  %v2063_v39 = vpop.f32.mrb[8].mxu1 }
 0x176   : > { %vm2183_vm15 = vcmp.gt.f32.partialorder %v2151_v25, 0.0  ;;  %v2237_v37 = vmul.f32 %v3366_v35, %v2151_v25  ;;  %v2266_v40 = vsel %vm2180_vm12, %v2148_v21, %v2234_v32  ;;  %v2152_v42 = vadd.f32 %v3351_v26, %v1990_v38  ;;  %v1992_v44 = vpop.f32.mrb[9].mxu0  ;;  %v2065_v45 = vpop.f32.mrb[9].mxu1 }
 0x177   : > { %v2268_v41 = vsel %vm2182_vm13, %v2150_v22, %v2236_v33  ;;  %v2154_v43 = vadd.f32 %v3353_v27, %v2063_v39  ;;  %2298 = vst [vmem:[%s3375_s12 + $0x60] sm:$0xff] %v2266_v40  ;;  %v2267_v46 = vsel %vm2181_vm14, %v2149_v0, %v2235_v36  ;;  %v2153_v48 = vadd.f32 %v3355_v28, %v1992_v44  ;;  %v1994_v50 = vpop.f32.mrb[10].mxu0  ;;  %v2067_v51 = vpop.f32.mrb[10].mxu1 }
 0x178   : > { %2300 = vst [vmem:[%s3375_s12 + $0x70] sm:$0xff] %v2268_v41  ;;  %v2269_v47 = vsel %vm2183_vm15, %v2151_v25, %v2237_v37  ;;  %v2155_v49 = vadd.f32 %v3357_v29, %v2065_v45  ;;  %2299 = vst [vmem:[%s3375_s12 + $0x68] sm:$0xff] %v2267_v46  ;;  %vm2184_vm0 = vcmp.gt.f32.partialorder %v2152_v42, 0.0  ;;  %v2238_v52 = vmul.f32 %v3359_v30, %v2152_v42  ;;  %v1996_v54 = vpop.f32.mrb[11].mxu0  ;;  %v2069_v55 = vpop.f32.mrb[11].mxu1 }
 0x179   : > { %2301 = vst [vmem:[%s3375_s12 + $0x78] sm:$0xff] %v2269_v47  ;;  %vm2186_vm1 = vcmp.gt.f32.partialorder %v2154_v43, 0.0  ;;  %v2240_v53 = vmul.f32 %v3361_v31, %v2154_v43  ;;  %vm2185_vm2 = vcmp.gt.f32.partialorder %v2153_v48, 0.0  ;;  %v2239_v56 = vmul.f32 %v3364_v34, %v2153_v48 }
 0x17a   : > { %vm2187_vm3 = vcmp.gt.f32.partialorder %v2155_v49, 0.0  ;;  %v2241_v57 = vmul.f32 %v3366_v35, %v2155_v49  ;;  %v2270_v58 = vsel %vm2184_vm0, %v2152_v42, %v2238_v52  ;;  %v2156_v60 = vadd.f32 %v3351_v26, %v1994_v50 }
 0x17b   : > { %v2272_v59 = vsel %vm2186_vm1, %v2154_v43, %v2240_v53  ;;  %v2158_v61 = vadd.f32 %v3353_v27, %v2067_v51  ;;  %2302 = vst [vmem:[%s3375_s12 + $0x80] sm:$0xff] %v2270_v58  ;;  %v2271_v62 = vsel %vm2185_vm2, %v2153_v48, %v2239_v56  ;;  %v2157_v1 = vadd.f32 %v3355_v28, %v1996_v54 }
 0x17c   : > { %2304 = vst [vmem:[%s3375_s12 + $0x90] sm:$0xff] %v2272_v59  ;;  %v2273_v63 = vsel %vm2187_vm3, %v2155_v49, %v2241_v57  ;;  %v2159_v2 = vadd.f32 %v3357_v29, %v2069_v55  ;;  %2303 = vst [vmem:[%s3375_s12 + $0x88] sm:$0xff] %v2271_v62  ;;  %vm2188_vm4 = vcmp.gt.f32.partialorder %v2156_v60, 0.0  ;;  %v2242_v3 = vmul.f32 %v3359_v30, %v2156_v60 }
 0x17d   : > { %2305 = vst [vmem:[%s3375_s12 + $0x98] sm:$0xff] %v2273_v63  ;;  %vm2190_vm5 = vcmp.gt.f32.partialorder %v2158_v61, 0.0  ;;  %v2244_v4 = vmul.f32 %v3361_v31, %v2158_v61  ;;  %vm2189_vm6 = vcmp.gt.f32.partialorder %v2157_v1, 0.0  ;;  %v2243_v5 = vmul.f32 %v3364_v34, %v2157_v1  ;;  %v2000_v7 = vpop.f32.mrb[12].mxu0  ;;  %v2073_v8 = vpop.f32.mrb[12].mxu1 }
 0x17e   : > { %vm2191_vm7 = vcmp.gt.f32.partialorder %v2159_v2, 0.0  ;;  %v2245_v6 = vmul.f32 %v3366_v35, %v2159_v2  ;;  %v2274_v9 = vsel %vm2188_vm4, %v2156_v60, %v2242_v3  ;;  %v2160_v11 = vadd.f32 %v3351_v26, %v2000_v7  ;;  %v2002_v13 = vpop.f32.mrb[13].mxu0  ;;  %v2075_v14 = vpop.f32.mrb[13].mxu1 }
 0x17f   : > { %v2276_v10 = vsel %vm2190_vm5, %v2158_v61, %v2244_v4  ;;  %v2162_v12 = vadd.f32 %v3353_v27, %v2073_v8  ;;  %2306 = vst [vmem:[%s3375_s12 + $0xa0] sm:$0xff] %v2274_v9  ;;  %v2275_v15 = vsel %vm2189_vm6, %v2157_v1, %v2243_v5  ;;  %v2161_v17 = vadd.f32 %v3355_v28, %v2002_v13  ;;  %v2004_v19 = vpop.f32.mrb[14].mxu0  ;;  %v2077_v20 = vpop.f32.mrb[14].mxu1 }
 0x180   : > { %2308 = vst [vmem:[%s3375_s12 + $0xb0] sm:$0xff] %v2276_v10  ;;  %v2277_v16 = vsel %vm2191_vm7, %v2159_v2, %v2245_v6  ;;  %v2163_v18 = vadd.f32 %v3357_v29, %v2075_v14  ;;  %2307 = vst [vmem:[%s3375_s12 + $0xa8] sm:$0xff] %v2275_v15  ;;  %vm2192_vm8 = vcmp.gt.f32.partialorder %v2160_v11, 0.0  ;;  %v2246_v21 = vmul.f32 %v3359_v30, %v2160_v11  ;;  %v2006_v23 = vpop.f32.mrb[15].mxu0  ;;  %v2079_v24 = vpop.f32.mrb[15].mxu1 }
 0x181   : > { %2309 = vst [vmem:[%s3375_s12 + $0xb8] sm:$0xff] %v2277_v16  ;;  %vm2194_vm9 = vcmp.gt.f32.partialorder %v2162_v12, 0.0  ;;  %v2248_v22 = vmul.f32 %v3361_v31, %v2162_v12  ;;  %vm2193_vm10 = vcmp.gt.f32.partialorder %v2161_v17, 0.0  ;;  %v2247_v0 = vmul.f32 %v3364_v34, %v2161_v17 }
 0x182   : > { %vm2195_vm11 = vcmp.gt.f32.partialorder %v2163_v18, 0.0  ;;  %v2249_v25 = vmul.f32 %v3366_v35, %v2163_v18  ;;  %v2278_v32 = vsel %vm2192_vm8, %v2160_v11, %v2246_v21  ;;  %v2164_v36 = vadd.f32 %v3351_v26, %v2004_v19 }
 0x183   : > { %v2280_v33 = vsel %vm2194_vm9, %v2162_v12, %v2248_v22  ;;  %v2166_v37 = vadd.f32 %v3353_v27, %v2077_v20  ;;  %2310 = vst [vmem:[%s3375_s12 + $0xc0] sm:$0xff] %v2278_v32  ;;  %v2279_v38 = vsel %vm2193_vm10, %v2161_v17, %v2247_v0  ;;  %v2165_v40 = vadd.f32 %v3355_v28, %v2006_v23 }
 0x184   : > { %2312 = vst [vmem:[%s3375_s12 + $0xd0] sm:$0xff] %v2280_v33  ;;  %v2281_v39 = vsel %vm2195_vm11, %v2163_v18, %v2249_v25  ;;  %v2167_v41 = vadd.f32 %v3357_v29, %v2079_v24  ;;  %2311 = vst [vmem:[%s3375_s12 + $0xc8] sm:$0xff] %v2279_v38  ;;  %vm2196_vm12 = vcmp.gt.f32.partialorder %v2164_v36, 0.0  ;;  %v2250_v42 = vmul.f32 %v3359_v30, %v2164_v36 }
 0x185   : > { %2313 = vst [vmem:[%s3375_s12 + $0xd8] sm:$0xff] %v2281_v39  ;;  %vm2198_vm13 = vcmp.gt.f32.partialorder %v2166_v37, 0.0  ;;  %v2252_v26 = vmul.f32 %v3361_v31, %v2166_v37  ;;  %vm2197_vm14 = vcmp.gt.f32.partialorder %v2165_v40, 0.0  ;;  %v2251_v27 = vmul.f32 %v3364_v34, %v2165_v40 }
 0x186   : > { %vm2199_vm15 = vcmp.gt.f32.partialorder %v2167_v41, 0.0  ;;  %v2253_v43 = vmul.f32 %v3366_v35, %v2167_v41  ;;  %v2282_v44 = vsel %vm2196_vm12, %v2164_v36, %v2250_v42 }
 0x187   : > { %v2284_v28 = vsel %vm2198_vm13, %v2166_v37, %v2252_v26  ;;  %2314 = vst [vmem:[%s3375_s12 + $0xe0] sm:$0xff] %v2282_v44  ;;  %v2283_v29 = vsel %vm2197_vm14, %v2165_v40, %v2251_v27 }
 0x188   : > { %2316 = vst [vmem:[%s3375_s12 + $0xf0] sm:$0xff] %v2284_v28  ;;  %v2285_v45 = vsel %vm2199_vm15, %v2167_v41, %v2253_v43  ;;  %2315 = vst [vmem:[%s3375_s12 + $0xe8] sm:$0xff] %v2283_v29 }
 0x189   : > { %2317 = vst [vmem:[%s3375_s12 + $0xf8] sm:$0xff] %v2285_v45 }
 0x18a PF: > { %s17_s26 = sadd.s32 1, %s3072_s26   ;;  %s3486_s24 = smov %s3068_s25 }
 0x18b   : > { %p14_p5 = scmp.ge.s32.totalorder %s17_s26, 4   ;;  %s3487_s25 = smov %s3489_s27 }
 0x18d   :  { %16 = sbr.rel (!%p14_p5) target bundleno = 2 (0x2), region = 96 }

// kernel: net_forward.5
= control target key start
LH: loop header
LB: loop body
LE: loop exit
PB: predicated region body
PF: predicated region fallthrough
CT: control target
= control target key end

     0   :  { %s6609_s15 = smov 0   ;;  %s6611_s16 = smov 0   ;;  %s7302_s0 = inlined_call_operand.vmem [shape: bf16[6,64,4608], index: 0, kind: input, shape index: {}]   ;;  %s7303_s1 = inlined_call_operand.vmem [shape: bf16[6,4608,128], index: 1, kind: input, shape index: {}]   ;;  %s7304_s2 = inlined_call_operand.vmem [shape: f32[6,1,128], index: 2, kind: input, shape index: {}]   ;;  %s7305_s3 = inlined_call_operand.vmem [shape: f32[6,1,128], index: 3, kind: input, shape index: {}]   ;;  %s7306_s4 = inlined_call_operand.vmem [shape: bf16[6,64,128], index: 4, kind: output, shape index: {}]  }
   0x1   :  { %s6613_s17 = smov 0  }
   0x2 LB: > { %s26_s18 = sadd.s32 1, %s6578_s16  ;;  %p4829_p0 = scmp.ge.s32.totalorder %s6582_s17, 1  ;;  %s6582_s17 = sphi %s6613_s17, %s14_s17   ;;  %s6578_s16 = sphi %s6611_s16, %s7308_s16   ;;  %s6574_s15 = sphi %s6609_s15, %s7307_s15  }
   0x3   : > { %p28_p1 = scmp.ge.s32.totalorder %s26_s18, 6  ;;  %p210_p2 = scmp.lt.s32.totalorder %s6582_s17, 7 }
   0x5   : > { %s7310_s18 = smov (%p28_p1, %s26_s18), 0  ;;  %p211_p3 = pnand %p4829_p0, %p210_p2 }
   0x6   : > { %p257_p4 = scmp.lt.s32.totalorder (!%p211_p3), %s6574_s15, 5 }
   0x7   : > { %214 = sbr.rel (%p211_p3) target bundleno = 608 (0x260), region = 36 }
   0xe   : > { %s7312_s15 = smov (!%p257_p4, %s6574_s15), 5 }
   0xf   : > { %s6031_s19 = smul.u32 2304, %s7312_s15  ;;  %s274_s29 = scalar_lea.vmem %s7304_s2, %s7312_s15 }
  0x10   : > { %s6030_s23 = smul.u32 1152, %s7312_s15  ;;  %s277_s6 = scalar_lea.vmem %s7305_s3, %s7312_s15 }
  0x11   : > { %s6633_s22 = scalar_lea.vmem %s7303_s1, %s6031_s19  ;;  %s5278_s7 = sshll.u32 %s7312_s15, 5 }
  0x12   : > { %v6056_v0 = vld [vmem:[%s6633_s22 + $0x40] sm:$0xff]   ;;  %v6060_v4 = vld [vmem:[%s6633_s22 + $0x48] sm:$0xff]   ;;  %v6064_v8 = vld [vmem:[%s6633_s22 + $0x50] sm:$0xff]   ;;  %s6669_s26 = scalar_lea.vmem %s7302_s0, %s6030_s23  ;;  %s7275_s10 = scalar_lea.vmem %s7306_s4, %s5278_s7 }
  0x13   : > { %v6057_v1 = vld [vmem:[%s6633_s22 + $0xc0] sm:$0xff]   ;;  %5310 = vmatprep.subr.bf16.mxu0 %v6056_v0  ;;  %v6061_v5 = vld [vmem:[%s6633_s22 + $0xc8] sm:$0xff]   ;;  %v6065_v9 = vld [vmem:[%s6633_s22 + $0xd0] sm:$0xff]  }
  0x14   : > { %v6058_v2 = vld [vmem:[%s6633_s22] sm:$0xff]   ;;  %5350 = vmatprep.subr.bf16.mxu1 %v6057_v1  ;;  %v6062_v6 = vld [vmem:[%s6633_s22 + $0x8] sm:$0xff]   ;;  %v6066_v10 = vld [vmem:[%s6633_s22 + $0x10] sm:$0xff]  }
  0x15   : > { %v6059_v3 = vld [vmem:[%s6633_s22 + $0x80] sm:$0xff]   ;;  %5311 = vmatpush3.bf16.msra.mxu0 %v6058_v2  ;;  %v6063_v7 = vld [vmem:[%s6633_s22 + $0x88] sm:$0xff]   ;;  %v6067_v11 = vld [vmem:[%s6633_s22 + $0x90] sm:$0xff]  }
  0x16   : > { %5351 = vmatpush3.bf16.msra.mxu1 %v6059_v3  ;;  %5312 = vmatprep.subr.bf16.mxu0 %v6060_v4  ;;  %v6068_v12 = vld [vmem:[%s6633_s22 + $0x58] sm:$0xff]   ;;  %v6072_v16 = vld [vmem:[%s6633_s22 + $0x60] sm:$0xff]   ;;  %v6076_v20 = vld [vmem:[%s6633_s22 + $0x68] sm:$0xff]  }
  0x17   : > { %5352 = vmatprep.subr.bf16.mxu1 %v6061_v5  ;;  %v6069_v13 = vld [vmem:[%s6633_s22 + $0xd8] sm:$0xff]   ;;  %v6073_v17 = vld [vmem:[%s6633_s22 + $0xe0] sm:$0xff]   ;;  %v6077_v21 = vld [vmem:[%s6633_s22 + $0xe8] sm:$0xff]  }
  0x18   : > { %v6070_v14 = vld [vmem:[%s6633_s22 + $0x18] sm:$0xff]   ;;  %v6074_v18 = vld [vmem:[%s6633_s22 + $0x20] sm:$0xff]   ;;  %v6078_v22 = vld [vmem:[%s6633_s22 + $0x28] sm:$0xff]  }
  0x19   : > { %5313 = vmatpush3.bf16.msra.mxu0 %v6062_v6  ;;  %v6071_v15 = vld [vmem:[%s6633_s22 + $0x98] sm:$0xff]   ;;  %v6075_v19 = vld [vmem:[%s6633_s22 + $0xa0] sm:$0xff]   ;;  %v6079_v23 = vld [vmem:[%s6633_s22 + $0xa8] sm:$0xff]  }
  0x1a   : > { %5353 = vmatpush3.bf16.msra.mxu1 %v6063_v7  ;;  %5314 = vmatprep.subr.bf16.mxu0 %v6064_v8  ;;  %v6080_v24 = vld [vmem:[%s6633_s22 + $0x70] sm:$0xff]   ;;  %v6084_v28 = vld [vmem:[%s6633_s22 + $0x78] sm:$0xff]   ;;  %v6094_v36 = vld [vmem:[%s6633_s22 + $0x140] sm:$0xff]  }
  0x1b   : > { %5354 = vmatprep.subr.bf16.mxu1 %v6065_v9  ;;  %v6081_v25 = vld [vmem:[%s6633_s22 + $0xf0] sm:$0xff]   ;;  %v6085_v29 = vld [vmem:[%s6633_s22 + $0xf8] sm:$0xff]   ;;  %v6095_v37 = vld [vmem:[%s6633_s22 + $0x1c0] sm:$0xff]  }
  0x1c   : > { %v6082_v26 = vld [vmem:[%s6633_s22 + $0x30] sm:$0xff]   ;;  %v6086_v30 = vld [vmem:[%s6633_s22 + $0x38] sm:$0xff]   ;;  %v6096_v38 = vld [vmem:[%s6633_s22 + $0x100] sm:$0xff]  }
  0x1d   : > { %5315 = vmatpush3.bf16.msra.mxu0 %v6066_v10  ;;  %v6083_v27 = vld [vmem:[%s6633_s22 + $0xb0] sm:$0xff]   ;;  %v6087_v31 = vld [vmem:[%s6633_s22 + $0xb8] sm:$0xff]   ;;  %v6097_v39 = vld [vmem:[%s6633_s22 + $0x180] sm:$0xff]  }
  0x1e   : > { %5355 = vmatpush3.bf16.msra.mxu1 %v6067_v11  ;;  %5316 = vmatprep.subr.bf16.mxu0 %v6068_v12  ;;  %v6088_v32 = vld [vmem:[%s6669_s26] ss:$144 sps:$4 sm:$0xff]   ;;  %v6090_v33 = vld [vmem:[%s6669_s26 + $0x4] ss:$144 sps:$4 sm:$0xff]   ;;  %v6091_v34 = vld [vmem:[%s6669_s26 + $0x8] ss:$144 sps:$4 sm:$0xff]  }
  0x1f   : > { %5356 = vmatprep.subr.bf16.mxu1 %v6069_v13  ;;  %v6093_v35 = vld [vmem:[%s6669_s26 + $0xc] ss:$144 sps:$4 sm:$0xff]   ;;  %3496 = vmatprep.mubr.bf16.mxu0 %v6090_v33  ;;  %v6102_v44 = vld [vmem:[%s6669_s26 + $0x124] ss:$144 sps:$4 sm:$0xff]   ;;  %v6106_v46 = vld [vmem:[%s6669_s26 + $0x120] ss:$144 sps:$4 sm:$0xff]  }
  0x20   : > { %3561 = vmatprep.mubr.bf16.mxu1 %v6093_v35  ;;  %v6098_v40 = vld [vmem:[%s6633_s22 + $0x148] sm:$0xff]   ;;  %v6108_v48 = vld [vmem:[%s6633_s22 + $0x150] sm:$0xff]   ;;  %v6112_v52 = vld [vmem:[%s6633_s22 + $0x158] sm:$0xff]  }
  0x21   : > { %5317 = vmatpush3.bf16.msra.mxu0 %v6070_v14  ;;  %v6099_v41 = vld [vmem:[%s6633_s22 + $0x1c8] sm:$0xff]   ;;  %v6109_v49 = vld [vmem:[%s6633_s22 + $0x1d0] sm:$0xff]   ;;  %v6113_v53 = vld [vmem:[%s6633_s22 + $0x1d8] sm:$0xff]  }
  0x22   : > { %5357 = vmatpush3.bf16.msra.mxu1 %v6071_v15  ;;  %5318 = vmatprep.subr.bf16.mxu0 %v6072_v16  ;;  %v6100_v42 = vld [vmem:[%s6633_s22 + $0x108] sm:$0xff]   ;;  %v6110_v50 = vld [vmem:[%s6633_s22 + $0x110] sm:$0xff]   ;;  %v6114_v54 = vld [vmem:[%s6633_s22 + $0x118] sm:$0xff]  }
  0x23   : > { %5358 = vmatprep.subr.bf16.mxu1 %v6073_v17  ;;  %v6101_v43 = vld [vmem:[%s6633_s22 + $0x188] sm:$0xff]   ;;  %v6111_v51 = vld [vmem:[%s6633_s22 + $0x190] sm:$0xff]   ;;  %v6115_v55 = vld [vmem:[%s6633_s22 + $0x198] sm:$0xff]  }
  0x24   : > { %v6104_v45 = vld [vmem:[%s6669_s26 + $0x12c] ss:$144 sps:$4 sm:$0xff]   ;;  %v6107_v47 = vld [vmem:[%s6669_s26 + $0x128] ss:$144 sps:$4 sm:$0xff]   ;;  %v6116_v56 = vld [vmem:[%s6669_s26 + $0x244] ss:$144 sps:$4 sm:$0xff]  }
  0x25   : > { %5319 = vmatpush3.bf16.msra.mxu0 %v6074_v18  ;;  %v6118_v57 = vld [vmem:[%s6669_s26 + $0x24c] ss:$144 sps:$4 sm:$0xff]   ;;  %v6120_v58 = vld [vmem:[%s6669_s26 + $0x240] ss:$144 sps:$4 sm:$0xff]   ;;  %v6121_v59 = vld [vmem:[%s6669_s26 + $0x248] ss:$144 sps:$4 sm:$0xff]  }
  0x26   : > { %5359 = vmatpush3.bf16.msra.mxu1 %v6075_v19  ;;  %5320 = vmatprep.subr.bf16.mxu0 %v6076_v20  ;;  %v6122_v60 = vld [vmem:[%s6633_s22 + $0x160] sm:$0xff]   ;;  %v6126_v0 = vld [vmem:[%s6633_s22 + $0x168] sm:$0xff]   ;;  %v6136_v8 = vld [vmem:[%s6633_s22 + $0x170] sm:$0xff]  }
  0x27   : > { %5360 = vmatprep.subr.bf16.mxu1 %v6077_v21  ;;  %v6123_v61 = vld [vmem:[%s6633_s22 + $0x1e0] sm:$0xff]   ;;  %v6127_v1 = vld [vmem:[%s6633_s22 + $0x1e8] sm:$0xff]   ;;  %v6137_v9 = vld [vmem:[%s6633_s22 + $0x1f0] sm:$0xff]  }
  0x28   : > { %v6124_v62 = vld [vmem:[%s6633_s22 + $0x120] sm:$0xff]   ;;  %v6128_v2 = vld [vmem:[%s6633_s22 + $0x128] sm:$0xff]   ;;  %v6138_v10 = vld [vmem:[%s6633_s22 + $0x130] sm:$0xff]  }
  0x29   : > { %5321 = vmatpush3.bf16.msra.mxu0 %v6078_v22  ;;  %v6125_v63 = vld [vmem:[%s6633_s22 + $0x1a0] sm:$0xff]   ;;  %v6129_v3 = vld [vmem:[%s6633_s22 + $0x1a8] sm:$0xff]   ;;  %v6139_v11 = vld [vmem:[%s6633_s22 + $0x1b0] sm:$0xff]  }
  0x2a   : > { %5361 = vmatpush3.bf16.msra.mxu1 %v6079_v23  ;;  %5322 = vmatprep.subr.bf16.mxu0 %v6080_v24  ;;  %v6130_v4 = vld [vmem:[%s6669_s26 + $0x364] ss:$144 sps:$4 sm:$0xff]   ;;  %v6132_v5 = vld [vmem:[%s6669_s26 + $0x36c] ss:$144 sps:$4 sm:$0xff]   ;;  %v6134_v6 = vld [vmem:[%s6669_s26 + $0x360] ss:$144 sps:$4 sm:$0xff]  }
  0x2b   : > { %5362 = vmatprep.subr.bf16.mxu1 %v6081_v25  ;;  %v6135_v7 = vld [vmem:[%s6669_s26 + $0x368] ss:$144 sps:$4 sm:$0xff]   ;;  %v6144_v16 = vld [vmem:[%s6669_s26 + $0x10] ss:$144 sps:$4 sm:$0xff]   ;;  %v6146_v17 = vld [vmem:[%s6669_s26 + $0x14] ss:$144 sps:$4 sm:$0xff]  }
  0x2c   : > { %v6140_v12 = vld [vmem:[%s6633_s22 + $0x178] sm:$0xff]   ;;  %v6150_v20 = vld [vmem:[%s6633_s22 + $0x240] sm:$0xff]   ;;  %v6154_v24 = vld [vmem:[%s6633_s22 + $0x248] sm:$0xff]  }
  0x2d   : > { %5323 = vmatpush3.bf16.msra.mxu0 %v6082_v26  ;;  %v6141_v13 = vld [vmem:[%s6633_s22 + $0x1f8] sm:$0xff]   ;;  %v6151_v21 = vld [vmem:[%s6633_s22 + $0x2c0] sm:$0xff]   ;;  %v6155_v25 = vld [vmem:[%s6633_s22 + $0x2c8] sm:$0xff]  }
  0x2e   : > { %5363 = vmatpush3.bf16.msra.mxu1 %v6083_v27  ;;  %5324 = vmatprep.subr.bf16.mxu0 %v6084_v28  ;;  %v6142_v14 = vld [vmem:[%s6633_s22 + $0x138] sm:$0xff]   ;;  %v6152_v22 = vld [vmem:[%s6633_s22 + $0x200] sm:$0xff]   ;;  %v6156_v26 = vld [vmem:[%s6633_s22 + $0x208] sm:$0xff]  }
  0x2f   : > { %5364 = vmatprep.subr.bf16.mxu1 %v6085_v29  ;;  %v6143_v15 = vld [vmem:[%s6633_s22 + $0x1b8] sm:$0xff]   ;;  %v6153_v23 = vld [vmem:[%s6633_s22 + $0x280] sm:$0xff]   ;;  %v6157_v27 = vld [vmem:[%s6633_s22 + $0x288] sm:$0xff]  }
  0x30   : > { %v6147_v18 = vld [vmem:[%s6669_s26 + $0x18] ss:$144 sps:$4 sm:$0xff]   ;;  %v6149_v19 = vld [vmem:[%s6669_s26 + $0x1c] ss:$144 sps:$4 sm:$0xff]   ;;  %v6158_v28 = vld [vmem:[%s6669_s26 + $0x134] ss:$144 sps:$4 sm:$0xff]  }
  0x31   : > { %5325 = vmatpush3.bf16.msra.mxu0 %v6086_v30  ;;  %v6160_v29 = vld [vmem:[%s6669_s26 + $0x13c] ss:$144 sps:$4 sm:$0xff]   ;;  %v6162_v30 = vld [vmem:[%s6669_s26 + $0x130] ss:$144 sps:$4 sm:$0xff]  }
  0x32   : > { %5365 = vmatpush3.bf16.msra.mxu1 %v6087_v31  ;;  %5390 = vmatprep.subr.bf16.mxu0 %v6094_v36  ;;  %v6163_v31 = vld [vmem:[%s6669_s26 + $0x138] ss:$144 sps:$4 sm:$0xff]   ;;  %v6165_v33 = vld [vmem:[%s6633_s22 + $0x2d0] sm:$0xff]  }
  0x33   : > { %5430 = vmatprep.subr.bf16.mxu1 %v6095_v37  ;;  %v6167_v35 = vld [vmem:[%s6633_s22 + $0x290] sm:$0xff]   ;;  %v6168_v36 = vld [vmem:[%s6633_s22 + $0x258] sm:$0xff]  }
  0x34   : > { %3497 = vmatmul.mubr.bf16.vlgmr.msra.gmra.mrb[0].mxu0 %v6088_v32  ;;  %v6164_v32 = vld [vmem:[%s6633_s22 + $0x250] sm:$0xff]   ;;  %v6169_v37 = vld [vmem:[%s6633_s22 + $0x2d8] sm:$0xff]  }
  0x35   : > { %3562 = vmatmul.mubr.bf16.vlgmr.msra.gmra.mrb[0].mxu1 %v6091_v34  ;;  %5391 = vmatpush3.bf16.msra.mxu0 %v6096_v38  ;;  %v6166_v34 = vld [vmem:[%s6633_s22 + $0x210] sm:$0xff]   ;;  %v6170_v38 = vld [vmem:[%s6633_s22 + $0x218] sm:$0xff]  }
  0x36   : > { %5431 = vmatpush3.bf16.msra.mxu1 %v6097_v39  ;;  %5392 = vmatprep.subr.bf16.mxu0 %v6098_v40  ;;  %v6171_v39 = vld [vmem:[%s6633_s22 + $0x298] sm:$0xff]   ;;  %v6172_v40 = vld [vmem:[%s6669_s26 + $0x254] ss:$144 sps:$4 sm:$0xff]  }
  0x37   : > { %5432 = vmatprep.subr.bf16.mxu1 %v6099_v41  ;;  %3504 = vmatprep.mubr.bf16.mxu0 %v6102_v44  ;;  %v6174_v41 = vld [vmem:[%s6669_s26 + $0x25c] ss:$144 sps:$4 sm:$0xff]   ;;  %v6178_v44 = vld [vmem:[%s6633_s22 + $0x260] sm:$0xff]  }
  0x38   : > { %3569 = vmatprep.mubr.bf16.mxu1 %v6104_v45  ;;  %v6179_v45 = vld [vmem:[%s6633_s22 + $0x2e0] sm:$0xff]  }
  0x39   : > { %5393 = vmatpush3.bf16.msra.mxu0 %v6100_v42  ;;  %v6176_v42 = vld [vmem:[%s6669_s26 + $0x250] ss:$144 sps:$4 sm:$0xff]  }
  0x3a   : > { %5433 = vmatpush3.bf16.msra.mxu1 %v6101_v43  ;;  %5394 = vmatprep.subr.bf16.mxu0 %v6108_v48  ;;  %v6177_v43 = vld [vmem:[%s6669_s26 + $0x258] ss:$144 sps:$4 sm:$0xff]  }
  0x3b   : > { %5434 = vmatprep.subr.bf16.mxu1 %v6109_v49  ;;  %v6182_v48 = vld [vmem:[%s6633_s22 + $0x268] sm:$0xff]  }
  0x3c   : > { %3505 = vmatmul.mubr.bf16.gmra.mrb[4].mxu0 %v6106_v46  ;;  %v6180_v46 = vld [vmem:[%s6633_s22 + $0x220] sm:$0xff]   ;;  %v6183_v49 = vld [vmem:[%s6633_s22 + $0x2e8] sm:$0xff]  }
  0x3d   : > { %3570 = vmatmul.mubr.bf16.gmra.mrb[4].mxu1 %v6107_v47  ;;  %5395 = vmatpush3.bf16.msra.mxu0 %v6110_v50  ;;  %v6181_v47 = vld [vmem:[%s6633_s22 + $0x2a0] sm:$0xff]   ;;  %v6184_v50 = vld [vmem:[%s6633_s22 + $0x228] sm:$0xff]  }
  0x3e   : > { %5435 = vmatpush3.bf16.msra.mxu1 %v6111_v51  ;;  %5396 = vmatprep.subr.bf16.mxu0 %v6112_v52  ;;  %v6185_v51 = vld [vmem:[%s6633_s22 + $0x2a8] sm:$0xff]   ;;  %v6186_v52 = vld [vmem:[%s6669_s26 + $0x374] ss:$144 sps:$4 sm:$0xff]  }
  0x3f   : > { %5436 = vmatprep.subr.bf16.mxu1 %v6113_v53  ;;  %3512 = vmatprep.mubr.bf16.mxu0 %v6116_v56  ;;  %v6188_v53 = vld [vmem:[%s6669_s26 + $0x37c] ss:$144 sps:$4 sm:$0xff]   ;;  %v6192_v56 = vld [vmem:[%s6633_s22 + $0x270] sm:$0xff]  }
  0x40   : > { %3577 = vmatprep.mubr.bf16.mxu1 %v6118_v57  ;;  %v6193_v57 = vld [vmem:[%s6633_s22 + $0x2f0] sm:$0xff]  }
  0x41   : > { %5397 = vmatpush3.bf16.msra.mxu0 %v6114_v54  ;;  %v6190_v54 = vld [vmem:[%s6669_s26 + $0x370] ss:$144 sps:$4 sm:$0xff]  }
  0x42   : > { %5437 = vmatpush3.bf16.msra.mxu1 %v6115_v55  ;;  %5398 = vmatprep.subr.bf16.mxu0 %v6122_v60  ;;  %v6191_v55 = vld [vmem:[%s6669_s26 + $0x378] ss:$144 sps:$4 sm:$0xff]  }
  0x43   : > { %5438 = vmatprep.subr.bf16.mxu1 %v6123_v61  ;;  %v6196_v60 = vld [vmem:[%s6633_s22 + $0x278] sm:$0xff]  }
  0x44   : > { %3513 = vmatmul.mubr.bf16.gmra.mrb[8].mxu0 %v6120_v58  ;;  %v6194_v58 = vld [vmem:[%s6633_s22 + $0x230] sm:$0xff]   ;;  %v6197_v61 = vld [vmem:[%s6633_s22 + $0x2f8] sm:$0xff]  }
  0x45   : > { %3578 = vmatmul.mubr.bf16.gmra.mrb[8].mxu1 %v6121_v59  ;;  %5399 = vmatpush3.bf16.msra.mxu0 %v6124_v62  ;;  %v6195_v59 = vld [vmem:[%s6633_s22 + $0x2b0] sm:$0xff]   ;;  %v6198_v62 = vld [vmem:[%s6633_s22 + $0x238] sm:$0xff]  }
  0x46   : > { %5439 = vmatpush3.bf16.msra.mxu1 %v6125_v63  ;;  %5400 = vmatprep.subr.bf16.mxu0 %v6126_v0  ;;  %v6199_v63 = vld [vmem:[%s6633_s22 + $0x2b8] sm:$0xff]   ;;  %v6200_v0 = vld [vmem:[%s6669_s26 + $0x20] ss:$144 sps:$4 sm:$0xff]  }
  0x47   : > { %5440 = vmatprep.subr.bf16.mxu1 %v6127_v1  ;;  %3520 = vmatprep.mubr.bf16.mxu0 %v6130_v4  ;;  %v6202_v1 = vld [vmem:[%s6669_s26 + $0x24] ss:$144 sps:$4 sm:$0xff]  }
  0x48   : > { %3585 = vmatprep.mubr.bf16.mxu1 %v6132_v5  ;;  %v6206_v4 = vld [vmem:[%s6633_s22 + $0x340] sm:$0xff]  }
  0x49   : > { %5401 = vmatpush3.bf16.msra.mxu0 %v6128_v2  ;;  %v6203_v2 = vld [vmem:[%s6669_s26 + $0x28] ss:$144 sps:$4 sm:$0xff]   ;;  %v6207_v5 = vld [vmem:[%s6633_s22 + $0x3c0] sm:$0xff]  }
  0x4a   : > { %5441 = vmatpush3.bf16.msra.mxu1 %v6129_v3  ;;  %5402 = vmatprep.subr.bf16.mxu0 %v6136_v8  ;;  %v6205_v3 = vld [vmem:[%s6669_s26 + $0x2c] ss:$144 sps:$4 sm:$0xff]  }
  0x4b   : > { %5442 = vmatprep.subr.bf16.mxu1 %v6137_v9  ;;  %v6210_v8 = vld [vmem:[%s6633_s22 + $0x348] sm:$0xff]  }
  0x4c   : > { %3521 = vmatmul.mubr.bf16.gmra.mrb[12].mxu0 %v6134_v6  ;;  %v6208_v6 = vld [vmem:[%s6633_s22 + $0x300] sm:$0xff]   ;;  %v6211_v9 = vld [vmem:[%s6633_s22 + $0x3c8] sm:$0xff]  }
  0x4d   : > { %3586 = vmatmul.mubr.bf16.gmra.mrb[12].mxu1 %v6135_v7  ;;  %5403 = vmatpush3.bf16.msra.mxu0 %v6138_v10  ;;  %v6209_v7 = vld [vmem:[%s6633_s22 + $0x380] sm:$0xff]   ;;  %v6212_v10 = vld [vmem:[%s6633_s22 + $0x308] sm:$0xff]  }
  0x4e   : > { %5443 = vmatpush3.bf16.msra.mxu1 %v6139_v11  ;;  %5404 = vmatprep.subr.bf16.mxu0 %v6140_v12  ;;  %v6213_v11 = vld [vmem:[%s6633_s22 + $0x388] sm:$0xff]   ;;  %v6214_v12 = vld [vmem:[%s6669_s26 + $0x144] ss:$144 sps:$4 sm:$0xff]  }
  0x4f   : > { %5444 = vmatprep.subr.bf16.mxu1 %v6141_v13  ;;  %3626 = vmatprep.mubr.bf16.mxu0 %v6146_v17  ;;  %v6216_v13 = vld [vmem:[%s6669_s26 + $0x14c] ss:$144 sps:$4 sm:$0xff]   ;;  %v6221_v17 = vld [vmem:[%s6633_s22 + $0x3d0] sm:$0xff]  }
  0x50   : > { %3691 = vmatprep.mubr.bf16.mxu1 %v6149_v19  ;;  %v6223_v19 = vld [vmem:[%s6633_s22 + $0x390] sm:$0xff]  }
  0x51   : > { %5405 = vmatpush3.bf16.msra.mxu0 %v6142_v14  ;;  %v6218_v14 = vld [vmem:[%s6669_s26 + $0x140] ss:$144 sps:$4 sm:$0xff]  }
  0x52   : > { %5445 = vmatpush3.bf16.msra.mxu1 %v6143_v15  ;;  %5470 = vmatprep.subr.bf16.mxu0 %v6150_v20  ;;  %v6219_v15 = vld [vmem:[%s6669_s26 + $0x148] ss:$144 sps:$4 sm:$0xff]  }
  0x53   : > { %5510 = vmatprep.subr.bf16.mxu1 %v6151_v21  ;;  %v6224_v20 = vld [vmem:[%s6633_s22 + $0x358] sm:$0xff]  }
  0x54   : > { %3627 = vmatmul.mubr.bf16.vlgmr.msra.gmra.mrb[16].mxu0 %v6144_v16  ;;  %v6220_v16 = vld [vmem:[%s6633_s22 + $0x350] sm:$0xff]   ;;  %v6225_v21 = vld [vmem:[%s6633_s22 + $0x3d8] sm:$0xff]  }
  0x55   : > { %3692 = vmatmul.mubr.bf16.vlgmr.msra.gmra.mrb[16].mxu1 %v6147_v18  ;;  %5471 = vmatpush3.bf16.msra.mxu0 %v6152_v22  ;;  %v6222_v18 = vld [vmem:[%s6633_s22 + $0x310] sm:$0xff]   ;;  %v6226_v22 = vld [vmem:[%s6633_s22 + $0x318] sm:$0xff]  }
  0x56   : > { %5511 = vmatpush3.bf16.msra.mxu1 %v6153_v23  ;;  %5472 = vmatprep.subr.bf16.mxu0 %v6154_v24  ;;  %v6227_v23 = vld [vmem:[%s6633_s22 + $0x398] sm:$0xff]   ;;  %v6228_v24 = vld [vmem:[%s6669_s26 + $0x264] ss:$144 sps:$4 sm:$0xff]  }
  0x57   : > { %5512 = vmatprep.subr.bf16.mxu1 %v6155_v25  ;;  %3634 = vmatprep.mubr.bf16.mxu0 %v6158_v28  ;;  %v6230_v25 = vld [vmem:[%s6669_s26 + $0x26c] ss:$144 sps:$4 sm:$0xff]   ;;  %v6234_v28 = vld [vmem:[%s6633_s22 + $0x360] sm:$0xff]  }
  0x58   : > { %3699 = vmatprep.mubr.bf16.mxu1 %v6160_v29  ;;  %v6235_v29 = vld [vmem:[%s6633_s22 + $0x3e0] sm:$0xff]  }
  0x59   : > { %5473 = vmatpush3.bf16.msra.mxu0 %v6156_v26  ;;  %v6232_v26 = vld [vmem:[%s6669_s26 + $0x260] ss:$144 sps:$4 sm:$0xff]  }
  0x5a   : > { %5513 = vmatpush3.bf16.msra.mxu1 %v6157_v27  ;;  %5474 = vmatprep.subr.bf16.mxu0 %v6164_v32  ;;  %v6233_v27 = vld [vmem:[%s6669_s26 + $0x268] ss:$144 sps:$4 sm:$0xff]  }
  0x5b   : > { %5514 = vmatprep.subr.bf16.mxu1 %v6165_v33  ;;  %v6238_v32 = vld [vmem:[%s6633_s22 + $0x368] sm:$0xff]  }
  0x5c   : > { %3635 = vmatmul.mubr.bf16.gmra.mrb[20].mxu0 %v6162_v30  ;;  %v6236_v30 = vld [vmem:[%s6633_s22 + $0x320] sm:$0xff]   ;;  %v6239_v33 = vld [vmem:[%s6633_s22 + $0x3e8] sm:$0xff]  }
  0x5d   : > { %3700 = vmatmul.mubr.bf16.gmra.mrb[20].mxu1 %v6163_v31  ;;  %5475 = vmatpush3.bf16.msra.mxu0 %v6166_v34  ;;  %v6237_v31 = vld [vmem:[%s6633_s22 + $0x3a0] sm:$0xff]   ;;  %v6240_v34 = vld [vmem:[%s6633_s22 + $0x328] sm:$0xff]  }
  0x5e   : > { %5515 = vmatpush3.bf16.msra.mxu1 %v6167_v35  ;;  %5476 = vmatprep.subr.bf16.mxu0 %v6168_v36  ;;  %v6241_v35 = vld [vmem:[%s6633_s22 + $0x3a8] sm:$0xff]   ;;  %v6242_v36 = vld [vmem:[%s6669_s26 + $0x384] ss:$144 sps:$4 sm:$0xff]  }
  0x5f   : > { %5516 = vmatprep.subr.bf16.mxu1 %v6169_v37  ;;  %3642 = vmatprep.mubr.bf16.mxu0 %v6172_v40  ;;  %v6244_v37 = vld [vmem:[%s6669_s26 + $0x38c] ss:$144 sps:$4 sm:$0xff]   ;;  %v6248_v40 = vld [vmem:[%s6633_s22 + $0x370] sm:$0xff]  }
  0x60   : > { %3707 = vmatprep.mubr.bf16.mxu1 %v6174_v41  ;;  %v6249_v41 = vld [vmem:[%s6633_s22 + $0x3f0] sm:$0xff]  }
  0x61   : > { %5477 = vmatpush3.bf16.msra.mxu0 %v6170_v38  ;;  %v6246_v38 = vld [vmem:[%s6669_s26 + $0x380] ss:$144 sps:$4 sm:$0xff]  }
  0x62   : > { %5517 = vmatpush3.bf16.msra.mxu1 %v6171_v39  ;;  %5478 = vmatprep.subr.bf16.mxu0 %v6178_v44  ;;  %v6247_v39 = vld [vmem:[%s6669_s26 + $0x388] ss:$144 sps:$4 sm:$0xff]  }
  0x63   : > { %5518 = vmatprep.subr.bf16.mxu1 %v6179_v45  ;;  %v6252_v44 = vld [vmem:[%s6633_s22 + $0x378] sm:$0xff]  }
  0x64   : > { %3643 = vmatmul.mubr.bf16.gmra.mrb[24].mxu0 %v6176_v42  ;;  %v6250_v42 = vld [vmem:[%s6633_s22 + $0x330] sm:$0xff]   ;;  %v6253_v45 = vld [vmem:[%s6633_s22 + $0x3f8] sm:$0xff]  }
  0x65   : > { %3708 = vmatmul.mubr.bf16.gmra.mrb[24].mxu1 %v6177_v43  ;;  %5479 = vmatpush3.bf16.msra.mxu0 %v6180_v46  ;;  %v6251_v43 = vld [vmem:[%s6633_s22 + $0x3b0] sm:$0xff]   ;;  %v6254_v46 = vld [vmem:[%s6633_s22 + $0x338] sm:$0xff]  }
  0x66   : > { %5519 = vmatpush3.bf16.msra.mxu1 %v6181_v47  ;;  %5480 = vmatprep.subr.bf16.mxu0 %v6182_v48  ;;  %v6255_v47 = vld [vmem:[%s6633_s22 + $0x3b8] sm:$0xff]   ;;  %v6256_v48 = vld [vmem:[%s6669_s26 + $0x30] ss:$144 sps:$4 sm:$0xff]  }
  0x67   : > { %5520 = vmatprep.subr.bf16.mxu1 %v6183_v49  ;;  %3650 = vmatprep.mubr.bf16.mxu0 %v6186_v52  ;;  %v6258_v49 = vld [vmem:[%s6669_s26 + $0x34] ss:$144 sps:$4 sm:$0xff]  }
  0x68   : > { %3715 = vmatprep.mubr.bf16.mxu1 %v6188_v53  ;;  %v6262_v52 = vld [vmem:[%s6633_s22 + $0x440] sm:$0xff]  }
  0x69   : > { %5481 = vmatpush3.bf16.msra.mxu0 %v6184_v50  ;;  %v6259_v50 = vld [vmem:[%s6669_s26 + $0x38] ss:$144 sps:$4 sm:$0xff]   ;;  %v6263_v53 = vld [vmem:[%s6633_s22 + $0x4c0] sm:$0xff]  }
  0x6a   : > { %5521 = vmatpush3.bf16.msra.mxu1 %v6185_v51  ;;  %5482 = vmatprep.subr.bf16.mxu0 %v6192_v56  ;;  %v6261_v51 = vld [vmem:[%s6669_s26 + $0x3c] ss:$144 sps:$4 sm:$0xff]  }
  0x6b   : > { %5522 = vmatprep.subr.bf16.mxu1 %v6193_v57  ;;  %v6266_v56 = vld [vmem:[%s6633_s22 + $0x448] sm:$0xff]  }
  0x6c   : > { %3651 = vmatmul.mubr.bf16.gmra.mrb[28].mxu0 %v6190_v54  ;;  %v6264_v54 = vld [vmem:[%s6633_s22 + $0x400] sm:$0xff]   ;;  %v6267_v57 = vld [vmem:[%s6633_s22 + $0x4c8] sm:$0xff]  }
  0x6d   : > { %3716 = vmatmul.mubr.bf16.gmra.mrb[28].mxu1 %v6191_v55  ;;  %5483 = vmatpush3.bf16.msra.mxu0 %v6194_v58  ;;  %v6265_v55 = vld [vmem:[%s6633_s22 + $0x480] sm:$0xff]   ;;  %v6268_v58 = vld [vmem:[%s6633_s22 + $0x408] sm:$0xff]  }
  0x6e   : > { %5523 = vmatpush3.bf16.msra.mxu1 %v6195_v59  ;;  %5484 = vmatprep.subr.bf16.mxu0 %v6196_v60  ;;  %v6269_v59 = vld [vmem:[%s6633_s22 + $0x488] sm:$0xff]   ;;  %v6270_v60 = vld [vmem:[%s6669_s26 + $0x154] ss:$144 sps:$4 sm:$0xff]  }
  0x6f   : > { %5524 = vmatprep.subr.bf16.mxu1 %v6197_v61  ;;  %3756 = vmatprep.mubr.bf16.mxu0 %v6202_v1  ;;  %v6272_v61 = vld [vmem:[%s6669_s26 + $0x15c] ss:$144 sps:$4 sm:$0xff]   ;;  %v6277_v1 = vld [vmem:[%s6633_s22 + $0x4d0] sm:$0xff]  }
  0x70   : > { %3821 = vmatprep.mubr.bf16.mxu1 %v6205_v3  ;;  %v6279_v3 = vld [vmem:[%s6633_s22 + $0x490] sm:$0xff]  }
  0x71   : > { %5485 = vmatpush3.bf16.msra.mxu0 %v6198_v62  ;;  %v6274_v62 = vld [vmem:[%s6669_s26 + $0x150] ss:$144 sps:$4 sm:$0xff]  }
  0x72   : > { %5525 = vmatpush3.bf16.msra.mxu1 %v6199_v63  ;;  %5550 = vmatprep.subr.bf16.mxu0 %v6206_v4  ;;  %v6275_v63 = vld [vmem:[%s6669_s26 + $0x158] ss:$144 sps:$4 sm:$0xff]  }
  0x73   : > { %5590 = vmatprep.subr.bf16.mxu1 %v6207_v5  ;;  %v6280_v4 = vld [vmem:[%s6633_s22 + $0x458] sm:$0xff]  }
  0x74   : > { %3757 = vmatmul.mubr.bf16.vlgmr.msra.gmra.mrb[32].mxu0 %v6200_v0  ;;  %v6276_v0 = vld [vmem:[%s6633_s22 + $0x450] sm:$0xff]   ;;  %v6281_v5 = vld [vmem:[%s6633_s22 + $0x4d8] sm:$0xff]  }
  0x75   : > { %3822 = vmatmul.mubr.bf16.vlgmr.msra.gmra.mrb[32].mxu1 %v6203_v2  ;;  %5551 = vmatpush3.bf16.msra.mxu0 %v6208_v6  ;;  %v6278_v2 = vld [vmem:[%s6633_s22 + $0x410] sm:$0xff]   ;;  %v6282_v6 = vld [vmem:[%s6633_s22 + $0x418] sm:$0xff]  }
  0x76   : > { %5591 = vmatpush3.bf16.msra.mxu1 %v6209_v7  ;;  %5552 = vmatprep.subr.bf16.mxu0 %v6210_v8  ;;  %v6283_v7 = vld [vmem:[%s6633_s22 + $0x498] sm:$0xff]   ;;  %v6284_v8 = vld [vmem:[%s6669_s26 + $0x274] ss:$144 sps:$4 sm:$0xff]  }
  0x77   : > { %5592 = vmatprep.subr.bf16.mxu1 %v6211_v9  ;;  %3764 = vmatprep.mubr.bf16.mxu0 %v6214_v12  ;;  %v6286_v9 = vld [vmem:[%s6669_s26 + $0x27c] ss:$144 sps:$4 sm:$0xff]   ;;  %v6290_v12 = vld [vmem:[%s6633_s22 + $0x460] sm:$0xff]  }
  0x78   : > { %3829 = vmatprep.mubr.bf16.mxu1 %v6216_v13  ;;  %v6291_v13 = vld [vmem:[%s6633_s22 + $0x4e0] sm:$0xff]  }
  0x79   : > { %5553 = vmatpush3.bf16.msra.mxu0 %v6212_v10  ;;  %v6288_v10 = vld [vmem:[%s6669_s26 + $0x270] ss:$144 sps:$4 sm:$0xff]  }
  0x7a   : > { %5593 = vmatpush3.bf16.msra.mxu1 %v6213_v11  ;;  %5554 = vmatprep.subr.bf16.mxu0 %v6220_v16  ;;  %v6289_v11 = vld [vmem:[%s6669_s26 + $0x278] ss:$144 sps:$4 sm:$0xff]  }
  0x7b   : > { %5594 = vmatprep.subr.bf16.mxu1 %v6221_v17  ;;  %v6294_v16 = vld [vmem:[%s6633_s22 + $0x468] sm:$0xff]  }
  0x7c   : > { %3765 = vmatmul.mubr.bf16.gmra.mrb[36].mxu0 %v6218_v14  ;;  %v6292_v14 = vld [vmem:[%s6633_s22 + $0x420] sm:$0xff]   ;;  %v6295_v17 = vld [vmem:[%s6633_s22 + $0x4e8] sm:$0xff]  }
  0x7d   : > { %3830 = vmatmul.mubr.bf16.gmra.mrb[36].mxu1 %v6219_v15  ;;  %5555 = vmatpush3.bf16.msra.mxu0 %v6222_v18  ;;  %v6293_v15 = vld [vmem:[%s6633_s22 + $0x4a0] sm:$0xff]   ;;  %v6296_v18 = vld [vmem:[%s6633_s22 + $0x428] sm:$0xff]  }
  0x7e   : > { %5595 = vmatpush3.bf16.msra.mxu1 %v6223_v19  ;;  %5556 = vmatprep.subr.bf16.mxu0 %v6224_v20  ;;  %v6297_v19 = vld [vmem:[%s6633_s22 + $0x4a8] sm:$0xff]   ;;  %v6298_v20 = vld [vmem:[%s6669_s26 + $0x394] ss:$144 sps:$4 sm:$0xff]  }
  0x7f   : > { %5596 = vmatprep.subr.bf16.mxu1 %v6225_v21  ;;  %3772 = vmatprep.mubr.bf16.mxu0 %v6228_v24  ;;  %v6300_v21 = vld [vmem:[%s6669_s26 + $0x39c] ss:$144 sps:$4 sm:$0xff]   ;;  %v6304_v24 = vld [vmem:[%s6633_s22 + $0x470] sm:$0xff]  }
  0x80   : > { %3837 = vmatprep.mubr.bf16.mxu1 %v6230_v25  ;;  %v6305_v25 = vld [vmem:[%s6633_s22 + $0x4f0] sm:$0xff]  }
  0x81   : > { %5557 = vmatpush3.bf16.msra.mxu0 %v6226_v22  ;;  %v6302_v22 = vld [vmem:[%s6669_s26 + $0x390] ss:$144 sps:$4 sm:$0xff]  }
  0x82   : > { %5597 = vmatpush3.bf16.msra.mxu1 %v6227_v23  ;;  %5558 = vmatprep.subr.bf16.mxu0 %v6234_v28  ;;  %v6303_v23 = vld [vmem:[%s6669_s26 + $0x398] ss:$144 sps:$4 sm:$0xff]  }
  0x83   : > { %5598 = vmatprep.subr.bf16.mxu1 %v6235_v29  ;;  %v6308_v28 = vld [vmem:[%s6633_s22 + $0x478] sm:$0xff]  }
  0x84   : > { %3773 = vmatmul.mubr.bf16.gmra.mrb[40].mxu0 %v6232_v26  ;;  %v6306_v26 = vld [vmem:[%s6633_s22 + $0x430] sm:$0xff]   ;;  %v6309_v29 = vld [vmem:[%s6633_s22 + $0x4f8] sm:$0xff]  }
  0x85   : > { %3838 = vmatmul.mubr.bf16.gmra.mrb[40].mxu1 %v6233_v27  ;;  %5559 = vmatpush3.bf16.msra.mxu0 %v6236_v30  ;;  %v6307_v27 = vld [vmem:[%s6633_s22 + $0x4b0] sm:$0xff]   ;;  %v6310_v30 = vld [vmem:[%s6633_s22 + $0x438] sm:$0xff]  }
  0x86   : > { %5599 = vmatpush3.bf16.msra.mxu1 %v6237_v31  ;;  %5560 = vmatprep.subr.bf16.mxu0 %v6238_v32  ;;  %v6311_v31 = vld [vmem:[%s6633_s22 + $0x4b8] sm:$0xff]   ;;  %v6312_v32 = vld [vmem:[%s6669_s26 + $0x40] ss:$144 sps:$4 sm:$0xff]  }
  0x87   : > { %5600 = vmatprep.subr.bf16.mxu1 %v6239_v33  ;;  %3780 = vmatprep.mubr.bf16.mxu0 %v6242_v36  ;;  %v6314_v33 = vld [vmem:[%s6669_s26 + $0x44] ss:$144 sps:$4 sm:$0xff]  }
  0x88   : > { %3845 = vmatprep.mubr.bf16.mxu1 %v6244_v37  ;;  %v6318_v36 = vld [vmem:[%s6633_s22 + $0x540] sm:$0xff]  }
  0x89   : > { %5561 = vmatpush3.bf16.msra.mxu0 %v6240_v34  ;;  %v6315_v34 = vld [vmem:[%s6669_s26 + $0x48] ss:$144 sps:$4 sm:$0xff]   ;;  %v6319_v37 = vld [vmem:[%s6633_s22 + $0x5c0] sm:$0xff]  }
  0x8a   : > { %5601 = vmatpush3.bf16.msra.mxu1 %v6241_v35  ;;  %5562 = vmatprep.subr.bf16.mxu0 %v6248_v40  ;;  %v6317_v35 = vld [vmem:[%s6669_s26 + $0x4c] ss:$144 sps:$4 sm:$0xff]  }
  0x8b   : > { %5602 = vmatprep.subr.bf16.mxu1 %v6249_v41  ;;  %v6322_v40 = vld [vmem:[%s6633_s22 + $0x548] sm:$0xff]  }
  0x8c   : > { %3781 = vmatmul.mubr.bf16.gmra.mrb[44].mxu0 %v6246_v38  ;;  %v6320_v38 = vld [vmem:[%s6633_s22 + $0x500] sm:$0xff]   ;;  %v6323_v41 = vld [vmem:[%s6633_s22 + $0x5c8] sm:$0xff]  }
  0x8d   : > { %3846 = vmatmul.mubr.bf16.gmra.mrb[44].mxu1 %v6247_v39  ;;  %5563 = vmatpush3.bf16.msra.mxu0 %v6250_v42  ;;  %v6321_v39 = vld [vmem:[%s6633_s22 + $0x580] sm:$0xff]   ;;  %v6324_v42 = vld [vmem:[%s6633_s22 + $0x508] sm:$0xff]  }
  0x8e   : > { %5603 = vmatpush3.bf16.msra.mxu1 %v6251_v43  ;;  %5564 = vmatprep.subr.bf16.mxu0 %v6252_v44  ;;  %v6325_v43 = vld [vmem:[%s6633_s22 + $0x588] sm:$0xff]   ;;  %v6326_v44 = vld [vmem:[%s6669_s26 + $0x164] ss:$144 sps:$4 sm:$0xff]  }
  0x8f   : > { %5604 = vmatprep.subr.bf16.mxu1 %v6253_v45  ;;  %3886 = vmatprep.mubr.bf16.mxu0 %v6258_v49  ;;  %v6328_v45 = vld [vmem:[%s6669_s26 + $0x16c] ss:$144 sps:$4 sm:$0xff]   ;;  %v6333_v49 = vld [vmem:[%s6633_s22 + $0x5d0] sm:$0xff]  }
  0x90   : > { %3951 = vmatprep.mubr.bf16.mxu1 %v6261_v51  ;;  %v6335_v51 = vld [vmem:[%s6633_s22 + $0x590] sm:$0xff]  }
  0x91   : > { %5565 = vmatpush3.bf16.msra.mxu0 %v6254_v46  ;;  %v6330_v46 = vld [vmem:[%s6669_s26 + $0x160] ss:$144 sps:$4 sm:$0xff]  }
  0x92   : > { %5605 = vmatpush3.bf16.msra.mxu1 %v6255_v47  ;;  %5630 = vmatprep.subr.bf16.mxu0 %v6262_v52  ;;  %v6331_v47 = vld [vmem:[%s6669_s26 + $0x168] ss:$144 sps:$4 sm:$0xff]  }
  0x93   : > { %5670 = vmatprep.subr.bf16.mxu1 %v6263_v53  ;;  %v6336_v52 = vld [vmem:[%s6633_s22 + $0x558] sm:$0xff]  }
  0x94   : > { %3887 = vmatmul.mubr.bf16.vlgmr.msra.gmra.mrb[48].mxu0 %v6256_v48  ;;  %v6332_v48 = vld [vmem:[%s6633_s22 + $0x550] sm:$0xff]   ;;  %v6337_v53 = vld [vmem:[%s6633_s22 + $0x5d8] sm:$0xff]  }
  0x95   : > { %3952 = vmatmul.mubr.bf16.vlgmr.msra.gmra.mrb[48].mxu1 %v6259_v50  ;;  %5631 = vmatpush3.bf16.msra.mxu0 %v6264_v54  ;;  %v6334_v50 = vld [vmem:[%s6633_s22 + $0x510] sm:$0xff]   ;;  %v6338_v54 = vld [vmem:[%s6633_s22 + $0x518] sm:$0xff]  }
  0x96   : > { %5671 = vmatpush3.bf16.msra.mxu1 %v6265_v55  ;;  %5632 = vmatprep.subr.bf16.mxu0 %v6266_v56  ;;  %v6339_v55 = vld [vmem:[%s6633_s22 + $0x598] sm:$0xff]   ;;  %v6340_v56 = vld [vmem:[%s6669_s26 + $0x284] ss:$144 sps:$4 sm:$0xff]  }
  0x97   : > { %5672 = vmatprep.subr.bf16.mxu1 %v6267_v57  ;;  %3894 = vmatprep.mubr.bf16.mxu0 %v6270_v60  ;;  %v6342_v57 = vld [vmem:[%s6669_s26 + $0x28c] ss:$144 sps:$4 sm:$0xff]   ;;  %v6346_v60 = vld [vmem:[%s6633_s22 + $0x560] sm:$0xff]  }
  0x98   : > { %3959 = vmatprep.mubr.bf16.mxu1 %v6272_v61  ;;  %v6347_v61 = vld [vmem:[%s6633_s22 + $0x5e0] sm:$0xff]  }
  0x99   : > { %5633 = vmatpush3.bf16.msra.mxu0 %v6268_v58  ;;  %v6344_v58 = vld [vmem:[%s6669_s26 + $0x280] ss:$144 sps:$4 sm:$0xff]  }
  0x9a   : > { %5673 = vmatpush3.bf16.msra.mxu1 %v6269_v59  ;;  %5634 = vmatprep.subr.bf16.mxu0 %v6276_v0  ;;  %v6345_v59 = vld [vmem:[%s6669_s26 + $0x288] ss:$144 sps:$4 sm:$0xff]  }
  0x9b   : > { %5674 = vmatprep.subr.bf16.mxu1 %v6277_v1  ;;  %v6350_v0 = vld [vmem:[%s6633_s22 + $0x568] sm:$0xff]  }
  0x9c   : > { %3895 = vmatmul.mubr.bf16.gmra.mrb[52].mxu0 %v6274_v62  ;;  %v6348_v62 = vld [vmem:[%s6633_s22 + $0x520] sm:$0xff]   ;;  %v6351_v1 = vld [vmem:[%s6633_s22 + $0x5e8] sm:$0xff]  }
  0x9d   : > { %3960 = vmatmul.mubr.bf16.gmra.mrb[52].mxu1 %v6275_v63  ;;  %5635 = vmatpush3.bf16.msra.mxu0 %v6278_v2  ;;  %v6349_v63 = vld [vmem:[%s6633_s22 + $0x5a0] sm:$0xff]   ;;  %v6352_v2 = vld [vmem:[%s6633_s22 + $0x528] sm:$0xff]  }
  0x9e   : > { %5675 = vmatpush3.bf16.msra.mxu1 %v6279_v3  ;;  %5636 = vmatprep.subr.bf16.mxu0 %v6280_v4  ;;  %v6353_v3 = vld [vmem:[%s6633_s22 + $0x5a8] sm:$0xff]   ;;  %v6354_v4 = vld [vmem:[%s6669_s26 + $0x3a4] ss:$144 sps:$4 sm:$0xff]  }
  0x9f   : > { %5676 = vmatprep.subr.bf16.mxu1 %v6281_v5  ;;  %3902 = vmatprep.mubr.bf16.mxu0 %v6284_v8  ;;  %v6356_v5 = vld [vmem:[%s6669_s26 + $0x3ac] ss:$144 sps:$4 sm:$0xff]   ;;  %v6360_v8 = vld [vmem:[%s6633_s22 + $0x570] sm:$0xff]  }
  0xa0   : > { %3967 = vmatprep.mubr.bf16.mxu1 %v6286_v9  ;;  %v6361_v9 = vld [vmem:[%s6633_s22 + $0x5f0] sm:$0xff]  }
  0xa1   : > { %5637 = vmatpush3.bf16.msra.mxu0 %v6282_v6  ;;  %v6358_v6 = vld [vmem:[%s6669_s26 + $0x3a0] ss:$144 sps:$4 sm:$0xff]  }
  0xa2   : > { %5677 = vmatpush3.bf16.msra.mxu1 %v6283_v7  ;;  %5638 = vmatprep.subr.bf16.mxu0 %v6290_v12  ;;  %v6359_v7 = vld [vmem:[%s6669_s26 + $0x3a8] ss:$144 sps:$4 sm:$0xff]  }
  0xa3   : > { %5678 = vmatprep.subr.bf16.mxu1 %v6291_v13  ;;  %v6364_v12 = vld [vmem:[%s6633_s22 + $0x578] sm:$0xff]  }
  0xa4   : > { %3903 = vmatmul.mubr.bf16.gmra.mrb[56].mxu0 %v6288_v10  ;;  %v6362_v10 = vld [vmem:[%s6633_s22 + $0x530] sm:$0xff]   ;;  %v6365_v13 = vld [vmem:[%s6633_s22 + $0x5f8] sm:$0xff]  }
  0xa5   : > { %3968 = vmatmul.mubr.bf16.gmra.mrb[56].mxu1 %v6289_v11  ;;  %5639 = vmatpush3.bf16.msra.mxu0 %v6292_v14  ;;  %v6363_v11 = vld [vmem:[%s6633_s22 + $0x5b0] sm:$0xff]   ;;  %v6366_v14 = vld [vmem:[%s6633_s22 + $0x538] sm:$0xff]  }
  0xa6   : > { %5679 = vmatpush3.bf16.msra.mxu1 %v6293_v15  ;;  %5640 = vmatprep.subr.bf16.mxu0 %v6294_v16  ;;  %v6367_v15 = vld [vmem:[%s6633_s22 + $0x5b8] sm:$0xff]   ;;  %v6368_v16 = vld [vmem:[%s6669_s26 + $0x50] ss:$144 sps:$4 sm:$0xff]  }
  0xa7   : > { %5680 = vmatprep.subr.bf16.mxu1 %v6295_v17  ;;  %3910 = vmatprep.mubr.bf16.mxu0 %v6298_v20  ;;  %v6370_v17 = vld [vmem:[%s6669_s26 + $0x54] ss:$144 sps:$4 sm:$0xff]  }
  0xa8   : > { %3975 = vmatprep.mubr.bf16.mxu1 %v6300_v21  ;;  %v6374_v21 = vld [vmem:[%s6633_s22 + $0x640] sm:$0xff]  }
  0xa9   : > { %5641 = vmatpush3.bf16.msra.mxu0 %v6296_v18  ;;  %v6371_v18 = vld [vmem:[%s6669_s26 + $0x58] ss:$144 sps:$4 sm:$0xff]  }
  0xaa   : > { %5681 = vmatpush3.bf16.msra.mxu1 %v6297_v19  ;;  %5642 = vmatprep.subr.bf16.mxu0 %v6304_v24  ;;  %v6373_v19 = vld [vmem:[%s6669_s26 + $0x5c] ss:$144 sps:$4 sm:$0xff]  }
  0xab   : > { %5682 = vmatprep.subr.bf16.mxu1 %v6305_v25  ;;  %v6376_v25 = vld [vmem:[%s6633_s22 + $0x600] sm:$0xff]  }
  0xac   : > { %3911 = vmatmul.mubr.bf16.gmra.mrb[60].mxu0 %v6302_v22 }
  0xad   : > { %3976 = vmatmul.mubr.bf16.gmra.mrb[60].mxu1 %v6303_v23  ;;  %5643 = vmatpush3.bf16.msra.mxu0 %v6306_v26  ;;  %v6375_v23 = vld [vmem:[%s6633_s22 + $0x6c0] sm:$0xff]  }
  0xae   : > { %5683 = vmatpush3.bf16.msra.mxu1 %v6307_v27  ;;  %5644 = vmatprep.subr.bf16.mxu0 %v6308_v28  ;;  %v6377_v28 = vld [vmem:[%s6633_s22 + $0x680] sm:$0xff]  }
  0xaf   : > { %5684 = vmatprep.subr.bf16.mxu1 %v6309_v29  ;;  %4016 = vmatprep.mubr.bf16.mxu0 %v6314_v33  ;;  %v6379_v33 = vld [vmem:[%s6633_s22 + $0x6c8] sm:$0xff]  }
  0xb0   : > { %4081 = vmatprep.mubr.bf16.mxu1 %v6317_v35  ;;  %v6380_v35 = vld [vmem:[%s6633_s22 + $0x608] sm:$0xff]  }
  0xb1   : > { %5645 = vmatpush3.bf16.msra.mxu0 %v6310_v30 }
  0xb2   : > { %5685 = vmatpush3.bf16.msra.mxu1 %v6311_v31  ;;  %5710 = vmatprep.subr.bf16.mxu0 %v6318_v36  ;;  %v6378_v31 = vld [vmem:[%s6633_s22 + $0x648] sm:$0xff]  }
  0xb3   : > { %5750 = vmatprep.subr.bf16.mxu1 %v6319_v37 }
  0xb4   : > { %4017 = vmatmul.mubr.bf16.vlgmr.msra.gmra.mrb[64].mxu0 %v6312_v32 }
  0xb5   : > { %4082 = vmatmul.mubr.bf16.vlgmr.msra.gmra.mrb[64].mxu1 %v6315_v34  ;;  %5711 = vmatpush3.bf16.msra.mxu0 %v6320_v38  ;;  %v6381_v38 = vld [vmem:[%s6633_s22 + $0x688] sm:$0xff]  }
  0xb6   : > { %5751 = vmatpush3.bf16.msra.mxu1 %v6321_v39  ;;  %5712 = vmatprep.subr.bf16.mxu0 %v6322_v40  ;;  %v6382_v40 = vld [vmem:[%s6669_s26 + $0x174] ss:$144 sps:$4 sm:$0xff]  }
  0xb7   : > { %5752 = vmatprep.subr.bf16.mxu1 %v6323_v41  ;;  %4024 = vmatprep.mubr.bf16.mxu0 %v6326_v44  ;;  %v6384_v41 = vld [vmem:[%s6669_s26 + $0x17c] ss:$144 sps:$4 sm:$0xff]   ;;  %v6387_v44 = vld [vmem:[%s6669_s26 + $0x178] ss:$144 sps:$4 sm:$0xff]  }
  0xb8   : > { %4089 = vmatprep.mubr.bf16.mxu1 %v6328_v45  ;;  %v6388_v45 = vld [vmem:[%s6633_s22 + $0x650] sm:$0xff]  }
  0xb9   : > { %5713 = vmatpush3.bf16.msra.mxu0 %v6324_v42 }
  0xba   : > { %5753 = vmatpush3.bf16.msra.mxu1 %v6325_v43  ;;  %5714 = vmatprep.subr.bf16.mxu0 %v6332_v48  ;;  %v6386_v43 = vld [vmem:[%s6669_s26 + $0x170] ss:$144 sps:$4 sm:$0xff]  }
  0xbb   : > { %5754 = vmatprep.subr.bf16.mxu1 %v6333_v49  ;;  %v6390_v49 = vld [vmem:[%s6633_s22 + $0x610] sm:$0xff]  }
  0xbc   : > { %4025 = vmatmul.mubr.bf16.gmra.mrb[68].mxu0 %v6330_v46 }
  0xbd   : > { %4090 = vmatmul.mubr.bf16.gmra.mrb[68].mxu1 %v6331_v47  ;;  %5715 = vmatpush3.bf16.msra.mxu0 %v6334_v50  ;;  %v6389_v47 = vld [vmem:[%s6633_s22 + $0x6d0] sm:$0xff]  }
  0xbe   : > { %5755 = vmatpush3.bf16.msra.mxu1 %v6335_v51  ;;  %5716 = vmatprep.subr.bf16.mxu0 %v6336_v52  ;;  %v6391_v52 = vld [vmem:[%s6633_s22 + $0x690] sm:$0xff]  }
  0xbf   : > { %5756 = vmatprep.subr.bf16.mxu1 %v6337_v53  ;;  %4032 = vmatprep.mubr.bf16.mxu0 %v6340_v56 }
  0xc0   : > { %4097 = vmatprep.mubr.bf16.mxu1 %v6342_v57  ;;  %v6393_v57 = vld [vmem:[%s6633_s22 + $0x6d8] sm:$0xff]  }
  0xc1   : > { %5717 = vmatpush3.bf16.msra.mxu0 %v6338_v54 }
  0xc2   : > { %5757 = vmatpush3.bf16.msra.mxu1 %v6339_v55  ;;  %5718 = vmatprep.subr.bf16.mxu0 %v6346_v60  ;;  %v6392_v55 = vld [vmem:[%s6633_s22 + $0x658] sm:$0xff]  }
  0xc3   : > { %5758 = vmatprep.subr.bf16.mxu1 %v6347_v61 }
  0xc4   : > { %4033 = vmatmul.mubr.bf16.gmra.mrb[72].mxu0 %v6344_v58 }
  0xc5   : > { %4098 = vmatmul.mubr.bf16.gmra.mrb[72].mxu1 %v6345_v59  ;;  %5719 = vmatpush3.bf16.msra.mxu0 %v6348_v62  ;;  %v6394_v59 = vld [vmem:[%s6633_s22 + $0x618] sm:$0xff]  }
  0xc6   : > { %5759 = vmatpush3.bf16.msra.mxu1 %v6349_v63  ;;  %5720 = vmatprep.subr.bf16.mxu0 %v6350_v0  ;;  %v6395_v62 = vld [vmem:[%s6633_s22 + $0x698] sm:$0xff]   ;;  %v6396_v0 = vld [vmem:[%s6669_s26 + $0x294] ss:$144 sps:$4 sm:$0xff]  }
  0xc7   : > { %5760 = vmatprep.subr.bf16.mxu1 %v6351_v1  ;;  %4040 = vmatprep.mubr.bf16.mxu0 %v6354_v4  ;;  %v6398_v1 = vld [vmem:[%s6669_s26 + $0x29c] ss:$144 sps:$4 sm:$0xff]   ;;  %v6401_v4 = vld [vmem:[%s6669_s26 + $0x298] ss:$144 sps:$4 sm:$0xff]  }
  0xc8   : > { %4105 = vmatprep.mubr.bf16.mxu1 %v6356_v5  ;;  %v6402_v5 = vld [vmem:[%s6633_s22 + $0x660] sm:$0xff]  }
  0xc9   : > { %5721 = vmatpush3.bf16.msra.mxu0 %v6352_v2  ;;  %v6400_v2 = vld [vmem:[%s6669_s26 + $0x290] ss:$144 sps:$4 sm:$0xff]  }
  0xca   : > { %5761 = vmatpush3.bf16.msra.mxu1 %v6353_v3  ;;  %5722 = vmatprep.subr.bf16.mxu0 %v6360_v8 }
  0xcb   : > { %5762 = vmatprep.subr.bf16.mxu1 %v6361_v9  ;;  %v6404_v9 = vld [vmem:[%s6633_s22 + $0x620] sm:$0xff]  }
  0xcc   : > { %4041 = vmatmul.mubr.bf16.gmra.mrb[76].mxu0 %v6358_v6 }
  0xcd   : > { %4106 = vmatmul.mubr.bf16.gmra.mrb[76].mxu1 %v6359_v7  ;;  %5723 = vmatpush3.bf16.msra.mxu0 %v6362_v10  ;;  %v6403_v7 = vld [vmem:[%s6633_s22 + $0x6e0] sm:$0xff]  }
  0xce   : > { %5763 = vmatpush3.bf16.msra.mxu1 %v6363_v11  ;;  %5724 = vmatprep.subr.bf16.mxu0 %v6364_v12  ;;  %v6405_v12 = vld [vmem:[%s6633_s22 + $0x6a0] sm:$0xff]  }
  0xcf   : > { %5764 = vmatprep.subr.bf16.mxu1 %v6365_v13  ;;  %4146 = vmatprep.mubr.bf16.mxu0 %v6370_v17  ;;  %v6407_v17 = vld [vmem:[%s6633_s22 + $0x6e8] sm:$0xff]  }
  0xd0   : > { %4211 = vmatprep.mubr.bf16.mxu1 %v6373_v19  ;;  %v6408_v19 = vld [vmem:[%s6633_s22 + $0x628] sm:$0xff]  }
  0xd1   : > { %5725 = vmatpush3.bf16.msra.mxu0 %v6366_v14 }
  0xd2   : > { %5765 = vmatpush3.bf16.msra.mxu1 %v6367_v15  ;;  %5790 = vmatprep.subr.bf16.mxu0 %v6374_v21  ;;  %v6406_v15 = vld [vmem:[%s6633_s22 + $0x668] sm:$0xff]  }
  0xd3   : > { %5830 = vmatprep.subr.bf16.mxu1 %v6375_v23 }
  0xd4   : > { %4147 = vmatmul.mubr.bf16.vlgmr.msra.gmra.mrb[80].mxu0 %v6368_v16 }
  0xd5   : > { %4212 = vmatmul.mubr.bf16.vlgmr.msra.gmra.mrb[80].mxu1 %v6371_v18  ;;  %5791 = vmatpush3.bf16.msra.mxu0 %v6376_v25  ;;  %v6412_v25 = vld [vmem:[%s6669_s26 + $0x3bc] ss:$144 sps:$4 sm:$0xff]  }
  0xd6   : > { %5831 = vmatpush3.bf16.msra.mxu1 %v6377_v28  ;;  %5792 = vmatprep.subr.bf16.mxu0 %v6378_v31  ;;  %v6415_v28 = vld [vmem:[%s6669_s26 + $0x3b8] ss:$144 sps:$4 sm:$0xff]  }
  0xd7   : > { %5832 = vmatprep.subr.bf16.mxu1 %v6379_v33  ;;  %4154 = vmatprep.mubr.bf16.mxu0 %v6382_v40 }
  0xd8   : > { %4219 = vmatprep.mubr.bf16.mxu1 %v6384_v41  ;;  %v6420_v41 = vld [vmem:[%s6633_s22 + $0x678] sm:$0xff]  }
  0xd9   : > { %5793 = vmatpush3.bf16.msra.mxu0 %v6380_v35 }
  0xda   : > { %5833 = vmatpush3.bf16.msra.mxu1 %v6381_v38  ;;  %5794 = vmatprep.subr.bf16.mxu0 %v6388_v45 }
  0xdb   : > { %5834 = vmatprep.subr.bf16.mxu1 %v6389_v47 }
  0xdc   : > { %4155 = vmatmul.mubr.bf16.gmra.mrb[84].mxu0 %v6386_v43 }
  0xdd   : > { %4220 = vmatmul.mubr.bf16.gmra.mrb[84].mxu1 %v6387_v44  ;;  %5795 = vmatpush3.bf16.msra.mxu0 %v6390_v49  ;;  %v6421_v44 = vld [vmem:[%s6633_s22 + $0x6f8] sm:$0xff]  }
  0xde   : > { %5835 = vmatpush3.bf16.msra.mxu1 %v6391_v52  ;;  %5796 = vmatprep.subr.bf16.mxu0 %v6392_v55  ;;  %v6424_v52 = vld [vmem:[%s6669_s26 + $0x60] ss:$144 sps:$4 sm:$0xff]   ;;  %v6426_v55 = vld [vmem:[%s6669_s26 + $0x64] ss:$144 sps:$4 sm:$0xff]  }
  0xdf   : > { %5836 = vmatprep.subr.bf16.mxu1 %v6393_v57  ;;  %4162 = vmatprep.mubr.bf16.mxu0 %v6396_v0  ;;  %v6427_v57 = vld [vmem:[%s6669_s26 + $0x68] ss:$144 sps:$4 sm:$0xff]  }
  0xe0   : > { %4227 = vmatprep.mubr.bf16.mxu1 %v6398_v1  ;;  %v6432_v1 = vld [vmem:[%s6633_s22 + $0x700] sm:$0xff]  }
  0xe1   : > { %5797 = vmatpush3.bf16.msra.mxu0 %v6394_v59  ;;  %v6430_v59 = vld [vmem:[%s6633_s22 + $0x740] sm:$0xff]  }
  0xe2   : > { %5837 = vmatpush3.bf16.msra.mxu1 %v6395_v62  ;;  %5798 = vmatprep.subr.bf16.mxu0 %v6402_v5  ;;  %v6431_v62 = vld [vmem:[%s6633_s22 + $0x7c0] sm:$0xff]  }
  0xe3   : > { %5838 = vmatprep.subr.bf16.mxu1 %v6403_v7  ;;  %v6434_v7 = vld [vmem:[%s6633_s22 + $0x748] sm:$0xff]  }
  0xe4   : > { %4163 = vmatmul.mubr.bf16.gmra.mrb[88].mxu0 %v6400_v2 }
  0xe5   : > { %4228 = vmatmul.mubr.bf16.gmra.mrb[88].mxu1 %v6401_v4  ;;  %5799 = vmatpush3.bf16.msra.mxu0 %v6404_v9  ;;  %v6433_v4 = vld [vmem:[%s6633_s22 + $0x780] sm:$0xff]   ;;  %v6435_v9 = vld [vmem:[%s6633_s22 + $0x7c8] sm:$0xff]  }
  0xe6   : > { %5839 = vmatpush3.bf16.msra.mxu1 %v6405_v12  ;;  %5800 = vmatprep.subr.bf16.mxu0 %v6406_v15  ;;  %v6436_v12 = vld [vmem:[%s6633_s22 + $0x708] sm:$0xff]  }
  0xe7   : > { %5840 = vmatprep.subr.bf16.mxu1 %v6407_v17  ;;  %4235 = vmatprep.mubr.bf16.mxu1 %v6412_v25  ;;  %v6444_v25 = vld [vmem:[%s6633_s22 + $0x750] sm:$0xff]  }
  0xe9   : > { %5801 = vmatpush3.bf16.msra.mxu0 %v6408_v19  ;;  %v6440_v19 = vld [vmem:[%s6669_s26 + $0x18c] ss:$144 sps:$4 sm:$0xff]  }
  0xed   : > { %4236 = vmatmul.mubr.bf16.gmra.mrb[92].mxu1 %v6415_v28  ;;  %v6445_v28 = vld [vmem:[%s6633_s22 + $0x7d0] sm:$0xff]  }
 0x107   : > { %v5326_v20 = vpop.f32.mrb[0].mxu0 }
 0x108   : > { %v5366_v22 = vpop.f32.mrb[0].mxu1  ;;  %v5327_v24 = vpop.f32.mrb[1].mxu0 }
 0x109   : > { %v6920_v26 = vadd.f32 %v5327_v24, %v5326_v20  ;;  %v5367_v27 = vpop.f32.mrb[1].mxu1  ;;  %v5329_v30 = vpop.f32.mrb[2].mxu0  ;;  %v6410_v24 = vld [vmem:[%s6669_s26 + $0x3b4] ss:$144 sps:$4 sm:$0xff]  }
 0x10a   : > { %v6923_v29 = vadd.f32 %v5367_v27, %v5366_v22  ;;  %v5369_v32 = vpop.f32.mrb[2].mxu1  ;;  %v5330_v34 = vpop.f32.mrb[3].mxu0  ;;  %v6409_v22 = vld [vmem:[%s6633_s22 + $0x6a8] sm:$0xff]   ;;  %v6414_v27 = vld [vmem:[%s6669_s26 + $0x3b0] ss:$144 sps:$4 sm:$0xff]   ;;  %4170 = vmatprep.mubr.bf16.mxu0 %v6410_v24 }
 0x10b   : > { %v6928_v36 = vadd.f32 %v5330_v34, %v5329_v30  ;;  %v5370_v37 = vpop.f32.mrb[3].mxu1  ;;  %5841 = vmatpush3.bf16.msra.mxu1 %v6409_v22  ;;  %v6416_v30 = vld [vmem:[%s6633_s22 + $0x670] sm:$0xff]   ;;  %4171 = vmatmul.mubr.bf16.gmra.mrb[92].mxu0 %v6414_v27  ;;  %v6443_v24 = vld [vmem:[%s6669_s26 + $0x188] ss:$144 sps:$4 sm:$0xff]  }
 0x10c   : > { %v6931_v39 = vadd.f32 %v5370_v37, %v5369_v32  ;;  %v6417_v32 = vld [vmem:[%s6633_s22 + $0x6f0] sm:$0xff]   ;;  %5802 = vmatprep.subr.bf16.mxu0 %v6416_v30  ;;  %4276 = vmatprep.mubr.bf16.mxu0 %v6426_v55  ;;  %v6454_v55 = vld [vmem:[%s6669_s26 + $0x2ac] ss:$144 sps:$4 sm:$0xff]  }
 0x10d   : > { %v6418_v34 = vld [vmem:[%s6633_s22 + $0x630] sm:$0xff]   ;;  %5842 = vmatprep.subr.bf16.mxu1 %v6417_v32 }
 0x10e   : > { %v6419_v37 = vld [vmem:[%s6633_s22 + $0x6b0] sm:$0xff]   ;;  %5803 = vmatpush3.bf16.msra.mxu0 %v6418_v34 }
 0x10f   : > { %v5332_v42 = vpop.f32.mrb[4].mxu0  ;;  %5843 = vmatpush3.bf16.msra.mxu1 %v6419_v37  ;;  %5804 = vmatprep.subr.bf16.mxu0 %v6420_v41  ;;  %v6447_v34 = vld [vmem:[%s6633_s22 + $0x790] sm:$0xff]  }
 0x110   : > { %v5372_v46 = vpop.f32.mrb[4].mxu1  ;;  %v5333_v48 = vpop.f32.mrb[5].mxu0  ;;  %5844 = vmatprep.subr.bf16.mxu1 %v6421_v44 }
 0x111   : > { %v6940_v50 = vadd.f32 %v5333_v48, %v5332_v42  ;;  %v5373_v51 = vpop.f32.mrb[5].mxu1  ;;  %v5335_v54 = vpop.f32.mrb[6].mxu0  ;;  %v6423_v48 = vld [vmem:[%s6633_s22 + $0x6b8] sm:$0xff]  }
 0x112   : > { %v6943_v53 = vadd.f32 %v5373_v51, %v5372_v46  ;;  %v5375_v56 = vpop.f32.mrb[6].mxu1  ;;  %v5336_v58 = vpop.f32.mrb[7].mxu0  ;;  %v6422_v46 = vld [vmem:[%s6633_s22 + $0x638] sm:$0xff]  }
 0x113   : > { %v6948_v60 = vadd.f32 %v5336_v58, %v5335_v54  ;;  %v5376_v61 = vpop.f32.mrb[7].mxu1  ;;  %5805 = vmatpush3.bf16.msra.mxu0 %v6422_v46  ;;  %5845 = vmatpush3.bf16.msra.mxu1 %v6423_v48  ;;  %v6429_v58 = vld [vmem:[%s6669_s26 + $0x6c] ss:$144 sps:$4 sm:$0xff]  }
 0x114   : > { %v6951_v63 = vadd.f32 %v5376_v61, %v5375_v56  ;;  %4341 = vmatprep.mubr.bf16.mxu1 %v6429_v58  ;;  %5870 = vmatprep.subr.bf16.mxu0 %v6430_v59  ;;  %v6451_v48 = vld [vmem:[%s6633_s22 + $0x798] sm:$0xff]   ;;  %v6458_v58 = vld [vmem:[%s6633_s22 + $0x760] sm:$0xff]  }
 0x115   : > { %5910 = vmatprep.subr.bf16.mxu1 %v6431_v62 }
 0x116   : > { %4277 = vmatmul.mubr.bf16.vlgmr.msra.gmra.mrb[96].mxu0 %v6424_v52  ;;  %4342 = vmatmul.mubr.bf16.vlgmr.msra.gmra.mrb[96].mxu1 %v6427_v57  ;;  %v6452_v52 = vld [vmem:[%s6669_s26 + $0x2a4] ss:$144 sps:$4 sm:$0xff]   ;;  %v6457_v57 = vld [vmem:[%s6669_s26 + $0x2a8] ss:$144 sps:$4 sm:$0xff]  }
 0x117   : > { %v5338_v3 = vpop.f32.mrb[8].mxu0  ;;  %5871 = vmatpush3.bf16.msra.mxu0 %v6432_v1  ;;  %5911 = vmatpush3.bf16.msra.mxu1 %v6433_v4 }
 0x118   : > { %v5378_v6 = vpop.f32.mrb[8].mxu1  ;;  %v5339_v8 = vpop.f32.mrb[9].mxu0  ;;  %5872 = vmatprep.subr.bf16.mxu0 %v6434_v7  ;;  %5912 = vmatprep.subr.bf16.mxu1 %v6435_v9  ;;  %v4834_v7 = vld [vmem:[%s274_s29] ss:$0 sm:$0xff] }
 0x119   : > { %v6960_v10 = vadd.f32 %v5339_v8, %v5338_v3  ;;  %v5379_v11 = vpop.f32.mrb[9].mxu1  ;;  %v5341_v14 = vpop.f32.mrb[10].mxu0  ;;  %4349 = vmatprep.mubr.bf16.mxu1 %v6440_v19  ;;  %v3499_v9 = vadd.f32 %v6920_v26, %v4834_v7  ;;  %v6463_v19 = vld [vmem:[%s6633_s22 + $0x7e8] sm:$0xff]  }
 0x11a   : > { %v6963_v13 = vadd.f32 %v5379_v11, %v5378_v6  ;;  %v5381_v16 = vpop.f32.mrb[10].mxu1  ;;  %v5342_v18 = vpop.f32.mrb[11].mxu0 }
 0x11b   : > { %v6968_v20 = vadd.f32 %v5342_v18, %v5341_v14  ;;  %v5382_v21 = vpop.f32.mrb[11].mxu1  ;;  %5873 = vmatpush3.bf16.msra.mxu0 %v6436_v12  ;;  %v6438_v18 = vld [vmem:[%s6669_s26 + $0x184] ss:$144 sps:$4 sm:$0xff]   ;;  %v3502_v12 = vadd.f32 %v6928_v36, %v4834_v7  ;;  %v3564_v26 = vadd.f32 %v6923_v29, %v3499_v9  ;;  %v6464_v36 = vld [vmem:[%s6633_s22 + $0x728] sm:$0xff]   ;;  %v6480_v9 = vld [vmem:[%s6669_s26 + $0x70] ss:$144 sps:$4 sm:$0xff]  }
 0x11c   : > { %v6971_v23 = vadd.f32 %v5382_v21, %v5381_v16  ;;  %v6437_v16 = vld [vmem:[%s6633_s22 + $0x788] sm:$0xff]   ;;  %v6442_v21 = vld [vmem:[%s6669_s26 + $0x180] ss:$144 sps:$4 sm:$0xff]   ;;  %4284 = vmatprep.mubr.bf16.mxu0 %v6438_v18  ;;  %5874 = vmatprep.subr.bf16.mxu0 %v6444_v25 }
 0x11d   : > { %5913 = vmatpush3.bf16.msra.mxu1 %v6437_v16  ;;  %v3510_v16 = vadd.f32 %v6948_v60, %v4834_v7 }
 0x11e   : > { %4285 = vmatmul.mubr.bf16.gmra.mrb[100].mxu0 %v6442_v21  ;;  %4350 = vmatmul.mubr.bf16.gmra.mrb[100].mxu1 %v6443_v24  ;;  %v3515_v21 = vadd.f32 %v6960_v10, %v4834_v7  ;;  %v6465_v10 = vld [vmem:[%s6633_s22 + $0x7a8] sm:$0xff]  }
 0x11f   : > { %v5344_v31 = vpop.f32.mrb[12].mxu0  ;;  %5914 = vmatprep.subr.bf16.mxu1 %v6445_v28  ;;  %4292 = vmatprep.mubr.bf16.mxu0 %v6452_v52  ;;  %v3575_v28 = vadd.f32 %v6951_v63, %v3510_v16  ;;  %v6483_v16 = vld [vmem:[%s6669_s26 + $0x78] ss:$144 sps:$4 sm:$0xff]  }
 0x120   : > { %v5384_v33 = vpop.f32.mrb[12].mxu1  ;;  %v5345_v35 = vpop.f32.mrb[13].mxu0  ;;  %4357 = vmatprep.mubr.bf16.mxu1 %v6454_v55  ;;  %v6475_v55 = vld [vmem:[%s6633_s22 + $0x7b0] sm:$0xff]  }
 0x121   : > { %v6981_v38 = vadd.f32 %v5345_v35, %v5344_v31  ;;  %v5385_v40 = vpop.f32.mrb[13].mxu1  ;;  %v5347_v43 = vpop.f32.mrb[14].mxu0  ;;  %v6446_v31 = vld [vmem:[%s6633_s22 + $0x710] sm:$0xff]   ;;  %5915 = vmatpush3.bf16.msra.mxu1 %v6447_v34 }
 0x122   : > { %v6984_v42 = vadd.f32 %v5385_v40, %v5384_v33  ;;  %v5387_v45 = vpop.f32.mrb[14].mxu1  ;;  %v5348_v47 = vpop.f32.mrb[15].mxu0  ;;  %5875 = vmatpush3.bf16.msra.mxu0 %v6446_v31  ;;  %v6448_v40 = vld [vmem:[%s6633_s22 + $0x758] sm:$0xff]  }
 0x123   : > { %v6989_v49 = vadd.f32 %v5348_v47, %v5347_v43  ;;  %v5388_v51 = vpop.f32.mrb[15].mxu1  ;;  %v6449_v43 = vld [vmem:[%s6633_s22 + $0x7d8] sm:$0xff]   ;;  %5876 = vmatprep.subr.bf16.mxu0 %v6448_v40  ;;  %v3523_v24 = vadd.f32 %v6981_v38, %v4834_v7 }
 0x124   : > { %v6992_v54 = vadd.f32 %v5388_v51, %v5387_v45  ;;  %v6450_v45 = vld [vmem:[%s6633_s22 + $0x718] sm:$0xff]   ;;  %5916 = vmatprep.subr.bf16.mxu1 %v6449_v43  ;;  %v6472_v43 = vld [vmem:[%s6633_s22 + $0x770] sm:$0xff]  }
 0x125   : > { %5917 = vmatpush3.bf16.msra.mxu1 %v6451_v48  ;;  %v3526_v25 = vadd.f32 %v6989_v49, %v4834_v7  ;;  %v3588_v29 = vadd.f32 %v6984_v42, %v3523_v24  ;;  %v6471_v40 = vld [vmem:[%s6669_s26 + $0x3c8] ss:$144 sps:$4 sm:$0xff]   ;;  %v6487_v24 = vld [vmem:[%s6633_s22 + $0x8c0] sm:$0xff]  }
 0x126   : > { %5877 = vmatpush3.bf16.msra.mxu0 %v6450_v45  ;;  %4358 = vmatmul.mubr.bf16.gmra.mrb[104].mxu1 %v6457_v57 }
 0x127   : > { %v5406_v56 = vpop.f32.mrb[16].mxu0  ;;  %5878 = vmatprep.subr.bf16.mxu0 %v6458_v58  ;;  %v3591_v49 = vadd.f32 %v6992_v54, %v3526_v25  ;;  %v6476_v58 = vld [vmem:[%s6633_s22 + $0x778] sm:$0xff]  }
 0x128   : > { %v5446_v61 = vpop.f32.mrb[16].mxu1  ;;  %v5407_v0 = vpop.f32.mrb[17].mxu0 }
 0x129   : > { %v7000_v2 = vadd.f32 %v5407_v0, %v5406_v56  ;;  %v5447_v3 = vpop.f32.mrb[17].mxu1  ;;  %v5409_v6 = vpop.f32.mrb[18].mxu0  ;;  %v6456_v56 = vld [vmem:[%s6669_s26 + $0x2a0] ss:$144 sps:$4 sm:$0xff]  }
 0x12a   : > { %v7003_v5 = vadd.f32 %v5447_v3, %v5446_v61  ;;  %v5449_v8 = vpop.f32.mrb[18].mxu1  ;;  %v5410_v11 = vpop.f32.mrb[19].mxu0  ;;  %4293 = vmatmul.mubr.bf16.gmra.mrb[104].mxu0 %v6456_v56  ;;  %v6459_v61 = vld [vmem:[%s6633_s22 + $0x7e0] sm:$0xff]  }
 0x12b   : > { %v7008_v14 = vadd.f32 %v5410_v11, %v5409_v6  ;;  %v5450_v15 = vpop.f32.mrb[19].mxu1  ;;  %v6460_v0 = vld [vmem:[%s6633_s22 + $0x720] sm:$0xff]   ;;  %5918 = vmatprep.subr.bf16.mxu1 %v6459_v61  ;;  %v6462_v11 = vld [vmem:[%s6633_s22 + $0x768] sm:$0xff]  }
 0x12c   : > { %v7011_v17 = vadd.f32 %v5450_v15, %v5449_v8  ;;  %v6461_v3 = vld [vmem:[%s6633_s22 + $0x7a0] sm:$0xff]   ;;  %5879 = vmatpush3.bf16.msra.mxu0 %v6460_v0  ;;  %v3507_v15 = vadd.f32 %v6940_v50, %v4834_v7  ;;  %v3567_v50 = vadd.f32 %v6931_v39, %v3502_v12 }
 0x12d   : > { %5919 = vmatpush3.bf16.msra.mxu1 %v6461_v3  ;;  %5880 = vmatprep.subr.bf16.mxu0 %v6462_v11  ;;  %v6466_v39 = vld [vmem:[%s6669_s26 + $0x3c4] ss:$144 sps:$4 sm:$0xff]  }
 0x12e   : > { %v3572_v60 = vadd.f32 %v6943_v53, %v3507_v15  ;;  %5920 = vmatprep.subr.bf16.mxu1 %v6463_v19  ;;  %v3629_v53 = vadd.f32 %v7000_v2, %v3564_v26  ;;  %v3632_v63 = vadd.f32 %v7008_v14, %v3567_v50  ;;  %4300 = vmatprep.mubr.bf16.mxu0 %v6466_v39  ;;  %v6482_v12 = vld [vmem:[%s6669_s26 + $0x74] ss:$144 sps:$4 sm:$0xff]  }
 0x12f   : > { %v5412_v22 = vpop.f32.mrb[20].mxu0  ;;  %v6489_v50 = vld [vmem:[%s6633_s22 + $0x880] sm:$0xff]  }
 0x130   : > { %v5452_v27 = vpop.f32.mrb[20].mxu1  ;;  %v5413_v30 = vpop.f32.mrb[21].mxu0  ;;  %5881 = vmatpush3.bf16.msra.mxu0 %v6464_v36  ;;  %v7075_v2 = vadd.f32 %v7011_v17, %v3632_v63  ;;  %v6474_v17 = vld [vmem:[%s6633_s22 + $0x730] sm:$0xff]   ;;  %v6493_v63 = vld [vmem:[%s6633_s22 + $0x888] sm:$0xff]  }
 0x131   : > { %v7020_v32 = vadd.f32 %v5413_v30, %v5412_v22  ;;  %v5453_v33 = vpop.f32.mrb[21].mxu1  ;;  %v5415_v37 = vpop.f32.mrb[22].mxu0  ;;  %v3518_v22 = vadd.f32 %v6968_v20, %v4834_v7  ;;  %v3580_v20 = vadd.f32 %v6963_v13, %v3515_v21  ;;  %5921 = vmatpush3.bf16.msra.mxu1 %v6465_v10  ;;  %v6468_v13 = vld [vmem:[%s6669_s26 + $0x3cc] ss:$144 sps:$4 sm:$0xff]   ;;  %5882 = vmatprep.subr.bf16.mxu0 %v6472_v43  ;;  %v6486_v21 = vld [vmem:[%s6633_s22 + $0x840] sm:$0xff]  }
 0x132   : > { %v7023_v35 = vadd.f32 %v5453_v33, %v5452_v27  ;;  %v5455_v41 = vpop.f32.mrb[22].mxu1  ;;  %v5416_v44 = vpop.f32.mrb[23].mxu0  ;;  %4365 = vmatprep.mubr.bf16.mxu1 %v6468_v13  ;;  %v6479_v7 = vld [vmem:[%s6633_s22 + $0x7b8] sm:$0xff]  }
 0x133   : > { %v5417_v46 = vadd.f32 %v5416_v44, %v5415_v37  ;;  %v5456_v47 = vpop.f32.mrb[23].mxu1  ;;  %v3583_v38 = vadd.f32 %v6971_v23, %v3518_v22  ;;  %v3637_v33 = vadd.f32 %v7020_v32, %v3572_v60  ;;  %v6470_v23 = vld [vmem:[%s6669_s26 + $0x3c0] ss:$144 sps:$4 sm:$0xff]   ;;  %v7072_v44 = vadd.f32 %v7003_v5, %v3629_v53  ;;  %4366 = vmatmul.mubr.bf16.gmra.mrb[108].mxu1 %v6471_v40  ;;  %v6496_v13 = vld [vmem:[%s6669_s26 + $0x19c] ss:$144 sps:$4 sm:$0xff]  }
 0x134   : > { %v7029_v51 = vadd.f32 %v5456_v47, %v5455_v41  ;;  %4301 = vmatmul.mubr.bf16.gmra.mrb[108].mxu0 %v6470_v23  ;;  %v6498_v23 = vld [vmem:[%s6669_s26 + $0x190] ss:$144 sps:$4 sm:$0xff]  }
 0x135   : > { %v3640_v34 = vadd.f32 %v5417_v46, %v3575_v28  ;;  %v7078_v14 = vadd.f32 %v7023_v35, %v3637_v33  ;;  %v6473_v46 = vld [vmem:[%s6633_s22 + $0x7f0] sm:$0xff]   ;;  %5883 = vmatpush3.bf16.msra.mxu0 %v6474_v17  ;;  %4406 = vmatprep.mubr.bf16.mxu0 %v6482_v12  ;;  %v6514_v12 = vld [vmem:[%s6633_s22 + $0x860] sm:$0xff]  }
 0x136   : > { %5922 = vmatprep.subr.bf16.mxu1 %v6473_v46  ;;  %5884 = vmatprep.subr.bf16.mxu0 %v6476_v58 }
 0x137   : > { %v5418_v59 = vpop.f32.mrb[24].mxu0  ;;  %v7081_v32 = vadd.f32 %v7029_v51, %v3640_v34  ;;  %5923 = vmatpush3.bf16.msra.mxu1 %v6475_v55  ;;  %v6494_v34 = vld [vmem:[%s6669_s26 + $0x194] ss:$144 sps:$4 sm:$0xff]  }
 0x138   : > { %v5458_v62 = vpop.f32.mrb[24].mxu1  ;;  %v5419_v1 = vpop.f32.mrb[25].mxu0 }
 0x139   : > { %v5420_v4 = vadd.f32 %v5419_v1, %v5418_v59  ;;  %v5459_v6 = vpop.f32.mrb[25].mxu1  ;;  %v5421_v18 = vpop.f32.mrb[26].mxu0  ;;  %v6478_v1 = vld [vmem:[%s6633_s22 + $0x738] sm:$0xff]  }
 0x13a   : > { %v5460_v8 = vadd.f32 %v5459_v6, %v5458_v62  ;;  %v5461_v27 = vpop.f32.mrb[26].mxu1  ;;  %v5422_v30 = vpop.f32.mrb[27].mxu0  ;;  %v6477_v62 = vld [vmem:[%s6633_s22 + $0x7f8] sm:$0xff]   ;;  %5885 = vmatpush3.bf16.msra.mxu0 %v6478_v1 }
 0x13b   : > { %v5462_v31 = vpop.f32.mrb[27].mxu1  ;;  %v3645_v42 = vadd.f32 %v5420_v4, %v3580_v20  ;;  %v5423_v41 = vadd.f32 %v5422_v30, %v5421_v18  ;;  %5924 = vmatprep.subr.bf16.mxu1 %v6477_v62  ;;  %v6485_v18 = vld [vmem:[%s6669_s26 + $0x7c] ss:$144 sps:$4 sm:$0xff]   ;;  %5950 = vmatprep.subr.bf16.mxu0 %v6486_v21 }
 0x13c   : > { %v5463_v54 = vadd.f32 %v5462_v31, %v5461_v27  ;;  %5925 = vmatpush3.bf16.msra.mxu1 %v6479_v7  ;;  %4471 = vmatprep.mubr.bf16.mxu1 %v6485_v18  ;;  %v6488_v27 = vld [vmem:[%s6633_s22 + $0x800] sm:$0xff]   ;;  %v6490_v30 = vld [vmem:[%s6633_s22 + $0x848] sm:$0xff]   ;;  %v6507_v1 = vld [vmem:[%s6633_s22 + $0x898] sm:$0xff]  }
 0x13d   : > { %v7084_v47 = vadd.f32 %v5460_v8, %v3645_v42  ;;  %v3648_v48 = vadd.f32 %v5423_v41, %v3583_v38  ;;  %4407 = vmatmul.mubr.bf16.vlgmr.msra.gmra.mrb[112].mxu0 %v6480_v9  ;;  %5990 = vmatprep.subr.bf16.mxu1 %v6487_v24  ;;  %v6491_v38 = vld [vmem:[%s6633_s22 + $0x8c8] sm:$0xff]   ;;  %v6512_v9 = vld [vmem:[%s6669_s26 + $0x2b0] ss:$144 sps:$4 sm:$0xff]  }
 0x13e   : > { %5951 = vmatpush3.bf16.msra.mxu0 %v6488_v27  ;;  %4414 = vmatprep.mubr.bf16.mxu0 %v6494_v34  ;;  %v6499_v42 = vld [vmem:[%s6669_s26 + $0x198] ss:$144 sps:$4 sm:$0xff]   ;;  %v6515_v18 = vld [vmem:[%s6633_s22 + $0x8e0] sm:$0xff]  }
 0x13f   : > { %v5424_v37 = vpop.f32.mrb[28].mxu0  ;;  %v7088_v51 = vadd.f32 %v5463_v54, %v3648_v48  ;;  %4472 = vmatmul.mubr.bf16.vlgmr.msra.gmra.mrb[112].mxu1 %v6483_v16  ;;  %5952 = vmatprep.subr.bf16.mxu0 %v6490_v30  ;;  %v6500_v54 = vld [vmem:[%s6633_s22 + $0x850] sm:$0xff]  }
 0x140   : > { %v5464_v45 = vpop.f32.mrb[28].mxu1  ;;  %v5425_v5 = vpop.f32.mrb[29].mxu0  ;;  %5991 = vmatpush3.bf16.msra.mxu1 %v6489_v50  ;;  %4479 = vmatprep.mubr.bf16.mxu1 %v6496_v13  ;;  %v6526_v34 = vld [vmem:[%s6669_s26 + $0x3d0] ss:$144 sps:$4 sm:$0xff]  }
 0x141   : > { %v5426_v52 = vadd.f32 %v5425_v5, %v5424_v37  ;;  %v5465_v35 = vpop.f32.mrb[29].mxu1  ;;  %v5427_v57 = vpop.f32.mrb[30].mxu0  ;;  %5992 = vmatprep.subr.bf16.mxu1 %v6491_v38  ;;  %v6503_v5 = vld [vmem:[%s6633_s22 + $0x890] sm:$0xff]  }
 0x142   : > { %v5466_v56 = vadd.f32 %v5465_v35, %v5464_v45  ;;  %v5467_v61 = vpop.f32.mrb[30].mxu1  ;;  %v5428_v0 = vpop.f32.mrb[31].mxu0  ;;  %v6504_v35 = vld [vmem:[%s6633_s22 + $0x858] sm:$0xff]  }
 0x143   : > { %v3653_v59 = vadd.f32 %v5426_v52, %v3588_v29  ;;  %v5429_v4 = vadd.f32 %v5428_v0, %v5427_v57  ;;  %v5468_v6 = vpop.f32.mrb[31].mxu1  ;;  %v6505_v57 = vld [vmem:[%s6633_s22 + $0x8d8] sm:$0xff]  }
 0x144   : > { %v5469_v8 = vadd.f32 %v5468_v6, %v5467_v61  ;;  %5993 = vmatpush3.bf16.msra.mxu1 %v6493_v63  ;;  %v6524_v63 = vld [vmem:[%s6669_s26 + $0x3dc] ss:$144 sps:$4 sm:$0xff]  }
 0x145   : > { %v7093_v3 = vadd.f32 %v5466_v56, %v3653_v59  ;;  %v3656_v11 = vadd.f32 %v5429_v4, %v3591_v49  ;;  %v6492_v49 = vld [vmem:[%s6633_s22 + $0x808] sm:$0xff]   ;;  %4415 = vmatmul.mubr.bf16.gmra.mrb[116].mxu0 %v6498_v23  ;;  %v6506_v59 = vld [vmem:[%s6633_s22 + $0x818] sm:$0xff]   ;;  %v6528_v23 = vld [vmem:[%s6633_s22 + $0x870] sm:$0xff]  }
 0x146   : > { %5953 = vmatpush3.bf16.msra.mxu0 %v6492_v49  ;;  %v6521_v49 = vld [vmem:[%s6633_s22 + $0x8a8] sm:$0xff]  }
 0x147   : > { %v5486_v15 = vpop.f32.mrb[32].mxu0  ;;  %v7100_v19 = vadd.f32 %v5469_v8, %v3656_v11  ;;  %4480 = vmatmul.mubr.bf16.gmra.mrb[116].mxu1 %v6499_v42  ;;  %5954 = vmatprep.subr.bf16.mxu0 %v6500_v54  ;;  %v6510_v8 = vld [vmem:[%s6669_s26 + $0x2bc] ss:$144 sps:$4 sm:$0xff]   ;;  %v6513_v11 = vld [vmem:[%s6669_s26 + $0x2b8] ss:$144 sps:$4 sm:$0xff]   ;;  %v6529_v42 = vld [vmem:[%s6633_s22 + $0x8f0] sm:$0xff]  }
 0x148   : > { %v5526_v22 = vpop.f32.mrb[32].mxu1  ;;  %v5487_v25 = vpop.f32.mrb[33].mxu0  ;;  %4487 = vmatprep.mubr.bf16.mxu1 %v6510_v8 }
 0x149   : > { %v5488_v26 = vadd.f32 %v5487_v25, %v5486_v15  ;;  %v5527_v36 = vpop.f32.mrb[33].mxu1  ;;  %v5489_v28 = vpop.f32.mrb[34].mxu0  ;;  %v6517_v25 = vld [vmem:[%s6633_s22 + $0x8a0] sm:$0xff]  }
 0x14a   : > { %v5528_v60 = vadd.f32 %v5527_v36, %v5526_v22  ;;  %v5529_v20 = vpop.f32.mrb[34].mxu1  ;;  %v5490_v29 = vpop.f32.mrb[35].mxu0  ;;  %v6518_v36 = vld [vmem:[%s6633_s22 + $0x868] sm:$0xff]  }
 0x14b   : > { %v3759_v10 = vadd.f32 %v5488_v26, %v7072_v44  ;;  %v5491_v39 = vadd.f32 %v5490_v29, %v5489_v28  ;;  %v5530_v53 = vpop.f32.mrb[35].mxu1  ;;  %v6501_v44 = vld [vmem:[%s6633_s22 + $0x8d0] sm:$0xff]   ;;  %v6519_v28 = vld [vmem:[%s6633_s22 + $0x8e8] sm:$0xff]  }
 0x14c   : > { %v5531_v33 = vadd.f32 %v5530_v53, %v5529_v20  ;;  %5994 = vmatprep.subr.bf16.mxu1 %v6501_v44 }
 0x14d   : > { %v7110_v31 = vadd.f32 %v5528_v60, %v3759_v10  ;;  %v3762_v37 = vadd.f32 %v5491_v39, %v7075_v2  ;;  %v6502_v2 = vld [vmem:[%s6633_s22 + $0x810] sm:$0xff]   ;;  %5995 = vmatpush3.bf16.msra.mxu1 %v6503_v5  ;;  %v6520_v10 = vld [vmem:[%s6633_s22 + $0x828] sm:$0xff]  }
 0x14e   : > { %5955 = vmatpush3.bf16.msra.mxu0 %v6502_v2  ;;  %5996 = vmatprep.subr.bf16.mxu1 %v6505_v57 }
 0x14f   : > { %v5492_v40 = vpop.f32.mrb[36].mxu0  ;;  %v7118_v41 = vadd.f32 %v5531_v33, %v3762_v37  ;;  %5956 = vmatprep.subr.bf16.mxu0 %v6504_v35  ;;  %4488 = vmatmul.mubr.bf16.gmra.mrb[120].mxu1 %v6513_v11  ;;  %v6527_v37 = vld [vmem:[%s6669_s26 + $0x3d8] ss:$144 sps:$4 sm:$0xff]   ;;  %v6542_v11 = vld [vmem:[%s6669_s26 + $0x1a4] ss:$144 sps:$4 sm:$0xff]  }
 0x150   : > { %v5532_v43 = vpop.f32.mrb[36].mxu1  ;;  %v5493_v45 = vpop.f32.mrb[37].mxu0  ;;  %4495 = vmatprep.mubr.bf16.mxu1 %v6524_v63 }
 0x151   : > { %v5494_v46 = vadd.f32 %v5493_v45, %v5492_v40  ;;  %v5533_v48 = vpop.f32.mrb[37].mxu1  ;;  %v5495_v52 = vpop.f32.mrb[38].mxu0  ;;  %5997 = vmatpush3.bf16.msra.mxu1 %v6507_v1  ;;  %v6531_v45 = vld [vmem:[%s6633_s22 + $0x8b0] sm:$0xff]  }
 0x152   : > { %v5534_v17 = vadd.f32 %v5533_v48, %v5532_v43  ;;  %v5535_v56 = vpop.f32.mrb[38].mxu1  ;;  %v5496_v58 = vpop.f32.mrb[39].mxu0  ;;  %5957 = vmatpush3.bf16.msra.mxu0 %v6506_v59  ;;  %5998 = vmatprep.subr.bf16.mxu1 %v6515_v18  ;;  %v6532_v48 = vld [vmem:[%s6633_s22 + $0x878] sm:$0xff]   ;;  %v6538_v1 = vld [vmem:[%s6669_s26 + $0x84] ss:$144 sps:$4 sm:$0xff]  }
 0x153   : > { %v3767_v55 = vadd.f32 %v5494_v46, %v7078_v14  ;;  %v5497_v62 = vadd.f32 %v5496_v58, %v5495_v52  ;;  %v5536_v0 = vpop.f32.mrb[39].mxu1  ;;  %v6508_v14 = vld [vmem:[%s6669_s26 + $0x2b4] ss:$144 sps:$4 sm:$0xff]   ;;  %5958 = vmatprep.subr.bf16.mxu0 %v6514_v12  ;;  %v6533_v52 = vld [vmem:[%s6633_s22 + $0x8f8] sm:$0xff]  }
 0x154   : > { %v5537_v4 = vadd.f32 %v5536_v0, %v5535_v56  ;;  %4422 = vmatprep.mubr.bf16.mxu0 %v6508_v14  ;;  %v6535_v59 = vld [vmem:[%s6633_s22 + $0x8b8] sm:$0xff]   ;;  %v6536_v0 = vld [vmem:[%s6669_s26 + $0x80] ss:$144 sps:$4 sm:$0xff]  }
 0x155   : > { %v7128_v61 = vadd.f32 %v5534_v17, %v3767_v55  ;;  %v3770_v6 = vadd.f32 %v5497_v62, %v7081_v32  ;;  %4423 = vmatmul.mubr.bf16.gmra.mrb[120].mxu0 %v6512_v9  ;;  %v6516_v32 = vld [vmem:[%s6633_s22 + $0x820] sm:$0xff]   ;;  %5999 = vmatpush3.bf16.msra.mxu1 %v6517_v25  ;;  %v6534_v55 = vld [vmem:[%s6633_s22 + $0x838] sm:$0xff]  }
 0x156   : > { %5959 = vmatpush3.bf16.msra.mxu0 %v6516_v32  ;;  %6000 = vmatprep.subr.bf16.mxu1 %v6519_v28 }
 0x157   : > { %v5498_v7 = vpop.f32.mrb[40].mxu0  ;;  %v7137_v15 = vadd.f32 %v5537_v4, %v3770_v6  ;;  %5960 = vmatprep.subr.bf16.mxu0 %v6518_v36  ;;  %4496 = vmatmul.mubr.bf16.gmra.mrb[124].mxu1 %v6527_v37  ;;  %v6539_v4 = vld [vmem:[%s6669_s26 + $0x88] ss:$144 sps:$4 sm:$0xff]   ;;  %v6541_v6 = vld [vmem:[%s6669_s26 + $0x8c] ss:$144 sps:$4 sm:$0xff]  }
 0x158   : > { %v5538_v16 = vpop.f32.mrb[40].mxu1  ;;  %v5499_v21 = vpop.f32.mrb[41].mxu0  ;;  %4601 = vmatprep.mubr.bf16.mxu1 %v6541_v6 }
 0x159   : > { %v5500_v22 = vadd.f32 %v5499_v21, %v5498_v7  ;;  %v5539_v24 = vpop.f32.mrb[41].mxu1  ;;  %v5501_v26 = vpop.f32.mrb[42].mxu0  ;;  %6001 = vmatpush3.bf16.msra.mxu1 %v6521_v49  ;;  %v6544_v21 = vld [vmem:[%s6669_s26 + $0x1ac] ss:$144 sps:$4 sm:$0xff]  }
 0x15a   : > { %v5540_v27 = vadd.f32 %v5539_v24, %v5538_v16  ;;  %v5541_v60 = vpop.f32.mrb[42].mxu1  ;;  %v5502_v30 = vpop.f32.mrb[43].mxu0  ;;  %5961 = vmatpush3.bf16.msra.mxu0 %v6520_v10  ;;  %6002 = vmatprep.subr.bf16.mxu1 %v6529_v42  ;;  %v6550_v10 = vld [vmem:[%s6669_s26 + $0x2cc] ss:$144 sps:$4 sm:$0xff]   ;;  %v6554_v42 = vld [vmem:[%s6669_s26 + $0x3e4] ss:$144 sps:$4 sm:$0xff]  }
 0x15b   : > { %v3775_v50 = vadd.f32 %v5500_v22, %v7084_v47  ;;  %v5503_v38 = vadd.f32 %v5502_v30, %v5501_v26  ;;  %v5542_v29 = vpop.f32.mrb[43].mxu1  ;;  %v6522_v47 = vld [vmem:[%s6669_s26 + $0x3d4] ss:$144 sps:$4 sm:$0xff]   ;;  %5962 = vmatprep.subr.bf16.mxu0 %v6528_v23  ;;  %v6546_v26 = vld [vmem:[%s6669_s26 + $0x1a0] ss:$144 sps:$4 sm:$0xff]  }
 0x15c   : > { %v5543_v39 = vadd.f32 %v5542_v29, %v5541_v60  ;;  %4430 = vmatprep.mubr.bf16.mxu0 %v6522_v47  ;;  %v6548_v60 = vld [vmem:[%s6669_s26 + $0x2c4] ss:$144 sps:$4 sm:$0xff]   ;;  %v6547_v30 = vld [vmem:[%s6669_s26 + $0x1a8] ss:$144 sps:$4 sm:$0xff]  }
 0x15d   : > { %v7146_v20 = vadd.f32 %v5540_v27, %v3775_v50  ;;  %v3778_v53 = vadd.f32 %v5503_v38, %v7088_v51  ;;  %4431 = vmatmul.mubr.bf16.gmra.mrb[124].mxu0 %v6526_v34  ;;  %v6530_v51 = vld [vmem:[%s6633_s22 + $0x830] sm:$0xff]   ;;  %6003 = vmatpush3.bf16.msra.mxu1 %v6531_v45  ;;  %v6556_v45 = vld [vmem:[%s6669_s26 + $0x3ec] ss:$144 sps:$4 sm:$0xff]  }
 0x15e   : > { %5963 = vmatpush3.bf16.msra.mxu0 %v6530_v51  ;;  %6004 = vmatprep.subr.bf16.mxu1 %v6533_v52  ;;  %v6552_v34 = vld [vmem:[%s6669_s26 + $0x2c0] ss:$144 sps:$4 sm:$0xff]   ;;  %v6553_v51 = vld [vmem:[%s6669_s26 + $0x2c8] ss:$144 sps:$4 sm:$0xff]  }
 0x15f   : > { %v5504_v33 = vpop.f32.mrb[44].mxu0  ;;  %v7154_v13 = vadd.f32 %v5543_v39, %v3778_v53  ;;  %5964 = vmatprep.subr.bf16.mxu0 %v6532_v48  ;;  %4536 = vmatprep.mubr.bf16.mxu0 %v6538_v1  ;;  %v6558_v48 = vld [vmem:[%s6669_s26 + $0x3e0] ss:$144 sps:$4 sm:$0xff]  }
 0x160   : > { %v5544_v40 = vpop.f32.mrb[44].mxu1  ;;  %v5505_v54 = vpop.f32.mrb[45].mxu0 }
 0x161   : > { %v5506_v43 = vadd.f32 %v5505_v54, %v5504_v33  ;;  %v5545_v44 = vpop.f32.mrb[45].mxu1  ;;  %v5507_v46 = vpop.f32.mrb[46].mxu0  ;;  %6005 = vmatpush3.bf16.msra.mxu1 %v6535_v59 }
 0x162   : > { %v5546_v2 = vadd.f32 %v5545_v44, %v5544_v40  ;;  %v5547_v17 = vpop.f32.mrb[46].mxu1  ;;  %v5508_v35 = vpop.f32.mrb[47].mxu0  ;;  %5965 = vmatpush3.bf16.msra.mxu0 %v6534_v55  ;;  %v6559_v55 = vld [vmem:[%s6669_s26 + $0x3e8] ss:$144 sps:$4 sm:$0xff]  }
 0x163   : > { %v3783_v5 = vadd.f32 %v5506_v43, %v7093_v3  ;;  %v5509_v57 = vadd.f32 %v5508_v35, %v5507_v46  ;;  %v5548_v58 = vpop.f32.mrb[47].mxu1 }
 0x164   : > { %v5549_v62 = vadd.f32 %v5548_v58, %v5547_v17  ;;  %4602 = vmatmul.mubr.bf16.vlgmr.msra.gmra.mrb[128].mxu1 %v6539_v4 }
 0x165   : > { %v7164_v56 = vadd.f32 %v5546_v2, %v3783_v5  ;;  %v3786_v3 = vadd.f32 %v5509_v57, %v7100_v19  ;;  %4537 = vmatmul.mubr.bf16.vlgmr.msra.gmra.mrb[128].mxu0 %v6536_v0  ;;  %4609 = vmatprep.mubr.bf16.mxu1 %v6544_v21 }
 0x166   : > { %4544 = vmatprep.mubr.bf16.mxu0 %v6542_v11 }
 0x167   : > { %v5566_v14 = vpop.f32.mrb[48].mxu0  ;;  %v7172_v7 = vadd.f32 %v5549_v62, %v3786_v3 }
 0x168   : > { %v5606_v8 = vpop.f32.mrb[48].mxu1  ;;  %v5567_v9 = vpop.f32.mrb[49].mxu0 }
 0x169   : > { %v5568_v12 = vadd.f32 %v5567_v9, %v5566_v14  ;;  %v5607_v16 = vpop.f32.mrb[49].mxu1  ;;  %v5569_v18 = vpop.f32.mrb[50].mxu0 }
 0x16a   : > { %v5608_v19 = vadd.f32 %v5607_v16, %v5606_v8  ;;  %v5609_v22 = vpop.f32.mrb[50].mxu1  ;;  %v5570_v24 = vpop.f32.mrb[51].mxu0 }
 0x16b   : > { %v3889_v32 = vadd.f32 %v5568_v12, %v7110_v31  ;;  %v5571_v25 = vadd.f32 %v5570_v24, %v5569_v18  ;;  %v5610_v27 = vpop.f32.mrb[51].mxu1 }
 0x16c   : > { %v5611_v50 = vadd.f32 %v5610_v27, %v5609_v22  ;;  %4610 = vmatmul.mubr.bf16.gmra.mrb[132].mxu1 %v6547_v30 }
 0x16d   : > { %v7178_v36 = vadd.f32 %v5608_v19, %v3889_v32  ;;  %v3892_v28 = vadd.f32 %v5571_v25, %v7118_v41  ;;  %4545 = vmatmul.mubr.bf16.gmra.mrb[132].mxu0 %v6546_v26  ;;  %4617 = vmatprep.mubr.bf16.mxu1 %v6550_v10 }
 0x16e   : > { %4552 = vmatprep.mubr.bf16.mxu0 %v6548_v60 }
 0x16f   : > { %v7184_v38 = vadd.f32 %v5611_v50, %v3892_v28  ;;  %v5572_v29 = vpop.f32.mrb[52].mxu0 }
 0x170   : > { %v5612_v31 = vpop.f32.mrb[52].mxu1  ;;  %v5573_v49 = vpop.f32.mrb[53].mxu0 }
 0x171   : > { %v5574_v39 = vadd.f32 %v5573_v49, %v5572_v29  ;;  %v5613_v47 = vpop.f32.mrb[53].mxu1  ;;  %v5575_v53 = vpop.f32.mrb[54].mxu0 }
 0x172   : > { %v5614_v63 = vadd.f32 %v5613_v47, %v5612_v31  ;;  %v5615_v41 = vpop.f32.mrb[54].mxu1  ;;  %v5576_v33 = vpop.f32.mrb[55].mxu0 }
 0x173   : > { %v3897_v37 = vadd.f32 %v5574_v39, %v7128_v61  ;;  %v5577_v23 = vadd.f32 %v5576_v33, %v5575_v53  ;;  %v5616_v40 = vpop.f32.mrb[55].mxu1 }
 0x174   : > { %v5617_v54 = vadd.f32 %v5616_v40, %v5615_v41  ;;  %4618 = vmatmul.mubr.bf16.gmra.mrb[136].mxu1 %v6553_v51 }
 0x175   : > { %v7190_v43 = vadd.f32 %v5614_v63, %v3897_v37  ;;  %v3900_v44 = vadd.f32 %v5577_v23, %v7137_v15  ;;  %4553 = vmatmul.mubr.bf16.gmra.mrb[136].mxu0 %v6552_v34  ;;  %4625 = vmatprep.mubr.bf16.mxu1 %v6556_v45 }
 0x176   : > { %4560 = vmatprep.mubr.bf16.mxu0 %v6554_v42 }
 0x177   : > { %v7194_v2 = vadd.f32 %v5617_v54, %v3900_v44  ;;  %v5578_v46 = vpop.f32.mrb[56].mxu0 }
 0x178   : > { %v5618_v61 = vpop.f32.mrb[56].mxu1  ;;  %v5579_v5 = vpop.f32.mrb[57].mxu0 }
 0x179   : > { %v5580_v17 = vadd.f32 %v5579_v5, %v5578_v46  ;;  %v5619_v52 = vpop.f32.mrb[57].mxu1  ;;  %v5581_v35 = vpop.f32.mrb[58].mxu0 }
 0x17a   : > { %v5620_v57 = vadd.f32 %v5619_v52, %v5618_v61  ;;  %v5621_v58 = vpop.f32.mrb[58].mxu1  ;;  %v5582_v59 = vpop.f32.mrb[59].mxu0 }
 0x17b   : > { %v3905_v15 = vadd.f32 %v5580_v17, %v7146_v20  ;;  %v5583_v62 = vadd.f32 %v5582_v59, %v5581_v35  ;;  %v5622_v0 = vpop.f32.mrb[59].mxu1 }
 0x17c   : > { %v5623_v1 = vadd.f32 %v5622_v0, %v5621_v58  ;;  %4626 = vmatmul.mubr.bf16.gmra.mrb[140].mxu1 %v6559_v55 }
 0x17d   : > { %4561 = vmatmul.mubr.bf16.gmra.mrb[140].mxu0 %v6558_v48  ;;  %v3970_v3 = vadd.f32 %v5620_v57, %v3905_v15  ;;  %v3908_v4 = vadd.f32 %v5583_v62, %v7154_v13 }
 0x17f   : > { %v7200_v14 = vadd.f32 %v5623_v1, %v3908_v4  ;;  %v5584_v6 = vpop.f32.mrb[60].mxu0 }
 0x180   : > { %v5624_v8 = vpop.f32.mrb[60].mxu1  ;;  %v5585_v9 = vpop.f32.mrb[61].mxu0 }
 0x181   : > { %v5625_v11 = vpop.f32.mrb[61].mxu1  ;;  %v5586_v12 = vadd.f32 %v5585_v9, %v5584_v6  ;;  %v5587_v18 = vpop.f32.mrb[62].mxu0 }
 0x182   : > { %v5626_v16 = vadd.f32 %v5625_v11, %v5624_v8  ;;  %v5627_v21 = vpop.f32.mrb[62].mxu1  ;;  %v5588_v19 = vpop.f32.mrb[63].mxu0 }
 0x183   : > { %v5628_v20 = vpop.f32.mrb[63].mxu1  ;;  %v3913_v32 = vadd.f32 %v5586_v12, %v7164_v56  ;;  %v5589_v22 = vadd.f32 %v5588_v19, %v5587_v18 }
 0x184   : > { %v5629_v24 = vadd.f32 %v5628_v20, %v5627_v21 }
 0x185   : > { %v3978_v25 = vadd.f32 %v5626_v16, %v3913_v32  ;;  %v3916_v13 = vadd.f32 %v5589_v22, %v7172_v7 }
 0x187   : > { %v7204_v27 = vadd.f32 %v5629_v24, %v3916_v13  ;;  %v5646_v26 = vpop.f32.mrb[64].mxu0 }
 0x188   : > { %v5647_v50 = vpop.f32.mrb[65].mxu0  ;;  %v5686_v60 = vpop.f32.mrb[64].mxu1 }
 0x189   : > { %v5648_v28 = vadd.f32 %v5647_v50, %v5646_v26  ;;  %v5649_v30 = vpop.f32.mrb[66].mxu0  ;;  %v5687_v10 = vpop.f32.mrb[65].mxu1 }
 0x18a   : > { %v5650_v29 = vpop.f32.mrb[67].mxu0  ;;  %v5688_v49 = vadd.f32 %v5687_v10, %v5686_v60  ;;  %v5689_v39 = vpop.f32.mrb[66].mxu1 }
 0x18b   : > { %v4019_v31 = vadd.f32 %v5648_v28, %v7178_v36  ;;  %v5651_v47 = vadd.f32 %v5650_v29, %v5649_v30  ;;  %v5690_v56 = vpop.f32.mrb[67].mxu1 }
 0x18c   : > { %v5691_v41 = vadd.f32 %v5690_v56, %v5689_v39 }
 0x18d   : > { %v4084_v53 = vadd.f32 %v5688_v49, %v4019_v31  ;;  %v4022_v63 = vadd.f32 %v5651_v47, %v7184_v38 }
 0x18f   : > { %v7208_v7 = vadd.f32 %v5691_v41, %v4022_v63  ;;  %v5652_v33 = vpop.f32.mrb[68].mxu0 }
 0x190   : > { %v5692_v34 = vpop.f32.mrb[68].mxu1  ;;  %v5653_v37 = vpop.f32.mrb[69].mxu0 }
 0x191   : > { %v5654_v23 = vadd.f32 %v5653_v37, %v5652_v33  ;;  %v5693_v40 = vpop.f32.mrb[69].mxu1  ;;  %v5655_v42 = vpop.f32.mrb[70].mxu0 }
 0x192   : > { %v5694_v54 = vadd.f32 %v5693_v40, %v5692_v34  ;;  %v5695_v51 = vpop.f32.mrb[70].mxu1  ;;  %v5656_v44 = vpop.f32.mrb[71].mxu0 }
 0x193   : > { %v4027_v36 = vadd.f32 %v5654_v23, %v7190_v43  ;;  %v5657_v45 = vadd.f32 %v5656_v44, %v5655_v42  ;;  %v5696_v46 = vpop.f32.mrb[71].mxu1 }
 0x194   : > { %v5697_v48 = vadd.f32 %v5696_v46, %v5695_v51 }
 0x195   : > { %v4092_v61 = vadd.f32 %v5694_v54, %v4027_v36  ;;  %v4030_v38 = vadd.f32 %v5657_v45, %v7194_v2 }
 0x197   : > { %v7212_v5 = vadd.f32 %v5697_v48, %v4030_v38  ;;  %v5658_v17 = vpop.f32.mrb[72].mxu0 }
 0x198   : > { %v5698_v52 = vpop.f32.mrb[72].mxu1  ;;  %v5659_v35 = vpop.f32.mrb[73].mxu0 }
 0x199   : > { %v5699_v55 = vpop.f32.mrb[73].mxu1  ;;  %v5660_v57 = vadd.f32 %v5659_v35, %v5658_v17  ;;  %v5661_v59 = vpop.f32.mrb[74].mxu0 }
 0x19a   : > { %v5700_v58 = vadd.f32 %v5699_v55, %v5698_v52  ;;  %v5701_v15 = vpop.f32.mrb[74].mxu1  ;;  %v5662_v62 = vpop.f32.mrb[75].mxu0 }
 0x19b   : > { %v5702_v0 = vpop.f32.mrb[75].mxu1  ;;  %v4035_v1 = vadd.f32 %v5660_v57, %v3970_v3  ;;  %v5663_v43 = vadd.f32 %v5662_v62, %v5661_v59 }
 0x19c   : > { %v5703_v4 = vadd.f32 %v5702_v0, %v5701_v15 }
 0x19d   : > { %v4100_v6 = vadd.f32 %v5700_v58, %v4035_v1  ;;  %v4038_v8 = vadd.f32 %v5663_v43, %v7200_v14 }
 0x19f   : > { %v7215_v9 = vadd.f32 %v5703_v4, %v4038_v8  ;;  %v5664_v2 = vpop.f32.mrb[76].mxu0 }
 0x1a0   : > { %v5704_v11 = vpop.f32.mrb[76].mxu1  ;;  %v5665_v12 = vpop.f32.mrb[77].mxu0 }
 0x1a1   : > { %v5666_v16 = vadd.f32 %v5665_v12, %v5664_v2  ;;  %v5705_v18 = vpop.f32.mrb[77].mxu1  ;;  %v5667_v21 = vpop.f32.mrb[78].mxu0 }
 0x1a2   : > { %v5706_v19 = vadd.f32 %v5705_v18, %v5704_v11  ;;  %v5707_v20 = vpop.f32.mrb[78].mxu1  ;;  %v5668_v32 = vpop.f32.mrb[79].mxu0 }
 0x1a3   : > { %v4043_v22 = vadd.f32 %v5666_v16, %v3978_v25  ;;  %v5669_v24 = vadd.f32 %v5668_v32, %v5667_v21  ;;  %v5708_v13 = vpop.f32.mrb[79].mxu1 }
 0x1a4   : > { %v5709_v3 = vadd.f32 %v5708_v13, %v5707_v20 }
 0x1a5   : > { %v4108_v26 = vadd.f32 %v5706_v19, %v4043_v22  ;;  %v4046_v50 = vadd.f32 %v5669_v24, %v7204_v27 }
 0x1a7   : > { %v7218_v60 = vadd.f32 %v5709_v3, %v4046_v50  ;;  %v5726_v14 = vpop.f32.mrb[80].mxu0 }
 0x1a8   : > { %v5766_v28 = vpop.f32.mrb[80].mxu1  ;;  %v5727_v30 = vpop.f32.mrb[81].mxu0 }
 0x1a9   : > { %v5728_v10 = vadd.f32 %v5727_v30, %v5726_v14  ;;  %v5767_v29 = vpop.f32.mrb[81].mxu1  ;;  %v5729_v31 = vpop.f32.mrb[82].mxu0 }
 0x1aa   : > { %v5768_v49 = vadd.f32 %v5767_v29, %v5766_v28  ;;  %v5769_v39 = vpop.f32.mrb[82].mxu1  ;;  %v5730_v47 = vpop.f32.mrb[83].mxu0 }
 0x1ab   : > { %v4149_v56 = vadd.f32 %v5728_v10, %v4084_v53  ;;  %v5731_v63 = vadd.f32 %v5730_v47, %v5729_v31  ;;  %v5770_v25 = vpop.f32.mrb[83].mxu1 }
 0x1ac   : > { %v5771_v41 = vadd.f32 %v5770_v25, %v5769_v39 }
 0x1ad   : > { %v4214_v33 = vadd.f32 %v5768_v49, %v4149_v56  ;;  %v4152_v34 = vadd.f32 %v5731_v63, %v7208_v7 }
 0x1af   : > { %v7221_v37 = vadd.f32 %v5771_v41, %v4152_v34  ;;  %v5732_v27 = vpop.f32.mrb[84].mxu0 }
 0x1b0   : > { %v5772_v23 = vpop.f32.mrb[84].mxu1  ;;  %v5733_v40 = vpop.f32.mrb[85].mxu0 }
 0x1b1   : > { %v5773_v42 = vpop.f32.mrb[85].mxu1  ;;  %v5734_v54 = vadd.f32 %v5733_v40, %v5732_v27  ;;  %v5735_v44 = vpop.f32.mrb[86].mxu0 }
 0x1b2   : > { %v5774_v51 = vadd.f32 %v5773_v42, %v5772_v23  ;;  %v5775_v36 = vpop.f32.mrb[86].mxu1  ;;  %v5736_v45 = vpop.f32.mrb[87].mxu0 }
 0x1b3   : > { %v5776_v46 = vpop.f32.mrb[87].mxu1  ;;  %v4157_v48 = vadd.f32 %v5734_v54, %v4092_v61  ;;  %v5737_v53 = vadd.f32 %v5736_v45, %v5735_v44 }
 0x1b4   : > { %v5777_v38 = vadd.f32 %v5776_v46, %v5775_v36 }
 0x1b5   : > { %v4222_v17 = vadd.f32 %v5774_v51, %v4157_v48  ;;  %v4160_v52 = vadd.f32 %v5737_v53, %v7212_v5 }
 0x1b7   : > { %v7224_v35 = vadd.f32 %v5777_v38, %v4160_v52  ;;  %v5738_v7 = vpop.f32.mrb[88].mxu0 }
 0x1b8   : > { %v5778_v55 = vpop.f32.mrb[88].mxu1  ;;  %v5739_v57 = vpop.f32.mrb[89].mxu0 }
 0x1b9   : > { %v5740_v58 = vadd.f32 %v5739_v57, %v5738_v7  ;;  %v5779_v59 = vpop.f32.mrb[89].mxu1  ;;  %v5741_v15 = vpop.f32.mrb[90].mxu0 }
 0x1ba   : > { %v5780_v62 = vadd.f32 %v5779_v59, %v5778_v55  ;;  %v5781_v0 = vpop.f32.mrb[90].mxu1  ;;  %v5742_v1 = vpop.f32.mrb[91].mxu0 }
 0x1bb   : > { %v4165_v43 = vadd.f32 %v5740_v58, %v4100_v6  ;;  %v5743_v4 = vadd.f32 %v5742_v1, %v5741_v15  ;;  %v5782_v8 = vpop.f32.mrb[91].mxu1 }
 0x1bc   : > { %v5783_v61 = vadd.f32 %v5782_v8, %v5781_v0 }
 0x1bd   : > { %v4230_v2 = vadd.f32 %v5780_v62, %v4165_v43  ;;  %v4168_v11 = vadd.f32 %v5743_v4, %v7215_v9 }
 0x1bf   : > { %v7227_v12 = vadd.f32 %v5783_v61, %v4168_v11 }
 0x1c0   : > { %v5784_v16 = vpop.f32.mrb[92].mxu1 }
 0x1c1   : > { %v5785_v19 = vpop.f32.mrb[93].mxu1 }
 0x1c2   : > { %v5786_v32 = vadd.f32 %v5785_v19, %v5784_v16  ;;  %v5787_v22 = vpop.f32.mrb[94].mxu1 }
 0x1c3   : > { %v5788_v6 = vpop.f32.mrb[95].mxu1 }
 0x1c4   : > { %v5789_v50 = vadd.f32 %v5788_v6, %v5787_v22 }
 0x1de   : > { %v5744_v5 = vpop.f32.mrb[92].mxu0 }
 0x1df   : > { %v5745_v18 = vpop.f32.mrb[93].mxu0 }
 0x1e0   : > { %v5746_v21 = vadd.f32 %v5745_v18, %v5744_v5  ;;  %v5747_v20 = vpop.f32.mrb[94].mxu0 }
 0x1e1   : > { %v5748_v24 = vpop.f32.mrb[95].mxu0 }
 0x1e2   : > { %v4173_v13 = vadd.f32 %v5746_v21, %v4108_v26  ;;  %v5749_v3 = vadd.f32 %v5748_v24, %v5747_v20 }
 0x1e4   : > { %v4238_v14 = vadd.f32 %v5786_v32, %v4173_v13  ;;  %v4176_v28 = vadd.f32 %v5749_v3, %v7218_v60 }
 0x1e6   : > { %v7230_v30 = vadd.f32 %v5789_v50, %v4176_v28 }
 0x1e9   : > { %v5806_v9 = vpop.f32.mrb[96].mxu0  ;;  %v5846_v10 = vpop.f32.mrb[96].mxu1 }
 0x1ea   : > { %v5807_v29 = vpop.f32.mrb[97].mxu0  ;;  %v5847_v49 = vpop.f32.mrb[97].mxu1 }
 0x1eb   : > { %v5808_v31 = vadd.f32 %v5807_v29, %v5806_v9  ;;  %v5809_v39 = vpop.f32.mrb[98].mxu0  ;;  %v5848_v47 = vadd.f32 %v5847_v49, %v5846_v10  ;;  %v5849_v56 = vpop.f32.mrb[98].mxu1 }
 0x1ec   : > { %v5810_v63 = vpop.f32.mrb[99].mxu0  ;;  %v5850_v26 = vpop.f32.mrb[99].mxu1 }
 0x1ed   : > { %v4279_v25 = vadd.f32 %v5808_v31, %v4214_v33  ;;  %v5811_v41 = vadd.f32 %v5810_v63, %v5809_v39  ;;  %v5851_v34 = vadd.f32 %v5850_v26, %v5849_v56 }
 0x1ef   : > { %v4344_v27 = vadd.f32 %v5848_v47, %v4279_v25  ;;  %v4282_v23 = vadd.f32 %v5811_v41, %v7221_v37 }
 0x1f1   : > { %v7233_v40 = vadd.f32 %v5851_v34, %v4282_v23  ;;  %v5812_v60 = vpop.f32.mrb[100].mxu0  ;;  %v5852_v42 = vpop.f32.mrb[100].mxu1 }
 0x1f2   : > { %v5813_v54 = vpop.f32.mrb[101].mxu0  ;;  %v5853_v44 = vpop.f32.mrb[101].mxu1 }
 0x1f3   : > { %v5814_v51 = vadd.f32 %v5813_v54, %v5812_v60  ;;  %v5815_v36 = vpop.f32.mrb[102].mxu0  ;;  %v5854_v45 = vadd.f32 %v5853_v44, %v5852_v42  ;;  %v5855_v46 = vpop.f32.mrb[102].mxu1 }
 0x1f4   : > { %v5816_v48 = vpop.f32.mrb[103].mxu0  ;;  %v5856_v33 = vpop.f32.mrb[103].mxu1 }
 0x1f5   : > { %v4287_v53 = vadd.f32 %v5814_v51, %v4222_v17  ;;  %v5817_v38 = vadd.f32 %v5816_v48, %v5815_v36  ;;  %v5857_v52 = vadd.f32 %v5856_v33, %v5855_v46 }
 0x1f7   : > { %v4352_v7 = vadd.f32 %v5854_v45, %v4287_v53  ;;  %v4290_v55 = vadd.f32 %v5817_v38, %v7224_v35 }
 0x1f9   : > { %v7236_v57 = vadd.f32 %v5857_v52, %v4290_v55  ;;  %v5858_v58 = vpop.f32.mrb[104].mxu1 }
 0x1fa   : > { %v5859_v62 = vpop.f32.mrb[105].mxu1 }
 0x1fb   : > { %v5860_v1 = vadd.f32 %v5859_v62, %v5858_v58  ;;  %v5861_v43 = vpop.f32.mrb[106].mxu1 }
 0x1fc   : > { %v5862_v17 = vpop.f32.mrb[107].mxu1 }
 0x1fd   : > { %v5818_v37 = vpop.f32.mrb[104].mxu0  ;;  %v5863_v11 = vadd.f32 %v5862_v17, %v5861_v43 }
 0x1fe   : > { %v5819_v59 = vpop.f32.mrb[105].mxu0 }
 0x1ff   : > { %v5820_v15 = vadd.f32 %v5819_v59, %v5818_v37  ;;  %v5821_v0 = vpop.f32.mrb[106].mxu0 }
 0x200   : > { %v5822_v4 = vpop.f32.mrb[107].mxu0 }
 0x201   : > { %v4295_v8 = vadd.f32 %v5820_v15, %v4230_v2  ;;  %v5823_v61 = vadd.f32 %v5822_v4, %v5821_v0 }
 0x203   : > { %v4360_v5 = vadd.f32 %v5860_v1, %v4295_v8  ;;  %v4298_v16 = vadd.f32 %v5823_v61, %v7227_v12 }
 0x205   : > { %v7239_v18 = vadd.f32 %v5863_v11, %v4298_v16 }
 0x206   : > { %v5864_v21 = vpop.f32.mrb[108].mxu1 }
 0x207   : > { %v5824_v35 = vpop.f32.mrb[108].mxu0  ;;  %v5865_v32 = vpop.f32.mrb[109].mxu1 }
 0x208   : > { %v5825_v19 = vpop.f32.mrb[109].mxu0  ;;  %v5866_v24 = vadd.f32 %v5865_v32, %v5864_v21  ;;  %v5867_v13 = vpop.f32.mrb[110].mxu1 }
 0x209   : > { %v5826_v20 = vadd.f32 %v5825_v19, %v5824_v35  ;;  %v5827_v22 = vpop.f32.mrb[110].mxu0  ;;  %v5868_v2 = vpop.f32.mrb[111].mxu1 }
 0x20a   : > { %v5828_v3 = vpop.f32.mrb[111].mxu0  ;;  %v5869_v28 = vadd.f32 %v5868_v2, %v5867_v13 }
 0x20b   : > { %v4303_v6 = vadd.f32 %v5826_v20, %v4238_v14  ;;  %v5829_v50 = vadd.f32 %v5828_v3, %v5827_v22 }
 0x20d   : > { %v4368_v9 = vadd.f32 %v5866_v24, %v4303_v6  ;;  %v4306_v10 = vadd.f32 %v5829_v50, %v7230_v30 }
 0x20f   : > { %v7242_v29 = vadd.f32 %v5869_v28, %v4306_v10 }
 0x210   : > { %v5886_v12 = vpop.f32.mrb[112].mxu0 }
 0x211   : > { %v5887_v49 = vpop.f32.mrb[113].mxu0 }
 0x212   : > { %v5926_v31 = vpop.f32.mrb[112].mxu1  ;;  %v5888_v39 = vadd.f32 %v5887_v49, %v5886_v12  ;;  %v5889_v56 = vpop.f32.mrb[114].mxu0 }
 0x213   : > { %v5927_v47 = vpop.f32.mrb[113].mxu1  ;;  %v5890_v41 = vpop.f32.mrb[115].mxu0 }
 0x214   : > { %v5928_v63 = vadd.f32 %v5927_v47, %v5926_v31  ;;  %v5929_v25 = vpop.f32.mrb[114].mxu1  ;;  %v4409_v26 = vadd.f32 %v5888_v39, %v4344_v27  ;;  %v5891_v34 = vadd.f32 %v5890_v41, %v5889_v56 }
 0x215   : > { %v5930_v14 = vpop.f32.mrb[115].mxu1 }
 0x216   : > { %v5931_v23 = vadd.f32 %v5930_v14, %v5929_v25  ;;  %v4474_v60 = vadd.f32 %v5928_v63, %v4409_v26  ;;  %v4412_v42 = vadd.f32 %v5891_v34, %v7233_v40 }
 0x218   : > { %v7245_v54 = vadd.f32 %v5931_v23, %v4412_v42  ;;  %v5892_v30 = vpop.f32.mrb[116].mxu0  ;;  %v7266_v23 = vld [vmem:[%s277_s6] ss:$0 sm:$0xff] }
 0x219   : > { %v5893_v44 = vpop.f32.mrb[117].mxu0 }
 0x21a   : > { %v5932_v51 = vpop.f32.mrb[116].mxu1  ;;  %v5894_v36 = vadd.f32 %v5893_v44, %v5892_v30  ;;  %v5895_v46 = vpop.f32.mrb[118].mxu0 }
 0x21b   : > { %v5933_v45 = vpop.f32.mrb[117].mxu1  ;;  %v5896_v38 = vpop.f32.mrb[119].mxu0 }
 0x21c   : > { %v5934_v48 = vadd.f32 %v5933_v45, %v5932_v51  ;;  %v5935_v53 = vpop.f32.mrb[118].mxu1  ;;  %v4417_v33 = vadd.f32 %v5894_v36, %v4352_v7  ;;  %v5897_v52 = vadd.f32 %v5896_v38, %v5895_v46 }
 0x21d   : > { %v5936_v27 = vpop.f32.mrb[119].mxu1 }
 0x21e   : > { %v5937_v55 = vadd.f32 %v5936_v27, %v5935_v53  ;;  %v7247_v37 = vadd.f32 %v5934_v48, %v4417_v33  ;;  %v4420_v58 = vadd.f32 %v5897_v52, %v7236_v57 }
 0x220   : > { %v7250_v40 = vadd.f32 %v5937_v55, %v4420_v58 }
 0x222   : > { %v5938_v15 = vpop.f32.mrb[120].mxu1 }
 0x223   : > { %v5939_v1 = vpop.f32.mrb[121].mxu1 }
 0x224   : > { %v5940_v4 = vadd.f32 %v5939_v1, %v5938_v15  ;;  %v5941_v8 = vpop.f32.mrb[122].mxu1 }
 0x225   : > { %v5942_v11 = vpop.f32.mrb[123].mxu1 }
 0x226   : > { %v5943_v16 = vadd.f32 %v5942_v11, %v5941_v8 }
 0x228   : > { %v5898_v59 = vpop.f32.mrb[120].mxu0 }
 0x229   : > { %v5899_v62 = vpop.f32.mrb[121].mxu0 }
 0x22a   : > { %v5900_v0 = vadd.f32 %v5899_v62, %v5898_v59  ;;  %v5901_v43 = vpop.f32.mrb[122].mxu0  ;;  %v5944_v20 = vpop.f32.mrb[124].mxu1 }
 0x22b   : > { %v5902_v61 = vpop.f32.mrb[123].mxu0  ;;  %v5945_v22 = vpop.f32.mrb[125].mxu1 }
 0x22c   : > { %v4425_v17 = vadd.f32 %v5900_v0, %v4360_v5  ;;  %v5903_v7 = vadd.f32 %v5902_v61, %v5901_v43  ;;  %v5946_v13 = vadd.f32 %v5945_v22, %v5944_v20  ;;  %v5947_v6 = vpop.f32.mrb[126].mxu1 }
 0x22d   : > { %v5948_v5 = vpop.f32.mrb[127].mxu1 }
 0x22e   : > { %v7252_v35 = vadd.f32 %v5940_v4, %v4425_v17  ;;  %v4428_v21 = vadd.f32 %v5903_v7, %v7239_v18  ;;  %v5949_v10 = vadd.f32 %v5948_v5, %v5947_v6 }
 0x230   : > { %v7255_v57 = vadd.f32 %v5943_v16, %v4428_v21  ;;  %v5904_v19 = vpop.f32.mrb[124].mxu0 }
 0x231   : > { %v5905_v32 = vpop.f32.mrb[125].mxu0 }
 0x232   : > { %v5906_v24 = vadd.f32 %v5905_v32, %v5904_v19  ;;  %v5907_v3 = vpop.f32.mrb[126].mxu0 }
 0x233   : > { %v5908_v50 = vpop.f32.mrb[127].mxu0 }
 0x234   : > { %v4433_v2 = vadd.f32 %v5906_v24, %v4368_v9  ;;  %v5909_v28 = vadd.f32 %v5908_v50, %v5907_v3 }
 0x236   : > { %v7257_v12 = vadd.f32 %v5946_v13, %v4433_v2  ;;  %v4436_v18 = vadd.f32 %v5909_v28, %v7242_v29 }
 0x237   : > { %v6006_v47 = vpop.f32.mrb[128].mxu1 }
 0x238   : > { %v7260_v31 = vadd.f32 %v5949_v10, %v4436_v18  ;;  %v5966_v49 = vpop.f32.mrb[128].mxu0  ;;  %v6007_v25 = vpop.f32.mrb[129].mxu1 }
 0x239   : > { %v5967_v39 = vpop.f32.mrb[129].mxu0  ;;  %v6008_v26 = vadd.f32 %v6007_v25, %v6006_v47  ;;  %v6009_v34 = vpop.f32.mrb[130].mxu1 }
 0x23a   : > { %v5968_v56 = vadd.f32 %v5967_v39, %v5966_v49  ;;  %v5969_v63 = vpop.f32.mrb[130].mxu0  ;;  %v6010_v29 = vpop.f32.mrb[131].mxu1 }
 0x23b   : > { %v5970_v9 = vpop.f32.mrb[131].mxu0  ;;  %v6011_v51 = vadd.f32 %v6010_v29, %v6009_v34 }
 0x23c   : > { %v4539_v41 = vadd.f32 %v5968_v56, %v4474_v60  ;;  %v5971_v14 = vadd.f32 %v5970_v9, %v5969_v63 }
 0x23e   : > { %v4604_v42 = vadd.f32 %v6008_v26, %v4539_v41  ;;  %v4542_v30 = vadd.f32 %v5971_v14, %v7245_v54 }
 0x23f   : > { %v6012_v48 = vpop.f32.mrb[132].mxu1 }
 0x240   : > { %vm4634_vm0 = vcmp.gt.f32.partialorder %v4604_v42, 0.0  ;;  %v4649_v44 = vmul.f32 %v7266_v23, %v4604_v42  ;;  %v4607_v36 = vadd.f32 %v6011_v51, %v4542_v30  ;;  %v5972_v45 = vpop.f32.mrb[132].mxu0  ;;  %v6013_v52 = vpop.f32.mrb[133].mxu1 }
 0x241   : > { %v5973_v46 = vpop.f32.mrb[133].mxu0  ;;  %v6014_v58 = vadd.f32 %v6013_v52, %v6012_v48  ;;  %v6015_v59 = vpop.f32.mrb[134].mxu1 }
 0x242   : > { %vm4635_vm1 = vcmp.gt.f32.partialorder %v4607_v36, 0.0  ;;  %v4650_v60 = vmul.f32 %v7266_v23, %v4607_v36  ;;  %v5974_v53 = vadd.f32 %v5973_v46, %v5972_v45  ;;  %v5975_v38 = vpop.f32.mrb[134].mxu0  ;;  %v4657_v33 = vsel %vm4634_vm0, %v4604_v42, %v4649_v44  ;;  %v6016_v0 = vpop.f32.mrb[135].mxu1 }
 0x243   : > { %v5976_v27 = vpop.f32.mrb[135].mxu0  ;;  %v6017_v4 = vadd.f32 %v6016_v0, %v6015_v59 }
 0x244   : > { %v4658_v54 = vsel %vm4635_vm1, %v4607_v36, %v4650_v60  ;;  %v4547_v55 = vadd.f32 %v5974_v53, %v7247_v37  ;;  %v5977_v15 = vadd.f32 %v5976_v27, %v5975_v38 }
 0x245   : > { %v5290_v62 = vpack.c.bf16 %v4658_v54, %v4657_v33 }
 0x246   : > { %v4612_v1 = vadd.f32 %v6014_v58, %v4547_v55  ;;  %v4550_v43 = vadd.f32 %v5977_v15, %v7250_v40 }
 0x247   : > { %5291 = vst [vmem:[%s7275_s10] sm:$0xff] %v5290_v62   ;;  %v6018_v37 = vpop.f32.mrb[136].mxu1 }
 0x248   : > { %vm4636_vm2 = vcmp.gt.f32.partialorder %v4612_v1, 0.0  ;;  %v4651_v8 = vmul.f32 %v7266_v23, %v4612_v1  ;;  %v4615_v61 = vadd.f32 %v6017_v4, %v4550_v43  ;;  %v5978_v17 = vpop.f32.mrb[136].mxu0  ;;  %v6019_v20 = vpop.f32.mrb[137].mxu1 }
 0x249   : > { %v5979_v7 = vpop.f32.mrb[137].mxu0  ;;  %v6020_v24 = vadd.f32 %v6019_v20, %v6018_v37  ;;  %v6021_v13 = vpop.f32.mrb[138].mxu1 }
 0x24a   : > { %vm4637_vm3 = vcmp.gt.f32.partialorder %v4615_v61, 0.0  ;;  %v4652_v11 = vmul.f32 %v7266_v23, %v4615_v61  ;;  %v5980_v16 = vadd.f32 %v5979_v7, %v5978_v17  ;;  %v5981_v21 = vpop.f32.mrb[138].mxu0  ;;  %v4659_v19 = vsel %vm4636_vm2, %v4612_v1, %v4651_v8  ;;  %v6022_v50 = vpop.f32.mrb[139].mxu1 }
 0x24b   : > { %v5982_v32 = vpop.f32.mrb[139].mxu0  ;;  %v6023_v28 = vadd.f32 %v6022_v50, %v6021_v13 }
 0x24c   : > { %v4660_v22 = vsel %vm4637_vm3, %v4615_v61, %v4652_v11  ;;  %v4555_v40 = vadd.f32 %v5980_v16, %v7252_v35  ;;  %v5983_v3 = vadd.f32 %v5982_v32, %v5981_v21 }
 0x24d   : > { %v5295_v6 = vpack.c.bf16 %v4660_v22, %v4659_v19 }
 0x24e   : > { %v4620_v5 = vadd.f32 %v6020_v24, %v4555_v40  ;;  %v4558_v2 = vadd.f32 %v5983_v3, %v7255_v57 }
 0x24f   : > { %5307 = vst [vmem:[%s7275_s10 + $0x8] sm:$0xff] %v5295_v6   ;;  %v6024_v35 = vpop.f32.mrb[140].mxu1 }
 0x250   : > { %vm4638_vm4 = vcmp.gt.f32.partialorder %v4620_v5, 0.0  ;;  %v4653_v10 = vmul.f32 %v7266_v23, %v4620_v5  ;;  %v4623_v18 = vadd.f32 %v6023_v28, %v4558_v2  ;;  %v5984_v49 = vpop.f32.mrb[140].mxu0  ;;  %v6025_v9 = vpop.f32.mrb[141].mxu1 }
 0x251   : > { %v5985_v39 = vpop.f32.mrb[141].mxu0  ;;  %v6026_v34 = vadd.f32 %v6025_v9, %v6024_v35  ;;  %v6027_v14 = vpop.f32.mrb[142].mxu1 }
 0x252   : > { %vm4639_vm5 = vcmp.gt.f32.partialorder %v4623_v18, 0.0  ;;  %v4654_v47 = vmul.f32 %v7266_v23, %v4623_v18  ;;  %v5986_v56 = vadd.f32 %v5985_v39, %v5984_v49  ;;  %v5987_v63 = vpop.f32.mrb[142].mxu0  ;;  %v4661_v25 = vsel %vm4638_vm4, %v4620_v5, %v4653_v10  ;;  %v6028_v30 = vpop.f32.mrb[143].mxu1 }
 0x253   : > { %v5988_v41 = vpop.f32.mrb[143].mxu0  ;;  %v6029_v36 = vadd.f32 %v6028_v30, %v6027_v14 }
 0x254   : > { %v4662_v26 = vsel %vm4639_vm5, %v4623_v18, %v4654_v47  ;;  %v4563_v57 = vadd.f32 %v5986_v56, %v7257_v12  ;;  %v5989_v29 = vadd.f32 %v5988_v41, %v5987_v63 }
 0x255   : > { %v5300_v42 = vpack.c.bf16 %v4662_v26, %v4661_v25 }
 0x256   : > { %v4628_v51 = vadd.f32 %v6026_v34, %v4563_v57  ;;  %v4566_v44 = vadd.f32 %v5989_v29, %v7260_v31 }
 0x257   : > { %5308 = vst [vmem:[%s7275_s10 + $0x10] sm:$0xff] %v5300_v42  }
 0x258   : > { %v4655_v45 = vmul.f32 %v7266_v23, %v4628_v51  ;;  %v4631_v46 = vadd.f32 %v6029_v36, %v4566_v44  ;;  %vm4640_vm6 = vcmp.gt.f32.partialorder %v4628_v51, 0.0 }
 0x25a   : > { %vm4641_vm7 = vcmp.gt.f32.partialorder %v4631_v46, 0.0  ;;  %v4656_v60 = vmul.f32 %v7266_v23, %v4631_v46  ;;  %v4663_v48 = vsel %vm4640_vm6, %v4628_v51, %v4655_v45 }
 0x25c   : > { %v4664_v12 = vsel %vm4641_vm7, %v4631_v46, %v4656_v60 }
 0x25d   : > { %v5305_v53 = vpack.c.bf16 %v4664_v12, %v4663_v48 }
 0x25f   : > { %5309 = vst [vmem:[%s7275_s10 + $0x18] sm:$0xff] %v5305_v53  }
 0x260 PF: > { %s14_s17 = sadd.s32 1, %s6582_s17   ;;  %s7307_s15 = smov %s6578_s16 }
 0x261   : > { %p11_p5 = scmp.ge.s32.totalorder %s14_s17, 8   ;;  %s7308_s16 = smov %s7310_s18 }
 0x263   :  { %13 = sbr.rel (!%p11_p5) target bundleno = 2 (0x2), region = 75 }

</bundles_post_ra>
